<compile_context>
chip_gen: v7x
topology: tpu7x:2x2x1
jax: 0.10.0
libtpu: 0.0.40
codegen_flags: <defaults>
</compile_context>

<pallas_src>
import jax
import jax.numpy as jnp
import numpy as np
from jax.experimental import pallas as pl
from jax.experimental.pallas import tpu as pltpu

EPS = 1e-5
MAX_TILE_M = 1024                 # rows (N*Ho*Wo) per grid step, multiple of 16
LANE = 128                        # lane width; channel / K padding granularity

_VMEM_LIMIT = None


def _round_up(x, m):
    return ((x + m - 1) // m) * m


def _pad2d(a, rows, cols):
    return jnp.pad(a, ((0, rows - a.shape[0]), (0, cols - a.shape[1])))


def _pad1d(a, n):
    return jnp.pad(a, (0, n - a.shape[0]))


def _compiler_params():
    global _VMEM_LIMIT
    if _VMEM_LIMIT is None:
        try:
            cap = int(pltpu.get_tpu_info().vmem_capacity_bytes)
        except Exception:
            cap = 64 * 1024 * 1024          # conservative (v7x-sized) fallback
        _VMEM_LIMIT = min((cap * 3) // 4, 112 * 1024 * 1024)
    return pltpu.CompilerParams(dimension_semantics=("parallel",),
                                vmem_limit_bytes=_VMEM_LIMIT)


# ----------------------------- kernels --------------------------------------

def make_conv_stats_kernel(prologue_flags):
    """Per (patches, weights) pair: [optional bn+relu prologue on the patches]
    -> bf16 MXU matmul (f32 accumulation) -> bf16 output tile + per-tile
    channel sum / sum-of-squares (XLU sublane reduction, MXU stays free)."""
    n_in = sum(4 if f else 2 for f in prologue_flags)

    def kernel(*refs):
        ins, outs = refs[:n_in], refs[n_in:]
        ii = 0
        for p_idx, fused in enumerate(prologue_flags):
            p_ref, w_ref = ins[ii], ins[ii + 1]
            ii += 2
            a = p_ref[...]
            if fused:
                sc_ref, sh_ref = ins[ii], ins[ii + 1]
                ii += 2
                # bn1 + ReLU fused into the conv2 matmul (VPU filler under MXU).
                a = jnp.maximum(a.astype(jnp.float32) * sc_ref[...] + sh_ref[...],
                                0.0).astype(jnp.bfloat16)
            y = jnp.dot(a, w_ref[...], preferred_element_type=jnp.float32)
            y_ref, s_ref, q_ref = outs[3 * p_idx], outs[3 * p_idx + 1], outs[3 * p_idx + 2]
            y_ref[...] = y.astype(y_ref.dtype)
            cpad = y.shape[-1]
            s_ref[...] = jnp.broadcast_to(jnp.sum(y, axis=0, keepdims=True), (8, cpad))
            q_ref[...] = jnp.broadcast_to(jnp.sum(y * y, axis=0, keepdims=True), (8, cpad))

    return kernel


def finalize_proj_kernel(c2_ref, s2_ref, b2_ref, cs_ref, ss_ref, bs_ref, out_ref):
    y = c2_ref[...].astype(jnp.float32) * s2_ref[...] + b2_ref[...]
    r = cs_ref[...].astype(jnp.float32) * ss_ref[...] + bs_ref[...]
    out_ref[...] = jnp.maximum(y + r, 0.0).astype(out_ref.dtype)


def finalize_identity_kernel(c2_ref, s2_ref, b2_ref, res_ref, out_ref):
    y = c2_ref[...].astype(jnp.float32) * s2_ref[...] + b2_ref[...] + res_ref[...]
    out_ref[...] = jnp.maximum(y, 0.0).astype(out_ref.dtype)


# --------------------------- pallas_call wrappers ----------------------------

def conv_stats_call(pairs, prologues, tile_m):
    """pairs: list of (patches (Mp, Kp) bf16, weights (Kp, Cp) bf16).
    prologues: per pair, None or (scale (1,Kp) f32, shift (1,Kp) f32).
    Returns per pair: (conv_out (Mp, Cp) bf16, sum (T*8, Cp) f32, sumsq)."""
    mp = pairs[0][0].shape[0]
    n_tiles = mp // tile_m
    flags = [p is not None for p in prologues]
    in_specs, args, out_shapes, out_specs = [], [], [], []
    for (patches, weights), pro in zip(pairs, prologues):
        kp, cpad = weights.shape
        args += [patches, weights]
        in_specs += [pl.BlockSpec((tile_m, kp), lambda i: (i, 0)),
                     pl.BlockSpec((kp, cpad), lambda i: (0, 0))]
        if pro is not None:
            args += [pro[0], pro[1]]
            in_specs += [pl.BlockSpec((1, kp), lambda i: (0, 0)),
                         pl.BlockSpec((1, kp), lambda i: (0, 0))]
        out_shapes += [jax.ShapeDtypeStruct((mp, cpad), jnp.bfloat16),
                       jax.ShapeDtypeStruct((n_tiles * 8, cpad), jnp.float32),
                       jax.ShapeDtypeStruct((n_tiles * 8, cpad), jnp.float32)]
        out_specs += [pl.BlockSpec((tile_m, cpad), lambda i: (i, 0)),
                      pl.BlockSpec((8, cpad), lambda i: (i, 0)),
                      pl.BlockSpec((8, cpad), lambda i: (i, 0))]
    outs = pl.pallas_call(
        make_conv_stats_kernel(flags),
        out_shape=tuple(out_shapes),
        grid_spec=pltpu.PrefetchScalarGridSpec(
            num_scalar_prefetch=0, grid=(n_tiles,),
            in_specs=in_specs, out_specs=tuple(out_specs)),
        compiler_params=_compiler_params(),
    )(*args)
    return [outs[3 * i:3 * i + 3] for i in range(len(pairs))]


def finalize_call(c2, scale2, shift2, tile_m, *, proj=None, res=None):
    mp, cpad = c2.shape
    n_tiles = mp // tile_m
    row = pl.BlockSpec((tile_m, cpad), lambda i: (i, 0))
    vec = pl.BlockSpec((1, cpad), lambda i: (0, 0))
    if proj is not None:
        cs, ss, bs = proj
        kernel = finalize_proj_kernel
        args = (c2, scale2, shift2, cs, ss, bs)
        in_specs = [row, vec, vec, row, vec, vec]
    else:
        kernel = finalize_identity_kernel
        args = (c2, scale2, shift2, res)
        in_specs = [row, vec, vec, row]
    return pl.pallas_call(
        kernel,
        out_shape=jax.ShapeDtypeStruct((mp, cpad), jnp.float32),
        grid_spec=pltpu.PrefetchScalarGridSpec(
            num_scalar_prefetch=0, grid=(n_tiles,),
            in_specs=in_specs,
            out_specs=pl.BlockSpec((tile_m, cpad), lambda i: (i, 0))),
        compiler_params=_compiler_params(),
    )(*args)


# ------------------------------ host helpers ---------------------------------

def finalize_stats(sum8, sq8, m_real, gamma_p, beta_p):
    """Reduce per-tile partial sums into (1, Cp) scale/shift: y*scale + shift.
    TODO(synk): E[x^2]-E[x]^2 can cancel catastrophically for activations with
    large mean/std ratio; fine for this block, revisit for real data."""
    c = sum8.shape[-1]
    s = sum8.reshape(-1, 8, c)[:, 0, :].sum(axis=0)
    q = sq8.reshape(-1, 8, c)[:, 0, :].sum(axis=0)
    mean = s / m_real
    var = jnp.maximum(q / m_real - mean * mean, 0.0)   # biased, training-mode
    scale = gamma_p * jax.lax.rsqrt(var + EPS)
    shift = beta_p - mean * scale
    return scale.reshape(1, -1), shift.reshape(1, -1)


def im2col_3x3(xp, stride):
    """xp: spatially padded NHWC (N, H+2, W+2, C). Returns (M, 9*C), Ho, Wo."""
    n, hp, wp, c = xp.shape
    ho = (hp - 3) // stride + 1
    wo = (wp - 3) // stride + 1
    cols = []
    for kh in range(3):
        for kw in range(3):
            sl = xp[:, kh:kh + (ho - 1) * stride + 1:stride,
                       kw:kw + (wo - 1) * stride + 1:stride, :]
            cols.append(sl.reshape(n * ho * wo, c))
    return jnp.concatenate(cols, axis=1), ho, wo


def fold_w3x3(w_oihw):
    """(O, I, 3, 3) -> (9*I, O), tap-major rows matching im2col_3x3."""
    o, i = w_oihw.shape[0], w_oihw.shape[1]
    return jnp.transpose(w_oihw, (2, 3, 1, 0)).reshape(9 * i, o)


def init_basic_block_params(key, in_planes, planes, stride):
    k1, k2, k3 = jax.random.split(key, 3)
    params = {
        "w1": jax.random.normal(k1, (planes, in_planes, 3, 3), jnp.float32) * 0.1,
        "g1": jnp.ones((planes,), jnp.float32),
        "b1": jnp.zeros((planes,), jnp.float32),
        "w2": jax.random.normal(k2, (planes, planes, 3, 3), jnp.float32) * 0.1,
        "g2": jnp.ones((planes,), jnp.float32),
        "b2": jnp.zeros((planes,), jnp.float32),
    }
    if stride != 1 or in_planes != planes:
        params["ws"] = jax.random.normal(k3, (planes, in_planes, 1, 1),
                                         jnp.float32) * 0.1
        params["gs"] = jnp.ones((planes,), jnp.float32)
        params["bs"] = jnp.zeros((planes,), jnp.float32)
    return params


def basic_block_forward(x_nchw, params, stride):
    x = jnp.transpose(x_nchw, (0, 2, 3, 1)).astype(jnp.float32)   # NHWC
    n, h, w, cin = x.shape
    planes = params["w1"].shape[0]
    cp = _round_up(planes, LANE)
    has_proj = (stride != 1) or (cin != planes)

    # ---- call 1: conv1 (+ fused 1x1 projection shortcut) as tiled matmuls ----
    xp = jnp.pad(x, ((0, 0), (1, 1), (1, 1), (0, 0)))
    p1, ho, wo = im2col_3x3(xp, stride)
    m = n * ho * wo
    tile_m = min(MAX_TILE_M, _round_up(m, 16))
    mp = _round_up(m, tile_m)

    k1p = _round_up(9 * cin, LANE)
    p1 = _pad2d(p1, mp, k1p).astype(jnp.bfloat16)
    w1 = _pad2d(fold_w3x3(params["w1"]), k1p, cp).astype(jnp.bfloat16)
    pairs, pros = [(p1, w1)], [None]
    if has_proj:
        ksp = _round_up(cin, LANE)
        xs = x[:, ::stride, ::stride, :].reshape(m, cin)
        xs = _pad2d(xs, mp, ksp).astype(jnp.bfloat16)
        ws = _pad2d(jnp.transpose(params["ws"][:, :, 0, 0], (1, 0)),
                    ksp, cp).astype(jnp.bfloat16)
        pairs.append((xs, ws))
        pros.append(None)

    results = conv_stats_call(pairs, pros, tile_m)
    c1, sum1, sq1 = results[0]
    scale1, shift1 = finalize_stats(sum1, sq1, m,
                                    _pad1d(params["g1"], cp),
                                    _pad1d(params["b1"], cp))

    # ---- call 2: conv2 matmul with bn1+ReLU fused as an in-kernel prologue ----
    s1 = scale1[0, :planes]
    b1 = shift1[0, :planes]
    # Halo pixels must be exactly 0 AFTER bn1+ReLU: pad c1 with +/-inf so the
    # prologue's ReLU clamps them to 0 exactly (no bf16 rounding leakage).
    pad_vec = jnp.where(s1 > 0, -jnp.inf,
                        jnp.where(s1 < 0, jnp.inf, 0.0)).astype(jnp.bfloat16)
    c1_img = c1[:m, :planes].reshape(n, ho, wo, planes)
    img = jnp.broadcast_to(pad_vec, (n, ho + 2, wo + 2, planes))
    img = img.at[:, 1:-1, 1:-1, :].set(c1_img)
    p2, _, _ = im2col_3x3(img, 1)                       # (m, 9*planes) bf16
    k2 = 9 * planes
    k2p = _round_up(k2, LANE)
    p2 = jnp.pad(p2, ((0, 0), (0, k2p - k2)))
    if mp > m:
        # Padded M rows also map to 0 through the prologue -> no stats pollution.
        pad_row = jnp.pad(jnp.tile(pad_vec, 9), (0, k2p - k2)).reshape(1, k2p)
        p2 = jnp.concatenate(
            [p2, jnp.broadcast_to(pad_row, (mp - m, k2p))], axis=0)
    scale9 = jnp.pad(jnp.tile(s1, 9), (0, k2p - k2)).reshape(1, k2p)
    shift9 = jnp.pad(jnp.tile(b1, 9), (0, k2p - k2)).reshape(1, k2p)
    w2 = _pad2d(fold_w3x3(params["w2"]), k2p, cp).astype(jnp.bfloat16)

    (c2, sum2, sq2), = conv_stats_call([(p2, w2)], [(scale9, shift9)], tile_m)
    scale2, shift2 = finalize_stats(sum2, sq2, m,
                                    _pad1d(params["g2"], cp),
                                    _pad1d(params["b2"], cp))

    # ---- call 3: bn2 + shortcut-bn + residual add + ReLU (fused epilogue) ----
    if has_proj:
        cs, sums, sqs = results[1]
        scales, shifts = finalize_stats(sums, sqs, m,
                                        _pad1d(params["gs"], cp),
                                        _pad1d(params["bs"], cp))
        out = finalize_call(c2, scale2, shift2, tile_m, proj=(cs, scales, shifts))
    else:
        res = _pad2d(x.reshape(m, cin), mp, cp)
        out = finalize_call(c2, scale2, shift2, tile_m, res=res)

    out = out[:m, :planes].reshape(n, ho, wo, planes)
    # TODO(synk): keep NHWC end-to-end when the consumer allows; the module's
    # contract is NCHW so we transpose back here.
    return jnp.transpose(out, (0, 3, 1, 2))


def reference_forward(x_nchw, params, stride):
    """Pure-JAX reference. Convolutions consume bf16 operands with f32
    accumulation (matching the Pallas kernels); BN / add / relu stay f32."""
    def conv(x, w, s, pad):
        return jax.lax.conv_general_dilated(
            x.astype(jnp.bfloat16), w.astype(jnp.bfloat16),
            window_strides=(s, s), padding=pad,
            dimension_numbers=("NCHW", "OIHW", "NCHW"),
            preferred_element_type=jnp.float32)

    def bn(y, g, b):
        mean = jnp.mean(y, axis=(0, 2, 3), keepdims=True)
        var = jnp.mean((y - mean) ** 2, axis=(0, 2, 3), keepdims=True)
        return ((y - mean) * jax.lax.rsqrt(var + EPS)
                * g.reshape(1, -1, 1, 1) + b.reshape(1, -1, 1, 1))

    h1 = jax.nn.relu(bn(conv(x_nchw, params["w1"], stride, ((1, 1), (1, 1))),
                        params["g1"], params["b1"]))
    h2 = bn(conv(h1, params["w2"], 1, ((1, 1), (1, 1))), params["g2"], params["b2"])
    if "ws" in params:
        sc = bn(conv(x_nchw, params["ws"], stride, "VALID"),
                params["gs"], params["bs"])
    else:
        sc = x_nchw
    return jax.nn.relu(h2 + sc)


if __name__ == "__main__":
    key = jax.random.PRNGKey(0)
    fwd = jax.jit(basic_block_forward, static_argnums=2)
    configs = [
        (8, 16, 1),    # channel expansion -> projection shortcut
        (16, 16, 2),   # stride-2 downsample -> projection shortcut
        (16, 16, 1),   # identity shortcut
    ]
    for in_planes, planes, stride in configs:
        key, kx, kp = jax.random.split(key, 3)
        x = jax.random.normal(kx, (2, in_planes, 16, 16), jnp.float32)  # NCHW
        params = init_basic_block_params(kp, in_planes, planes, stride)

        out = jax.block_until_ready(fwd(x, params, stride))
        ref = reference_forward(x, params, stride)
        assert out.shape == ref.shape, (out.shape, ref.shape)
        # bf16 matmul operands + bf16 stored intermediates (f32 accumulation /
        # f32 BN stats) in the Pallas path -> ~2e-2 tolerance budget.
        if not np.allclose(np.asarray(out), np.asarray(ref), atol=2e-2, rtol=2e-2):
            err = float(np.max(np.abs(np.asarray(out) - np.asarray(ref))))
            raise AssertionError(
                f"Pallas BasicBlock mismatch (in={in_planes}, planes={planes}, "
                f"stride={stride}): max abs err {err}")
    print("KERNEL_OK")
</pallas_src>

<mosaic_0001>
module attributes {stable_mosaic.version = 11 : i64} {
  func.func @kernel(%arg0: i32, %arg1: memref<512x128xbf16, #tpu.memory_space<vmem>>, %arg2: memref<128x128xbf16, #tpu.memory_space<vmem>>, %arg3: memref<512x128xbf16, #tpu.memory_space<vmem>>, %arg4: memref<128x128xbf16, #tpu.memory_space<vmem>>, %arg5: memref<512x128xbf16, #tpu.memory_space<vmem>>, %arg6: memref<8x128xf32, #tpu.memory_space<vmem>>, %arg7: memref<8x128xf32, #tpu.memory_space<vmem>>, %arg8: memref<512x128xbf16, #tpu.memory_space<vmem>>, %arg9: memref<8x128xf32, #tpu.memory_space<vmem>>, %arg10: memref<8x128xf32, #tpu.memory_space<vmem>>) attributes {dimension_semantics = [#tpu.dimension_semantics<parallel>], iteration_bounds = array<i64: 1>, scalar_prefetch = 0 : i64, scratch_operands = 0 : i64, tpu.core_type = #tpu.core_type<tc>, window_params = [{transform_indices = @transform_0, window_bounds = array<i64: 512, 128>}, {pipeline_mode = #tpu.pipeline_mode<synchronous>, transform_indices = @transform_1, window_bounds = array<i64: 128, 128>}, {transform_indices = @transform_2, window_bounds = array<i64: 512, 128>}, {pipeline_mode = #tpu.pipeline_mode<synchronous>, transform_indices = @transform_3, window_bounds = array<i64: 128, 128>}, {transform_indices = @transform_4, window_bounds = array<i64: 512, 128>}, {transform_indices = @transform_5, window_bounds = array<i64: 8, 128>}, {transform_indices = @transform_6, window_bounds = array<i64: 8, 128>}, {transform_indices = @transform_7, window_bounds = array<i64: 512, 128>}, {transform_indices = @transform_8, window_bounds = array<i64: 8, 128>}, {transform_indices = @transform_9, window_bounds = array<i64: 8, 128>}]} {
    %c0 = arith.constant 0 : index
    %c0_0 = arith.constant 0 : index
    %0 = vector.load %arg1[%c0, %c0_0] : memref<512x128xbf16, #tpu.memory_space<vmem>>, vector<512x128xbf16>
    %c0_1 = arith.constant 0 : index
    %c0_2 = arith.constant 0 : index
    %1 = vector.load %arg2[%c0_1, %c0_2] : memref<128x128xbf16, #tpu.memory_space<vmem>>, vector<128x128xbf16>
    %cst = arith.constant dense<0.000000e+00> : vector<512x128xf32>
    %2 = tpu.matmul %0, %1, %cst {dimension_numbers = #tpu.dot_dimension_numbers<[1], [0], [0], [1], [0, 0, 1, 1], [], []>} : vector<512x128xbf16>, vector<128x128xbf16>, vector<512x128xf32> -> vector<512x128xf32>
    %3 = arith.truncf %2 : vector<512x128xf32> to vector<512x128xbf16>
    %c0_3 = arith.constant 0 : index
    %c0_4 = arith.constant 0 : index
    %4 = vector.load %arg5[%c0_3, %c0_4] : memref<512x128xbf16, #tpu.memory_space<vmem>>, vector<512x128xbf16>
    tpu.vector_store %arg5[%c0_3, %c0_4], %3 {strides = array<i32>} : memref<512x128xbf16, #tpu.memory_space<vmem>>, vector<512x128xbf16>,
    %cst_5 = arith.constant dense<0.000000e+00> : vector<128xf32>
    %5 = vector.multi_reduction <add>, %2, %cst_5 [0] : vector<512x128xf32> to vector<128xf32>
    %6 = vector.shape_cast %5 : vector<128xf32> to vector<1x128xf32>
    %7 = vector.shape_cast %6 : vector<1x128xf32> to vector<1x128xf32>
    %8 = vector.broadcast %7 : vector<1x128xf32> to vector<8x128xf32>
    %c0_6 = arith.constant 0 : index
    %c0_7 = arith.constant 0 : index
    %9 = vector.load %arg6[%c0_6, %c0_7] : memref<8x128xf32, #tpu.memory_space<vmem>>, vector<8x128xf32>
    tpu.vector_store %arg6[%c0_6, %c0_7], %8 {strides = array<i32>} : memref<8x128xf32, #tpu.memory_space<vmem>>, vector<8x128xf32>,
    %10 = arith.mulf %2, %2 : vector<512x128xf32>
    %cst_8 = arith.constant dense<0.000000e+00> : vector<128xf32>
    %11 = vector.multi_reduction <add>, %10, %cst_8 [0] : vector<512x128xf32> to vector<128xf32>
    %12 = vector.shape_cast %11 : vector<128xf32> to vector<1x128xf32>
    %13 = vector.shape_cast %12 : vector<1x128xf32> to vector<1x128xf32>
    %14 = vector.broadcast %13 : vector<1x128xf32> to vector<8x128xf32>
    %c0_9 = arith.constant 0 : index
    %c0_10 = arith.constant 0 : index
    %15 = vector.load %arg7[%c0_9, %c0_10] : memref<8x128xf32, #tpu.memory_space<vmem>>, vector<8x128xf32>
    tpu.vector_store %arg7[%c0_9, %c0_10], %14 {strides = array<i32>} : memref<8x128xf32, #tpu.memory_space<vmem>>, vector<8x128xf32>,
    %c0_11 = arith.constant 0 : index
    %c0_12 = arith.constant 0 : index
    %16 = vector.load %arg3[%c0_11, %c0_12] : memref<512x128xbf16, #tpu.memory_space<vmem>>, vector<512x128xbf16>
    %c0_13 = arith.constant 0 : index
    %c0_14 = arith.constant 0 : index
    %17 = vector.load %arg4[%c0_13, %c0_14] : memref<128x128xbf16, #tpu.memory_space<vmem>>, vector<128x128xbf16>
    %cst_15 = arith.constant dense<0.000000e+00> : vector<512x128xf32>
    %18 = tpu.matmul %16, %17, %cst_15 {dimension_numbers = #tpu.dot_dimension_numbers<[1], [0], [0], [1], [0, 0, 1, 1], [], []>} : vector<512x128xbf16>, vector<128x128xbf16>, vector<512x128xf32> -> vector<512x128xf32>
    %19 = arith.truncf %18 : vector<512x128xf32> to vector<512x128xbf16>
    %c0_16 = arith.constant 0 : index
    %c0_17 = arith.constant 0 : index
    %20 = vector.load %arg8[%c0_16, %c0_17] : memref<512x128xbf16, #tpu.memory_space<vmem>>, vector<512x128xbf16>
    tpu.vector_store %arg8[%c0_16, %c0_17], %19 {strides = array<i32>} : memref<512x128xbf16, #tpu.memory_space<vmem>>, vector<512x128xbf16>,
    %cst_18 = arith.constant dense<0.000000e+00> : vector<128xf32>
    %21 = vector.multi_reduction <add>, %18, %cst_18 [0] : vector<512x128xf32> to vector<128xf32>
    %22 = vector.shape_cast %21 : vector<128xf32> to vector<1x128xf32>
    %23 = vector.shape_cast %22 : vector<1x128xf32> to vector<1x128xf32>
    %24 = vector.broadcast %23 : vector<1x128xf32> to vector<8x128xf32>
    %c0_19 = arith.constant 0 : index
    %c0_20 = arith.constant 0 : index
    %25 = vector.load %arg9[%c0_19, %c0_20] : memref<8x128xf32, #tpu.memory_space<vmem>>, vector<8x128xf32>
    tpu.vector_store %arg9[%c0_19, %c0_20], %24 {strides = array<i32>} : memref<8x128xf32, #tpu.memory_space<vmem>>, vector<8x128xf32>,
    %26 = arith.mulf %18, %18 : vector<512x128xf32>
    %cst_21 = arith.constant dense<0.000000e+00> : vector<128xf32>
    %27 = vector.multi_reduction <add>, %26, %cst_21 [0] : vector<512x128xf32> to vector<128xf32>
    %28 = vector.shape_cast %27 : vector<128xf32> to vector<1x128xf32>
    %29 = vector.shape_cast %28 : vector<1x128xf32> to vector<1x128xf32>
    %30 = vector.broadcast %29 : vector<1x128xf32> to vector<8x128xf32>
    %c0_22 = arith.constant 0 : index
    %c0_23 = arith.constant 0 : index
    %31 = vector.load %arg10[%c0_22, %c0_23] : memref<8x128xf32, #tpu.memory_space<vmem>>, vector<8x128xf32>
    tpu.vector_store %arg10[%c0_22, %c0_23], %30 {strides = array<i32>} : memref<8x128xf32, #tpu.memory_space<vmem>>, vector<8x128xf32>,
    return
  }
  func.func @transform_0(%arg0: i32) -> (i32, i32) {
    %c0_i32 = arith.constant 0 : i32
    %c0_i32_0 = arith.constant 0 : i32
    return %arg0, %c0_i32 : i32, i32
  }
  func.func @transform_1(%arg0: i32) -> (i32, i32) {
    %c0_i32 = arith.constant 0 : i32
    %c0_i32_0 = arith.constant 0 : i32
    %c0_i32_1 = arith.constant 0 : i32
    return %c0_i32, %c0_i32_0 : i32, i32
  }
  func.func @transform_2(%arg0: i32) -> (i32, i32) {
    %c0_i32 = arith.constant 0 : i32
    %c0_i32_0 = arith.constant 0 : i32
    return %arg0, %c0_i32 : i32, i32
  }
  func.func @transform_3(%arg0: i32) -> (i32, i32) {
    %c0_i32 = arith.constant 0 : i32
    %c0_i32_0 = arith.constant 0 : i32
    %c0_i32_1 = arith.constant 0 : i32
    return %c0_i32, %c0_i32_0 : i32, i32
  }
  func.func @transform_4(%arg0: i32) -> (i32, i32) {
    %c0_i32 = arith.constant 0 : i32
    %c0_i32_0 = arith.constant 0 : i32
    return %arg0, %c0_i32 : i32, i32
  }
  func.func @transform_5(%arg0: i32) -> (i32, i32) {
    %c0_i32 = arith.constant 0 : i32
    %c0_i32_0 = arith.constant 0 : i32
    return %arg0, %c0_i32 : i32, i32
  }
  func.func @transform_6(%arg0: i32) -> (i32, i32) {
    %c0_i32 = arith.constant 0 : i32
    %c0_i32_0 = arith.constant 0 : i32
    return %arg0, %c0_i32 : i32, i32
  }
  func.func @transform_7(%arg0: i32) -> (i32, i32) {
    %c0_i32 = arith.constant 0 : i32
    %c0_i32_0 = arith.constant 0 : i32
    return %arg0, %c0_i32 : i32, i32
  }
  func.func @transform_8(%arg0: i32) -> (i32, i32) {
    %c0_i32 = arith.constant 0 : i32
    %c0_i32_0 = arith.constant 0 : i32
    return %arg0, %c0_i32 : i32, i32
  }
  func.func @transform_9(%arg0: i32) -> (i32, i32) {
    %c0_i32 = arith.constant 0 : i32
    %c0_i32_0 = arith.constant 0 : i32
    return %arg0, %c0_i32 : i32, i32
  }
}

module attributes {stable_mosaic.version = 11 : i64} {
  func.func @kernel(%arg0: i32, %arg1: memref<512x256xbf16, #tpu.memory_space<vmem>>, %arg2: memref<256x128xbf16, #tpu.memory_space<vmem>>, %arg3: memref<1x256xf32, #tpu.memory_space<vmem>>, %arg4: memref<1x256xf32, #tpu.memory_space<vmem>>, %arg5: memref<512x128xbf16, #tpu.memory_space<vmem>>, %arg6: memref<8x128xf32, #tpu.memory_space<vmem>>, %arg7: memref<8x128xf32, #tpu.memory_space<vmem>>) attributes {dimension_semantics = [#tpu.dimension_semantics<parallel>], iteration_bounds = array<i64: 1>, scalar_prefetch = 0 : i64, scratch_operands = 0 : i64, tpu.core_type = #tpu.core_type<tc>, window_params = [{transform_indices = @transform_0, window_bounds = array<i64: 512, 256>}, {pipeline_mode = #tpu.pipeline_mode<synchronous>, transform_indices = @transform_1, window_bounds = array<i64: 256, 128>}, {pipeline_mode = #tpu.pipeline_mode<synchronous>, transform_indices = @transform_2, window_bounds = array<i64: 1, 256>}, {pipeline_mode = #tpu.pipeline_mode<synchronous>, transform_indices = @transform_3, window_bounds = array<i64: 1, 256>}, {transform_indices = @transform_4, window_bounds = array<i64: 512, 128>}, {transform_indices = @transform_5, window_bounds = array<i64: 8, 128>}, {transform_indices = @transform_6, window_bounds = array<i64: 8, 128>}]} {
    %c0 = arith.constant 0 : index
    %c0_0 = arith.constant 0 : index
    %0 = vector.load %arg1[%c0, %c0_0] : memref<512x256xbf16, #tpu.memory_space<vmem>>, vector<512x256xbf16>
    %1 = arith.extf %0 : vector<512x256xbf16> to vector<512x256xf32>
    %c0_1 = arith.constant 0 : index
    %c0_2 = arith.constant 0 : index
    %2 = vector.load %arg3[%c0_1, %c0_2] : memref<1x256xf32, #tpu.memory_space<vmem>>, vector<1x256xf32>
    %3 = vector.broadcast %2 : vector<1x256xf32> to vector<512x256xf32>
    %4 = arith.mulf %1, %3 : vector<512x256xf32>
    %c0_3 = arith.constant 0 : index
    %c0_4 = arith.constant 0 : index
    %5 = vector.load %arg4[%c0_3, %c0_4] : memref<1x256xf32, #tpu.memory_space<vmem>>, vector<1x256xf32>
    %6 = vector.broadcast %5 : vector<1x256xf32> to vector<512x256xf32>
    %7 = arith.addf %4, %6 : vector<512x256xf32>
    %cst = arith.constant 0.000000e+00 : f32
    %8 = vector.broadcast %cst : f32 to vector<512x256xf32>
    %9 = arith.maximumf %7, %8 : vector<512x256xf32>
    %10 = arith.truncf %9 : vector<512x256xf32> to vector<512x256xbf16>
    %c0_5 = arith.constant 0 : index
    %c0_6 = arith.constant 0 : index
    %11 = vector.load %arg2[%c0_5, %c0_6] : memref<256x128xbf16, #tpu.memory_space<vmem>>, vector<256x128xbf16>
    %cst_7 = arith.constant dense<0.000000e+00> : vector<512x128xf32>
    %12 = tpu.matmul %10, %11, %cst_7 {dimension_numbers = #tpu.dot_dimension_numbers<[1], [0], [0], [1], [0, 0, 1, 1], [], []>} : vector<512x256xbf16>, vector<256x128xbf16>, vector<512x128xf32> -> vector<512x128xf32>
    %13 = arith.truncf %12 : vector<512x128xf32> to vector<512x128xbf16>
    %c0_8 = arith.constant 0 : index
    %c0_9 = arith.constant 0 : index
    %14 = vector.load %arg5[%c0_8, %c0_9] : memref<512x128xbf16, #tpu.memory_space<vmem>>, vector<512x128xbf16>
    tpu.vector_store %arg5[%c0_8, %c0_9], %13 {strides = array<i32>} : memref<512x128xbf16, #tpu.memory_space<vmem>>, vector<512x128xbf16>,
    %cst_10 = arith.constant dense<0.000000e+00> : vector<128xf32>
    %15 = vector.multi_reduction <add>, %12, %cst_10 [0] : vector<512x128xf32> to vector<128xf32>
    %16 = vector.shape_cast %15 : vector<128xf32> to vector<1x128xf32>
    %17 = vector.shape_cast %16 : vector<1x128xf32> to vector<1x128xf32>
    %18 = vector.broadcast %17 : vector<1x128xf32> to vector<8x128xf32>
    %c0_11 = arith.constant 0 : index
    %c0_12 = arith.constant 0 : index
    %19 = vector.load %arg6[%c0_11, %c0_12] : memref<8x128xf32, #tpu.memory_space<vmem>>, vector<8x128xf32>
    tpu.vector_store %arg6[%c0_11, %c0_12], %18 {strides = array<i32>} : memref<8x128xf32, #tpu.memory_space<vmem>>, vector<8x128xf32>,
    %20 = arith.mulf %12, %12 : vector<512x128xf32>
    %cst_13 = arith.constant dense<0.000000e+00> : vector<128xf32>
    %21 = vector.multi_reduction <add>, %20, %cst_13 [0] : vector<512x128xf32> to vector<128xf32>
    %22 = vector.shape_cast %21 : vector<128xf32> to vector<1x128xf32>
    %23 = vector.shape_cast %22 : vector<1x128xf32> to vector<1x128xf32>
    %24 = vector.broadcast %23 : vector<1x128xf32> to vector<8x128xf32>
    %c0_14 = arith.constant 0 : index
    %c0_15 = arith.constant 0 : index
    %25 = vector.load %arg7[%c0_14, %c0_15] : memref<8x128xf32, #tpu.memory_space<vmem>>, vector<8x128xf32>
    tpu.vector_store %arg7[%c0_14, %c0_15], %24 {strides = array<i32>} : memref<8x128xf32, #tpu.memory_space<vmem>>, vector<8x128xf32>,
    return
  }
  func.func @transform_0(%arg0: i32) -> (i32, i32) {
    %c0_i32 = arith.constant 0 : i32
    %c0_i32_0 = arith.constant 0 : i32
    return %arg0, %c0_i32 : i32, i32
  }
  func.func @transform_1(%arg0: i32) -> (i32, i32) {
    %c0_i32 = arith.constant 0 : i32
    %c0_i32_0 = arith.constant 0 : i32
    %c0_i32_1 = arith.constant 0 : i32
    return %c0_i32, %c0_i32_0 : i32, i32
  }
  func.func @transform_2(%arg0: i32) -> (i32, i32) {
    %c0_i32 = arith.constant 0 : i32
    %c0_i32_0 = arith.constant 0 : i32
    %c0_i32_1 = arith.constant 0 : i32
    return %c0_i32, %c0_i32_0 : i32, i32
  }
  func.func @transform_3(%arg0: i32) -> (i32, i32) {
    %c0_i32 = arith.constant 0 : i32
    %c0_i32_0 = arith.constant 0 : i32
    %c0_i32_1 = arith.constant 0 : i32
    return %c0_i32, %c0_i32_0 : i32, i32
  }
  func.func @transform_4(%arg0: i32) -> (i32, i32) {
    %c0_i32 = arith.constant 0 : i32
    %c0_i32_0 = arith.constant 0 : i32
    return %arg0, %c0_i32 : i32, i32
  }
  func.func @transform_5(%arg0: i32) -> (i32, i32) {
    %c0_i32 = arith.constant 0 : i32
    %c0_i32_0 = arith.constant 0 : i32
    return %arg0, %c0_i32 : i32, i32
  }
  func.func @transform_6(%arg0: i32) -> (i32, i32) {
    %c0_i32 = arith.constant 0 : i32
    %c0_i32_0 = arith.constant 0 : i32
    return %arg0, %c0_i32 : i32, i32
  }
}

module attributes {stable_mosaic.version = 11 : i64} {
  func.func @finalize_proj_kernel(%arg0: i32, %arg1: memref<512x128xbf16, #tpu.memory_space<vmem>>, %arg2: memref<1x128xf32, #tpu.memory_space<vmem>>, %arg3: memref<1x128xf32, #tpu.memory_space<vmem>>, %arg4: memref<512x128xbf16, #tpu.memory_space<vmem>>, %arg5: memref<1x128xf32, #tpu.memory_space<vmem>>, %arg6: memref<1x128xf32, #tpu.memory_space<vmem>>, %arg7: memref<512x128xf32, #tpu.memory_space<vmem>>) attributes {dimension_semantics = [#tpu.dimension_semantics<parallel>], iteration_bounds = array<i64: 1>, scalar_prefetch = 0 : i64, scratch_operands = 0 : i64, tpu.core_type = #tpu.core_type<tc>, window_params = [{transform_indices = @transform_0, window_bounds = array<i64: 512, 128>}, {pipeline_mode = #tpu.pipeline_mode<synchronous>, transform_indices = @transform_1, window_bounds = array<i64: 1, 128>}, {pipeline_mode = #tpu.pipeline_mode<synchronous>, transform_indices = @transform_2, window_bounds = array<i64: 1, 128>}, {transform_indices = @transform_3, window_bounds = array<i64: 512, 128>}, {pipeline_mode = #tpu.pipeline_mode<synchronous>, transform_indices = @transform_4, window_bounds = array<i64: 1, 128>}, {pipeline_mode = #tpu.pipeline_mode<synchronous>, transform_indices = @transform_5, window_bounds = array<i64: 1, 128>}, {transform_indices = @transform_6, window_bounds = array<i64: 512, 128>}]} {
    %c0 = arith.constant 0 : index
    %c0_0 = arith.constant 0 : index
    %0 = vector.load %arg1[%c0, %c0_0] : memref<512x128xbf16, #tpu.memory_space<vmem>>, vector<512x128xbf16>
    %1 = arith.extf %0 : vector<512x128xbf16> to vector<512x128xf32>
    %c0_1 = arith.constant 0 : index
    %c0_2 = arith.constant 0 : index
    %2 = vector.load %arg2[%c0_1, %c0_2] : memref<1x128xf32, #tpu.memory_space<vmem>>, vector<1x128xf32>
    %3 = vector.broadcast %2 : vector<1x128xf32> to vector<512x128xf32>
    %4 = arith.mulf %1, %3 : vector<512x128xf32>
    %c0_3 = arith.constant 0 : index
    %c0_4 = arith.constant 0 : index
    %5 = vector.load %arg3[%c0_3, %c0_4] : memref<1x128xf32, #tpu.memory_space<vmem>>, vector<1x128xf32>
    %6 = vector.broadcast %5 : vector<1x128xf32> to vector<512x128xf32>
    %7 = arith.addf %4, %6 : vector<512x128xf32>
    %c0_5 = arith.constant 0 : index
    %c0_6 = arith.constant 0 : index
    %8 = vector.load %arg4[%c0_5, %c0_6] : memref<512x128xbf16, #tpu.memory_space<vmem>>, vector<512x128xbf16>
    %9 = arith.extf %8 : vector<512x128xbf16> to vector<512x128xf32>
    %c0_7 = arith.constant 0 : index
    %c0_8 = arith.constant 0 : index
    %10 = vector.load %arg5[%c0_7, %c0_8] : memref<1x128xf32, #tpu.memory_space<vmem>>, vector<1x128xf32>
    %11 = vector.broadcast %10 : vector<1x128xf32> to vector<512x128xf32>
    %12 = arith.mulf %9, %11 : vector<512x128xf32>
    %c0_9 = arith.constant 0 : index
    %c0_10 = arith.constant 0 : index
    %13 = vector.load %arg6[%c0_9, %c0_10] : memref<1x128xf32, #tpu.memory_space<vmem>>, vector<1x128xf32>
    %14 = vector.broadcast %13 : vector<1x128xf32> to vector<512x128xf32>
    %15 = arith.addf %12, %14 : vector<512x128xf32>
    %16 = arith.addf %7, %15 : vector<512x128xf32>
    %cst = arith.constant 0.000000e+00 : f32
    %17 = vector.broadcast %cst : f32 to vector<512x128xf32>
    %18 = arith.maximumf %16, %17 : vector<512x128xf32>
    %c0_11 = arith.constant 0 : index
    %c0_12 = arith.constant 0 : index
    %19 = vector.load %arg7[%c0_11, %c0_12] : memref<512x128xf32, #tpu.memory_space<vmem>>, vector<512x128xf32>
    tpu.vector_store %arg7[%c0_11, %c0_12], %18 {strides = array<i32>} : memref<512x128xf32, #tpu.memory_space<vmem>>, vector<512x128xf32>,
    return
  }
  func.func @transform_0(%arg0: i32) -> (i32, i32) {
    %c0_i32 = arith.constant 0 : i32
    %c0_i32_0 = arith.constant 0 : i32
    return %arg0, %c0_i32 : i32, i32
  }
  func.func @transform_1(%arg0: i32) -> (i32, i32) {
    %c0_i32 = arith.constant 0 : i32
    %c0_i32_0 = arith.constant 0 : i32
    %c0_i32_1 = arith.constant 0 : i32
    return %c0_i32, %c0_i32_0 : i32, i32
  }
  func.func @transform_2(%arg0: i32) -> (i32, i32) {
    %c0_i32 = arith.constant 0 : i32
    %c0_i32_0 = arith.constant 0 : i32
    %c0_i32_1 = arith.constant 0 : i32
    return %c0_i32, %c0_i32_0 : i32, i32
  }
  func.func @transform_3(%arg0: i32) -> (i32, i32) {
    %c0_i32 = arith.constant 0 : i32
    %c0_i32_0 = arith.constant 0 : i32
    return %arg0, %c0_i32 : i32, i32
  }
  func.func @transform_4(%arg0: i32) -> (i32, i32) {
    %c0_i32 = arith.constant 0 : i32
    %c0_i32_0 = arith.constant 0 : i32
    %c0_i32_1 = arith.constant 0 : i32
    return %c0_i32, %c0_i32_0 : i32, i32
  }
  func.func @transform_5(%arg0: i32) -> (i32, i32) {
    %c0_i32 = arith.constant 0 : i32
    %c0_i32_0 = arith.constant 0 : i32
    %c0_i32_1 = arith.constant 0 : i32
    return %c0_i32, %c0_i32_0 : i32, i32
  }
  func.func @transform_6(%arg0: i32) -> (i32, i32) {
    %c0_i32 = arith.constant 0 : i32
    %c0_i32_0 = arith.constant 0 : i32
    return %arg0, %c0_i32 : i32, i32
  }
}

</mosaic_0001>

<bundles_post_ra>
// kernel: basic_block_forward.3
= control target key start
LH: loop header
LB: loop body
LE: loop exit
PB: predicated region body
PF: predicated region fallthrough
CT: control target
= control target key end

     0   :  { %s3846_s1 = inlined_call_operand.vmem [shape: bf16[128,128], index: 1, kind: input, shape index: {}]   ;;  %s3847_s3 = inlined_call_operand.vmem [shape: bf16[128,128], index: 3, kind: input, shape index: {}]   ;;  %s3848_s0 = inlined_call_operand.vmem [shape: bf16[512,128], index: 0, kind: input, shape index: {}]   ;;  %s3849_s2 = inlined_call_operand.vmem [shape: bf16[512,128], index: 2, kind: input, shape index: {}]   ;;  %s3850_s4 = inlined_call_operand.vmem [shape: bf16[512,128], index: 4, kind: output, shape index: {0}]   ;;  %s3851_s7 = inlined_call_operand.vmem [shape: bf16[512,128], index: 7, kind: output, shape index: {3}]   ;;  %s3852_s5 = inlined_call_operand.vmem [shape: f32[8,128], index: 5, kind: output, shape index: {1}]   ;;  %s3853_s8 = inlined_call_operand.vmem [shape: f32[8,128], index: 8, kind: output, shape index: {4}]   ;;  %s3854_s6 = inlined_call_operand.vmem [shape: f32[8,128], index: 6, kind: output, shape index: {2}]   ;;  %s3855_s9 = inlined_call_operand.vmem [shape: f32[8,128], index: 9, kind: output, shape index: {5}]  }
   0x1   :  { %v3272_v0 = vld [vmem:[%s3846_s1] sm:$0xff]   ;;  %v3274_v2 = vld [vmem:[%s3846_s1 + $0x8] sm:$0xff]   ;;  %v3276_v4 = vld [vmem:[%s3846_s1 + $0x10] sm:$0xff]  }
   0x2   :  { %v3273_v1 = vld [vmem:[%s3847_s3] sm:$0xff]   ;;  %3112 = vmatprep.subr.bf16.mxu0 %v3272_v0  ;;  %v3275_v3 = vld [vmem:[%s3847_s3 + $0x8] sm:$0xff]   ;;  %v3277_v5 = vld [vmem:[%s3847_s3 + $0x10] sm:$0xff]  }
   0x3   :  { %3192 = vmatprep.subr.bf16.mxu1 %v3273_v1  ;;  %3113 = vmatpush3.bf16.msra.mxu0 %v3272_v0  ;;  %v3278_v6 = vld [vmem:[%s3846_s1 + $0x18] sm:$0xff]   ;;  %v3280_v8 = vld [vmem:[%s3846_s1 + $0x20] sm:$0xff]   ;;  %v3282_v10 = vld [vmem:[%s3846_s1 + $0x28] sm:$0xff]  }
   0x4   :  { %3193 = vmatpush3.bf16.msra.mxu1 %v3273_v1  ;;  %3114 = vmatprep.subr.bf16.mxu0 %v3274_v2  ;;  %v3279_v7 = vld [vmem:[%s3847_s3 + $0x18] sm:$0xff]   ;;  %v3281_v9 = vld [vmem:[%s3847_s3 + $0x20] sm:$0xff]   ;;  %v3283_v11 = vld [vmem:[%s3847_s3 + $0x28] sm:$0xff]  }
   0x5   :  { %3194 = vmatprep.subr.bf16.mxu1 %v3275_v3  ;;  %v3288_v12 = vld [vmem:[%s3848_s0] sm:$0xff]   ;;  %v3284_v14 = vld [vmem:[%s3846_s1 + $0x30] sm:$0xff]   ;;  %v3286_v16 = vld [vmem:[%s3846_s1 + $0x38] sm:$0xff]  }
   0x6   :  { %v3289_v13 = vld [vmem:[%s3849_s2] sm:$0xff]   ;;  %3128 = vmatprep.mubr.bf16.mxu0 %v3288_v12  ;;  %v3285_v15 = vld [vmem:[%s3847_s3 + $0x30] sm:$0xff]   ;;  %v3287_v17 = vld [vmem:[%s3847_s3 + $0x38] sm:$0xff]  }
   0x7   :  { %3115 = vmatpush3.bf16.msra.mxu0 %v3274_v2  ;;  %3208 = vmatprep.mubr.bf16.mxu1 %v3289_v13  ;;  %v3290_v18 = vld [vmem:[%s3848_s0 + $0x8] sm:$0xff]   ;;  %v3292_v20 = vld [vmem:[%s3848_s0 + $0x10] sm:$0xff]   ;;  %v3294_v22 = vld [vmem:[%s3848_s0 + $0x18] sm:$0xff]  }
   0x8   :  { %3195 = vmatpush3.bf16.msra.mxu1 %v3275_v3  ;;  %3116 = vmatprep.subr.bf16.mxu0 %v3276_v4  ;;  %v3291_v19 = vld [vmem:[%s3849_s2 + $0x8] sm:$0xff]   ;;  %v3293_v21 = vld [vmem:[%s3849_s2 + $0x10] sm:$0xff]   ;;  %v3295_v23 = vld [vmem:[%s3849_s2 + $0x18] sm:$0xff]  }
   0x9   :  { %3196 = vmatprep.subr.bf16.mxu1 %v3277_v5  ;;  %v3296_v24 = vld [vmem:[%s3848_s0 + $0x20] sm:$0xff]   ;;  %v3298_v26 = vld [vmem:[%s3848_s0 + $0x28] sm:$0xff]   ;;  %v3300_v28 = vld [vmem:[%s3848_s0 + $0x30] sm:$0xff]  }
   0xa   :  { %v3297_v25 = vld [vmem:[%s3849_s2 + $0x20] sm:$0xff]   ;;  %v3299_v27 = vld [vmem:[%s3849_s2 + $0x28] sm:$0xff]   ;;  %v3301_v29 = vld [vmem:[%s3849_s2 + $0x30] sm:$0xff]  }
   0xb   :  { %3117 = vmatpush3.bf16.msra.mxu0 %v3276_v4  ;;  %v3302_v30 = vld [vmem:[%s3848_s0 + $0x38] sm:$0xff]   ;;  %v3304_v32 = vld [vmem:[%s3848_s0 + $0x40] sm:$0xff]   ;;  %v3306_v34 = vld [vmem:[%s3848_s0 + $0x48] sm:$0xff]  }
   0xc   :  { %3197 = vmatpush3.bf16.msra.mxu1 %v3277_v5  ;;  %3118 = vmatprep.subr.bf16.mxu0 %v3278_v6  ;;  %v3303_v31 = vld [vmem:[%s3849_s2 + $0x38] sm:$0xff]   ;;  %v3305_v33 = vld [vmem:[%s3849_s2 + $0x40] sm:$0xff]   ;;  %v3307_v35 = vld [vmem:[%s3849_s2 + $0x48] sm:$0xff]  }
   0xd   :  { %3198 = vmatprep.subr.bf16.mxu1 %v3279_v7  ;;  %v3308_v36 = vld [vmem:[%s3848_s0 + $0x50] sm:$0xff]   ;;  %v3310_v38 = vld [vmem:[%s3848_s0 + $0x58] sm:$0xff]   ;;  %v3312_v40 = vld [vmem:[%s3848_s0 + $0x60] sm:$0xff]  }
   0xe   :  { %v3309_v37 = vld [vmem:[%s3849_s2 + $0x50] sm:$0xff]   ;;  %v3311_v39 = vld [vmem:[%s3849_s2 + $0x58] sm:$0xff]   ;;  %v3313_v41 = vld [vmem:[%s3849_s2 + $0x60] sm:$0xff]  }
   0xf   :  { %3119 = vmatpush3.bf16.msra.mxu0 %v3278_v6  ;;  %v3314_v42 = vld [vmem:[%s3848_s0 + $0x68] sm:$0xff]   ;;  %v3316_v44 = vld [vmem:[%s3848_s0 + $0x70] sm:$0xff]   ;;  %v3318_v46 = vld [vmem:[%s3848_s0 + $0x78] sm:$0xff]  }
  0x10   :  { %3199 = vmatpush3.bf16.msra.mxu1 %v3279_v7  ;;  %3120 = vmatprep.subr.bf16.mxu0 %v3280_v8  ;;  %v3315_v43 = vld [vmem:[%s3849_s2 + $0x68] sm:$0xff]   ;;  %v3317_v45 = vld [vmem:[%s3849_s2 + $0x70] sm:$0xff]   ;;  %v3319_v47 = vld [vmem:[%s3849_s2 + $0x78] sm:$0xff]  }
  0x11   :  { %3200 = vmatprep.subr.bf16.mxu1 %v3281_v9  ;;  %v3320_v48 = vld [vmem:[%s3848_s0 + $0x80] sm:$0xff]   ;;  %v3322_v50 = vld [vmem:[%s3848_s0 + $0x88] sm:$0xff]   ;;  %v3324_v52 = vld [vmem:[%s3848_s0 + $0x90] sm:$0xff]  }
  0x12   :  { %v3321_v49 = vld [vmem:[%s3849_s2 + $0x80] sm:$0xff]   ;;  %v3323_v51 = vld [vmem:[%s3849_s2 + $0x88] sm:$0xff]   ;;  %v3325_v53 = vld [vmem:[%s3849_s2 + $0x90] sm:$0xff]  }
  0x13   :  { %3121 = vmatpush3.bf16.msra.mxu0 %v3280_v8  ;;  %v3326_v54 = vld [vmem:[%s3848_s0 + $0x98] sm:$0xff]   ;;  %v3328_v56 = vld [vmem:[%s3848_s0 + $0xa0] sm:$0xff]   ;;  %v3330_v58 = vld [vmem:[%s3848_s0 + $0xa8] sm:$0xff]  }
  0x14   :  { %3201 = vmatpush3.bf16.msra.mxu1 %v3281_v9  ;;  %3122 = vmatprep.subr.bf16.mxu0 %v3282_v10  ;;  %v3327_v55 = vld [vmem:[%s3849_s2 + $0x98] sm:$0xff]   ;;  %v3329_v57 = vld [vmem:[%s3849_s2 + $0xa0] sm:$0xff]   ;;  %v3331_v59 = vld [vmem:[%s3849_s2 + $0xa8] sm:$0xff]  }
  0x15   :  { %3202 = vmatprep.subr.bf16.mxu1 %v3283_v11  ;;  %v3332_v60 = vld [vmem:[%s3848_s0 + $0xb0] sm:$0xff]   ;;  %v3334_v62 = vld [vmem:[%s3848_s0 + $0xb8] sm:$0xff]   ;;  %v3336_v0 = vld [vmem:[%s3848_s0 + $0xc0] sm:$0xff]  }
  0x16   :  { %v3333_v61 = vld [vmem:[%s3849_s2 + $0xb0] sm:$0xff]   ;;  %v3335_v63 = vld [vmem:[%s3849_s2 + $0xb8] sm:$0xff]   ;;  %v3337_v1 = vld [vmem:[%s3849_s2 + $0xc0] sm:$0xff]  }
  0x17   :  { %3123 = vmatpush3.bf16.msra.mxu0 %v3282_v10  ;;  %v3338_v2 = vld [vmem:[%s3848_s0 + $0xc8] sm:$0xff]   ;;  %v3340_v4 = vld [vmem:[%s3848_s0 + $0xd0] sm:$0xff]   ;;  %v3342_v6 = vld [vmem:[%s3848_s0 + $0xd8] sm:$0xff]  }
  0x18   :  { %3203 = vmatpush3.bf16.msra.mxu1 %v3283_v11  ;;  %3124 = vmatprep.subr.bf16.mxu0 %v3284_v14  ;;  %v3339_v3 = vld [vmem:[%s3849_s2 + $0xc8] sm:$0xff]   ;;  %v3341_v5 = vld [vmem:[%s3849_s2 + $0xd0] sm:$0xff]   ;;  %v3343_v7 = vld [vmem:[%s3849_s2 + $0xd8] sm:$0xff]  }
  0x19   :  { %3204 = vmatprep.subr.bf16.mxu1 %v3285_v15  ;;  %v3344_v8 = vld [vmem:[%s3848_s0 + $0xe0] sm:$0xff]   ;;  %v3346_v10 = vld [vmem:[%s3848_s0 + $0xe8] sm:$0xff]   ;;  %v3348_v12 = vld [vmem:[%s3848_s0 + $0xf0] sm:$0xff]  }
  0x1a   :  { %v3345_v9 = vld [vmem:[%s3849_s2 + $0xe0] sm:$0xff]   ;;  %v3347_v11 = vld [vmem:[%s3849_s2 + $0xe8] sm:$0xff]   ;;  %v3349_v13 = vld [vmem:[%s3849_s2 + $0xf0] sm:$0xff]  }
  0x1b   :  { %3125 = vmatpush3.bf16.msra.mxu0 %v3284_v14  ;;  %v3350_v14 = vld [vmem:[%s3848_s0 + $0xf8] sm:$0xff]  }
  0x1c   :  { %3205 = vmatpush3.bf16.msra.mxu1 %v3285_v15  ;;  %3126 = vmatprep.subr.bf16.mxu0 %v3286_v16  ;;  %v3351_v15 = vld [vmem:[%s3849_s2 + $0xf8] sm:$0xff]  }
  0x1d   :  { %3206 = vmatprep.subr.bf16.mxu1 %v3287_v17 }
  0x1f   :  { %3127 = vmatpush3.bf16.msra.mxu0 %v3286_v16 }
  0x20   :  { %3207 = vmatpush3.bf16.msra.mxu1 %v3287_v17 }
  0x22   :  { %3129 = vmatmul.mubr.bf16.vlgmr.msra.gmra.mrb[0].mxu0 %v3290_v18 }
  0x23   :  { %3209 = vmatmul.mubr.bf16.vlgmr.msra.gmra.mrb[0].mxu1 %v3291_v19  ;;  %3132 = vmatprep.mubr.bf16.mxu0 %v3292_v20 }
  0x24   :  { %3212 = vmatprep.mubr.bf16.mxu1 %v3293_v21 }
  0x2a   :  { %3133 = vmatmul.mubr.bf16.gmra.mrb[4].mxu0 %v3294_v22 }
  0x2b   :  { %3213 = vmatmul.mubr.bf16.gmra.mrb[4].mxu1 %v3295_v23  ;;  %3136 = vmatprep.mubr.bf16.mxu0 %v3296_v24 }
  0x2c   :  { %3216 = vmatprep.mubr.bf16.mxu1 %v3297_v25 }
  0x32   :  { %3137 = vmatmul.mubr.bf16.gmra.mrb[8].mxu0 %v3298_v26 }
  0x33   :  { %3217 = vmatmul.mubr.bf16.gmra.mrb[8].mxu1 %v3299_v27  ;;  %3140 = vmatprep.mubr.bf16.mxu0 %v3300_v28 }
  0x34   :  { %3220 = vmatprep.mubr.bf16.mxu1 %v3301_v29 }
  0x3a   :  { %3141 = vmatmul.mubr.bf16.gmra.mrb[12].mxu0 %v3302_v30 }
  0x3b   :  { %3221 = vmatmul.mubr.bf16.gmra.mrb[12].mxu1 %v3303_v31  ;;  %3144 = vmatprep.mubr.bf16.mxu0 %v3304_v32 }
  0x3c   :  { %3224 = vmatprep.mubr.bf16.mxu1 %v3305_v33 }
  0x42   :  { %3145 = vmatmul.mubr.bf16.gmra.mrb[16].mxu0 %v3306_v34 }
  0x43   :  { %3225 = vmatmul.mubr.bf16.gmra.mrb[16].mxu1 %v3307_v35  ;;  %3148 = vmatprep.mubr.bf16.mxu0 %v3308_v36 }
  0x44   :  { %3228 = vmatprep.mubr.bf16.mxu1 %v3309_v37 }
  0x4a   :  { %3149 = vmatmul.mubr.bf16.gmra.mrb[20].mxu0 %v3310_v38 }
  0x4b   :  { %3229 = vmatmul.mubr.bf16.gmra.mrb[20].mxu1 %v3311_v39  ;;  %3152 = vmatprep.mubr.bf16.mxu0 %v3312_v40 }
  0x4c   :  { %3232 = vmatprep.mubr.bf16.mxu1 %v3313_v41 }
  0x52   :  { %3153 = vmatmul.mubr.bf16.gmra.mrb[24].mxu0 %v3314_v42 }
  0x53   :  { %3233 = vmatmul.mubr.bf16.gmra.mrb[24].mxu1 %v3315_v43  ;;  %3156 = vmatprep.mubr.bf16.mxu0 %v3316_v44 }
  0x54   :  { %3236 = vmatprep.mubr.bf16.mxu1 %v3317_v45 }
  0x5a   :  { %3157 = vmatmul.mubr.bf16.gmra.mrb[28].mxu0 %v3318_v46 }
  0x5b   :  { %3237 = vmatmul.mubr.bf16.gmra.mrb[28].mxu1 %v3319_v47  ;;  %3160 = vmatprep.mubr.bf16.mxu0 %v3320_v48 }
  0x5c   :  { %3240 = vmatprep.mubr.bf16.mxu1 %v3321_v49 }
  0x62   :  { %3161 = vmatmul.mubr.bf16.gmra.mrb[32].mxu0 %v3322_v50 }
  0x63   :  { %3241 = vmatmul.mubr.bf16.gmra.mrb[32].mxu1 %v3323_v51  ;;  %3164 = vmatprep.mubr.bf16.mxu0 %v3324_v52 }
  0x64   :  { %3244 = vmatprep.mubr.bf16.mxu1 %v3325_v53 }
  0x6a   :  { %3165 = vmatmul.mubr.bf16.gmra.mrb[36].mxu0 %v3326_v54 }
  0x6b   :  { %3245 = vmatmul.mubr.bf16.gmra.mrb[36].mxu1 %v3327_v55  ;;  %3168 = vmatprep.mubr.bf16.mxu0 %v3328_v56 }
  0x6c   :  { %3248 = vmatprep.mubr.bf16.mxu1 %v3329_v57 }
  0x72   :  { %3169 = vmatmul.mubr.bf16.gmra.mrb[40].mxu0 %v3330_v58 }
  0x73   :  { %3249 = vmatmul.mubr.bf16.gmra.mrb[40].mxu1 %v3331_v59  ;;  %3172 = vmatprep.mubr.bf16.mxu0 %v3332_v60 }
  0x74   :  { %3252 = vmatprep.mubr.bf16.mxu1 %v3333_v61 }
  0x7a   :  { %3173 = vmatmul.mubr.bf16.gmra.mrb[44].mxu0 %v3334_v62 }
  0x7b   :  { %3253 = vmatmul.mubr.bf16.gmra.mrb[44].mxu1 %v3335_v63  ;;  %3176 = vmatprep.mubr.bf16.mxu0 %v3336_v0 }
  0x7c   :  { %3256 = vmatprep.mubr.bf16.mxu1 %v3337_v1 }
  0x82   :  { %3177 = vmatmul.mubr.bf16.gmra.mrb[48].mxu0 %v3338_v2 }
  0x83   :  { %3257 = vmatmul.mubr.bf16.gmra.mrb[48].mxu1 %v3339_v3  ;;  %3180 = vmatprep.mubr.bf16.mxu0 %v3340_v4 }
  0x84   :  { %3260 = vmatprep.mubr.bf16.mxu1 %v3341_v5 }
  0x8a   :  { %3181 = vmatmul.mubr.bf16.gmra.mrb[52].mxu0 %v3342_v6 }
  0x8b   :  { %3261 = vmatmul.mubr.bf16.gmra.mrb[52].mxu1 %v3343_v7  ;;  %3184 = vmatprep.mubr.bf16.mxu0 %v3344_v8 }
  0x8c   :  { %3264 = vmatprep.mubr.bf16.mxu1 %v3345_v9 }
  0x92   :  { %3185 = vmatmul.mubr.bf16.gmra.mrb[56].mxu0 %v3346_v10 }
  0x93   :  { %3265 = vmatmul.mubr.bf16.gmra.mrb[56].mxu1 %v3347_v11  ;;  %3188 = vmatprep.mubr.bf16.mxu0 %v3348_v12 }
  0x94   :  { %3268 = vmatprep.mubr.bf16.mxu1 %v3349_v13 }
  0x9a   :  { %3189 = vmatmul.mubr.bf16.gmra.mrb[60].mxu0 %v3350_v14 }
  0x9b   :  { %3269 = vmatmul.mubr.bf16.gmra.mrb[60].mxu1 %v3351_v15 }
  0xf5   :  { %v3130_v16 = vpop.f32.mrb[0].mxu0 }
  0xf6   :  { %v3210_v17 = vpop.f32.mrb[0].mxu1  ;;  %v378_v18 = vpop.f32.mrb[1].mxu0  ;;  %v1025_v34 = vmul.f32 %v3130_v16, %v3130_v16 }
  0xf7   :  { %v1511_v19 = vpop.f32.mrb[1].mxu1  ;;  %v3131_v20 = vpop.f32.mrb[2].mxu0  ;;  %v1023_v21 = vmul.f32 %v378_v18, %v378_v18  ;;  %v2158_v36 = vmul.f32 %v3210_v17, %v3210_v17 }
  0xf8   :  { %v2658_v22 = vpack.c.bf16 %v3131_v20, %v3130_v16  ;;  %v3211_v23 = vpop.f32.mrb[2].mxu1  ;;  %v381_v24 = vpop.f32.mrb[3].mxu0  ;;  %v2156_v25 = vmul.f32 %v1511_v19, %v1511_v19  ;;  %v1026_v40 = vmul.f32 %v3131_v20, %v3131_v20 }
  0xf9   :  { %v2818_v26 = vpack.c.bf16 %v3211_v23, %v3210_v17  ;;  %v2653_v27 = vpack.c.bf16 %v381_v24, %v378_v18  ;;  %v953_v28 = vadd.f32 %v381_v24, %v378_v18  ;;  %v1514_v29 = vpop.f32.mrb[3].mxu1  ;;  %v1024_v30 = vmul.f32 %v381_v24, %v381_v24 }
  0xfa   :  { %2970 = vst [vmem:[%s3850_s4 + $0x8] sm:$0xff] %v2658_v22   ;;  %v2813_v31 = vpack.c.bf16 %v1514_v29, %v1511_v19  ;;  %v2086_v32 = vadd.f32 %v1514_v29, %v1511_v19  ;;  %v2157_v33 = vmul.f32 %v1514_v29, %v1514_v29  ;;  %v2159_v43 = vmul.f32 %v3211_v23, %v3211_v23 }
  0xfb   :  { %3001 = vst [vmem:[%s3851_s7 + $0x8] sm:$0xff] %v2818_v26   ;;  %2654 = vst [vmem:[%s3850_s4] sm:$0xff] %v2653_v27   ;;  %v954_v35 = vadd.f32 %v3130_v16, %v953_v28  ;;  %v1087_v37 = vadd.f32 %v1024_v30, %v1023_v21 }
  0xfc   :  { %2814 = vst [vmem:[%s3851_s7] sm:$0xff] %v2813_v31   ;;  %v2087_v38 = vadd.f32 %v3210_v17, %v2086_v32  ;;  %v2220_v39 = vadd.f32 %v2157_v33, %v2156_v25 }
  0xfd   :  { %v3134_v41 = vpop.f32.mrb[4].mxu0  ;;  %v955_v42 = vadd.f32 %v3131_v20, %v954_v35  ;;  %v1088_v44 = vadd.f32 %v1087_v37, %v1025_v34 }
  0xfe   :  { %v2221_v45 = vadd.f32 %v2220_v39, %v2158_v36  ;;  %v3214_v46 = vpop.f32.mrb[4].mxu1  ;;  %v394_v47 = vpop.f32.mrb[5].mxu0  ;;  %v2088_v48 = vadd.f32 %v3211_v23, %v2087_v38  ;;  %v1029_v6 = vmul.f32 %v3134_v41, %v3134_v41 }
  0xff   :  { %v956_v49 = vadd.f32 %v955_v42, %v394_v47  ;;  %v1027_v50 = vmul.f32 %v394_v47, %v394_v47  ;;  %v1527_v51 = vpop.f32.mrb[5].mxu1  ;;  %v3135_v52 = vpop.f32.mrb[6].mxu0  ;;  %v1089_v53 = vadd.f32 %v1088_v44, %v1026_v40  ;;  %v2162_v8 = vmul.f32 %v3214_v46, %v3214_v46 }
 0x100   :  { %v2089_v54 = vadd.f32 %v2088_v48, %v1527_v51  ;;  %v2160_v55 = vmul.f32 %v1527_v51, %v1527_v51  ;;  %v2222_v56 = vadd.f32 %v2221_v45, %v2159_v43  ;;  %v3215_v57 = vpop.f32.mrb[6].mxu1  ;;  %v397_v58 = vpop.f32.mrb[7].mxu0  ;;  %v2668_v59 = vpack.c.bf16 %v3135_v52, %v3134_v41 }
 0x101   :  { %v2828_v60 = vpack.c.bf16 %v3215_v57, %v3214_v46  ;;  %v1530_v61 = vpop.f32.mrb[7].mxu1  ;;  %v1090_v62 = vadd.f32 %v1089_v53, %v1027_v50  ;;  %v2663_v0 = vpack.c.bf16 %v397_v58, %v394_v47  ;;  %v957_v1 = vadd.f32 %v956_v49, %v397_v58 }
 0x102   :  { %v2223_v63 = vadd.f32 %v2222_v56, %v2160_v55  ;;  %2972 = vst [vmem:[%s3850_s4 + $0x18] sm:$0xff] %v2668_v59   ;;  %v1028_v2 = vmul.f32 %v397_v58, %v397_v58  ;;  %v2823_v3 = vpack.c.bf16 %v1530_v61, %v1527_v51  ;;  %v2090_v4 = vadd.f32 %v2089_v54, %v1530_v61 }
 0x103   :  { %3003 = vst [vmem:[%s3851_s7 + $0x18] sm:$0xff] %v2828_v60   ;;  %v2161_v5 = vmul.f32 %v1530_v61, %v1530_v61  ;;  %2971 = vst [vmem:[%s3850_s4 + $0x10] sm:$0xff] %v2663_v0   ;;  %v958_v7 = vadd.f32 %v3134_v41, %v957_v1  ;;  %v1030_v13 = vmul.f32 %v3135_v52, %v3135_v52 }
 0x104   :  { %v1091_v9 = vadd.f32 %v1090_v62, %v1028_v2  ;;  %3002 = vst [vmem:[%s3851_s7 + $0x10] sm:$0xff] %v2823_v3   ;;  %v2091_v10 = vadd.f32 %v3214_v46, %v2090_v4  ;;  %v2163_v17 = vmul.f32 %v3215_v57, %v3215_v57 }
 0x105   :  { %v2224_v11 = vadd.f32 %v2223_v63, %v2161_v5  ;;  %v3138_v12 = vpop.f32.mrb[8].mxu0  ;;  %v959_v16 = vadd.f32 %v3135_v52, %v958_v7 }
 0x106   :  { %v3218_v14 = vpop.f32.mrb[8].mxu1  ;;  %v410_v15 = vpop.f32.mrb[9].mxu0  ;;  %v1092_v18 = vadd.f32 %v1091_v9, %v1029_v6  ;;  %v2092_v24 = vadd.f32 %v3215_v57, %v2091_v10  ;;  %v1033_v43 = vmul.f32 %v3138_v12, %v3138_v12 }
 0x107   :  { %v2225_v19 = vadd.f32 %v2224_v11, %v2162_v8  ;;  %v1031_v20 = vmul.f32 %v410_v15, %v410_v15  ;;  %v1543_v21 = vpop.f32.mrb[9].mxu1  ;;  %v3139_v22 = vpop.f32.mrb[10].mxu0  ;;  %v960_v23 = vadd.f32 %v959_v16, %v410_v15  ;;  %v2166_v46 = vmul.f32 %v3218_v14, %v3218_v14 }
 0x108   :  { %v2164_v25 = vmul.f32 %v1543_v21, %v1543_v21  ;;  %v2678_v26 = vpack.c.bf16 %v3139_v22, %v3138_v12  ;;  %v3219_v27 = vpop.f32.mrb[10].mxu1  ;;  %v413_v28 = vpop.f32.mrb[11].mxu0  ;;  %v1093_v29 = vadd.f32 %v1092_v18, %v1030_v13  ;;  %v2093_v33 = vadd.f32 %v2092_v24, %v1543_v21 }
 0x109   :  { %v2226_v30 = vadd.f32 %v2225_v19, %v2163_v17  ;;  %v2838_v31 = vpack.c.bf16 %v3219_v27, %v3218_v14  ;;  %v1546_v32 = vpop.f32.mrb[11].mxu1  ;;  %v2673_v34 = vpack.c.bf16 %v413_v28, %v410_v15  ;;  %v961_v35 = vadd.f32 %v960_v23, %v413_v28 }
 0x10a   :  { %2974 = vst [vmem:[%s3850_s4 + $0x28] sm:$0xff] %v2678_v26   ;;  %v1094_v36 = vadd.f32 %v1093_v29, %v1031_v20  ;;  %v1032_v38 = vmul.f32 %v413_v28, %v413_v28  ;;  %v2833_v39 = vpack.c.bf16 %v1546_v32, %v1543_v21  ;;  %v2094_v41 = vadd.f32 %v2093_v33, %v1546_v32 }
 0x10b   :  { %v2227_v37 = vadd.f32 %v2226_v30, %v2164_v25  ;;  %3005 = vst [vmem:[%s3851_s7 + $0x28] sm:$0xff] %v2838_v31   ;;  %2973 = vst [vmem:[%s3850_s4 + $0x20] sm:$0xff] %v2673_v34   ;;  %v962_v40 = vadd.f32 %v3138_v12, %v961_v35  ;;  %v2165_v42 = vmul.f32 %v1546_v32, %v1546_v32 }
 0x10c   :  { %v1095_v44 = vadd.f32 %v1094_v36, %v1032_v38  ;;  %3004 = vst [vmem:[%s3851_s7 + $0x20] sm:$0xff] %v2833_v39   ;;  %v2095_v47 = vadd.f32 %v3218_v14, %v2094_v41  ;;  %v1034_v52 = vmul.f32 %v3139_v22, %v3139_v22  ;;  %v2167_v53 = vmul.f32 %v3219_v27, %v3219_v27 }
 0x10d   :  { %v3142_v45 = vpop.f32.mrb[12].mxu0  ;;  %v2228_v48 = vadd.f32 %v2227_v37, %v2165_v42  ;;  %v963_v51 = vadd.f32 %v3139_v22, %v962_v40 }
 0x10e   :  { %v3222_v49 = vpop.f32.mrb[12].mxu1  ;;  %v426_v50 = vpop.f32.mrb[13].mxu0  ;;  %v1096_v54 = vadd.f32 %v1095_v44, %v1033_v43  ;;  %v2096_v60 = vadd.f32 %v3219_v27, %v2095_v47  ;;  %v1037_v14 = vmul.f32 %v3142_v45, %v3142_v45 }
 0x10f   :  { %v1035_v55 = vmul.f32 %v426_v50, %v426_v50  ;;  %v1559_v56 = vpop.f32.mrb[13].mxu1  ;;  %v3143_v57 = vpop.f32.mrb[14].mxu0  ;;  %v2229_v58 = vadd.f32 %v2228_v48, %v2166_v46  ;;  %v964_v59 = vadd.f32 %v963_v51, %v426_v50  ;;  %v2170_v18 = vmul.f32 %v3222_v49, %v3222_v49 }
 0x110   :  { %v2168_v61 = vmul.f32 %v1559_v56, %v1559_v56  ;;  %v3223_v62 = vpop.f32.mrb[14].mxu1  ;;  %v429_v63 = vpop.f32.mrb[15].mxu0  ;;  %v1097_v0 = vadd.f32 %v1096_v54, %v1034_v52  ;;  %v2688_v1 = vpack.c.bf16 %v3143_v57, %v3142_v45  ;;  %v2097_v4 = vadd.f32 %v2096_v60, %v1559_v56 }
 0x111   :  { %v2848_v2 = vpack.c.bf16 %v3223_v62, %v3222_v49  ;;  %v1562_v3 = vpop.f32.mrb[15].mxu1  ;;  %v2230_v5 = vadd.f32 %v2229_v58, %v2167_v53  ;;  %v2683_v6 = vpack.c.bf16 %v429_v63, %v426_v50  ;;  %v965_v8 = vadd.f32 %v964_v59, %v429_v63 }
 0x112   :  { %v1098_v7 = vadd.f32 %v1097_v0, %v1035_v55  ;;  %2976 = vst [vmem:[%s3850_s4 + $0x38] sm:$0xff] %v2688_v1   ;;  %v1036_v9 = vmul.f32 %v429_v63, %v429_v63  ;;  %v2843_v10 = vpack.c.bf16 %v1562_v3, %v1559_v56  ;;  %v2098_v12 = vadd.f32 %v2097_v4, %v1562_v3 }
 0x113   :  { %3007 = vst [vmem:[%s3851_s7 + $0x38] sm:$0xff] %v2848_v2   ;;  %v2231_v11 = vadd.f32 %v2230_v5, %v2168_v61  ;;  %2975 = vst [vmem:[%s3850_s4 + $0x30] sm:$0xff] %v2683_v6   ;;  %v2169_v13 = vmul.f32 %v1562_v3, %v1562_v3  ;;  %v966_v15 = vadd.f32 %v3142_v45, %v965_v8 }
 0x114   :  { %v1099_v16 = vadd.f32 %v1098_v7, %v1036_v9  ;;  %3006 = vst [vmem:[%s3851_s7 + $0x30] sm:$0xff] %v2843_v10   ;;  %v1038_v19 = vmul.f32 %v3143_v57, %v3143_v57  ;;  %v2099_v20 = vadd.f32 %v3222_v49, %v2098_v12  ;;  %v2171_v24 = vmul.f32 %v3223_v62, %v3223_v62 }
 0x115   :  { %v3146_v17 = vpop.f32.mrb[16].mxu0  ;;  %v2232_v21 = vadd.f32 %v2231_v11, %v2169_v13  ;;  %v967_v26 = vadd.f32 %v3143_v57, %v966_v15 }
 0x116   :  { %v3226_v22 = vpop.f32.mrb[16].mxu1  ;;  %v442_v23 = vpop.f32.mrb[17].mxu0  ;;  %v1100_v25 = vadd.f32 %v1099_v16, %v1037_v14  ;;  %v2100_v31 = vadd.f32 %v3223_v62, %v2099_v20  ;;  %v1041_v50 = vmul.f32 %v3146_v17, %v3146_v17 }
 0x117   :  { %v1039_v27 = vmul.f32 %v442_v23, %v442_v23  ;;  %v1575_v28 = vpop.f32.mrb[17].mxu1  ;;  %v3147_v29 = vpop.f32.mrb[18].mxu0  ;;  %v2233_v30 = vadd.f32 %v2232_v21, %v2170_v18  ;;  %v968_v36 = vadd.f32 %v967_v26, %v442_v23  ;;  %v2174_v54 = vmul.f32 %v3226_v22, %v3226_v22 }
 0x118   :  { %v2172_v32 = vmul.f32 %v1575_v28, %v1575_v28  ;;  %v2698_v33 = vpack.c.bf16 %v3147_v29, %v3146_v17  ;;  %v3227_v34 = vpop.f32.mrb[18].mxu1  ;;  %v445_v35 = vpop.f32.mrb[19].mxu0  ;;  %v1101_v37 = vadd.f32 %v1100_v25, %v1038_v19  ;;  %v2101_v40 = vadd.f32 %v2100_v31, %v1575_v28 }
 0x119   :  { %v2858_v38 = vpack.c.bf16 %v3227_v34, %v3226_v22  ;;  %v1578_v39 = vpop.f32.mrb[19].mxu1  ;;  %v2234_v41 = vadd.f32 %v2233_v30, %v2171_v24  ;;  %v2693_v42 = vpack.c.bf16 %v445_v35, %v442_v23  ;;  %v969_v44 = vadd.f32 %v968_v36, %v445_v35 }
 0x11a   :  { %2978 = vst [vmem:[%s3850_s4 + $0x48] sm:$0xff] %v2698_v33   ;;  %v1102_v43 = vadd.f32 %v1101_v37, %v1039_v27  ;;  %v1040_v45 = vmul.f32 %v445_v35, %v445_v35  ;;  %v2853_v46 = vpack.c.bf16 %v1578_v39, %v1575_v28  ;;  %v2102_v48 = vadd.f32 %v2101_v40, %v1578_v39 }
 0x11b   :  { %3009 = vst [vmem:[%s3851_s7 + $0x48] sm:$0xff] %v2858_v38   ;;  %v2235_v47 = vadd.f32 %v2234_v41, %v2172_v32  ;;  %2977 = vst [vmem:[%s3850_s4 + $0x40] sm:$0xff] %v2693_v42   ;;  %v2173_v49 = vmul.f32 %v1578_v39, %v1578_v39  ;;  %v970_v51 = vadd.f32 %v3146_v17, %v969_v44 }
 0x11c   :  { %v1103_v52 = vadd.f32 %v1102_v43, %v1040_v45  ;;  %3008 = vst [vmem:[%s3851_s7 + $0x40] sm:$0xff] %v2853_v46   ;;  %v1042_v55 = vmul.f32 %v3147_v29, %v3147_v29  ;;  %v2103_v56 = vadd.f32 %v3226_v22, %v2102_v48  ;;  %v2175_v60 = vmul.f32 %v3227_v34, %v3227_v34 }
 0x11d   :  { %v3150_v53 = vpop.f32.mrb[20].mxu0  ;;  %v2236_v57 = vadd.f32 %v2235_v47, %v2173_v49  ;;  %v971_v62 = vadd.f32 %v3147_v29, %v970_v51 }
 0x11e   :  { %v3230_v58 = vpop.f32.mrb[20].mxu1  ;;  %v458_v59 = vpop.f32.mrb[21].mxu0  ;;  %v1104_v61 = vadd.f32 %v1103_v52, %v1041_v50  ;;  %v2104_v3 = vadd.f32 %v3227_v34, %v2103_v56  ;;  %v1045_v22 = vmul.f32 %v3150_v53, %v3150_v53 }
 0x11f   :  { %v1043_v63 = vmul.f32 %v458_v59, %v458_v59  ;;  %v1591_v0 = vpop.f32.mrb[21].mxu1  ;;  %v3151_v1 = vpop.f32.mrb[22].mxu0  ;;  %v2237_v2 = vadd.f32 %v2236_v57, %v2174_v54  ;;  %v972_v8 = vadd.f32 %v971_v62, %v458_v59  ;;  %v2178_v26 = vmul.f32 %v3230_v58, %v3230_v58 }
 0x120   :  { %v2176_v4 = vmul.f32 %v1591_v0, %v1591_v0  ;;  %v2708_v5 = vpack.c.bf16 %v3151_v1, %v3150_v53  ;;  %v3231_v6 = vpop.f32.mrb[22].mxu1  ;;  %v461_v7 = vpop.f32.mrb[23].mxu0  ;;  %v1105_v9 = vadd.f32 %v1104_v61, %v1042_v55  ;;  %v2105_v12 = vadd.f32 %v2104_v3, %v1591_v0 }
 0x121   :  { %v2868_v10 = vpack.c.bf16 %v3231_v6, %v3230_v58  ;;  %v1594_v11 = vpop.f32.mrb[23].mxu1  ;;  %v2238_v13 = vadd.f32 %v2237_v2, %v2175_v60  ;;  %v2703_v14 = vpack.c.bf16 %v461_v7, %v458_v59  ;;  %v973_v16 = vadd.f32 %v972_v8, %v461_v7 }
 0x122   :  { %2980 = vst [vmem:[%s3850_s4 + $0x58] sm:$0xff] %v2708_v5   ;;  %v1106_v15 = vadd.f32 %v1105_v9, %v1043_v63  ;;  %v1044_v17 = vmul.f32 %v461_v7, %v461_v7  ;;  %v2863_v18 = vpack.c.bf16 %v1594_v11, %v1591_v0  ;;  %v2106_v20 = vadd.f32 %v2105_v12, %v1594_v11 }
 0x123   :  { %3011 = vst [vmem:[%s3851_s7 + $0x58] sm:$0xff] %v2868_v10   ;;  %v2239_v19 = vadd.f32 %v2238_v13, %v2176_v4  ;;  %2979 = vst [vmem:[%s3850_s4 + $0x50] sm:$0xff] %v2703_v14   ;;  %v2177_v21 = vmul.f32 %v1594_v11, %v1594_v11  ;;  %v974_v23 = vadd.f32 %v3150_v53, %v973_v16 }
 0x124   :  { %v1107_v24 = vadd.f32 %v1106_v15, %v1044_v17  ;;  %3010 = vst [vmem:[%s3851_s7 + $0x50] sm:$0xff] %v2863_v18   ;;  %v1046_v27 = vmul.f32 %v3151_v1, %v3151_v1  ;;  %v2107_v28 = vadd.f32 %v3230_v58, %v2106_v20  ;;  %v2179_v32 = vmul.f32 %v3231_v6, %v3231_v6 }
 0x125   :  { %v3154_v25 = vpop.f32.mrb[24].mxu0  ;;  %v2240_v29 = vadd.f32 %v2239_v19, %v2177_v21  ;;  %v975_v34 = vadd.f32 %v3151_v1, %v974_v23 }
 0x126   :  { %v3234_v30 = vpop.f32.mrb[24].mxu1  ;;  %v474_v31 = vpop.f32.mrb[25].mxu0  ;;  %v1108_v33 = vadd.f32 %v1107_v24, %v1045_v22  ;;  %v2108_v39 = vadd.f32 %v3231_v6, %v2107_v28  ;;  %v1049_v58 = vmul.f32 %v3154_v25, %v3154_v25 }
 0x127   :  { %v1047_v35 = vmul.f32 %v474_v31, %v474_v31  ;;  %v1607_v36 = vpop.f32.mrb[25].mxu1  ;;  %v3155_v37 = vpop.f32.mrb[26].mxu0  ;;  %v2241_v38 = vadd.f32 %v2240_v29, %v2178_v26  ;;  %v976_v44 = vadd.f32 %v975_v34, %v474_v31  ;;  %v2182_v62 = vmul.f32 %v3234_v30, %v3234_v30 }
 0x128   :  { %v2180_v40 = vmul.f32 %v1607_v36, %v1607_v36  ;;  %v2718_v41 = vpack.c.bf16 %v3155_v37, %v3154_v25  ;;  %v3235_v42 = vpop.f32.mrb[26].mxu1  ;;  %v477_v43 = vpop.f32.mrb[27].mxu0  ;;  %v1109_v45 = vadd.f32 %v1108_v33, %v1046_v27  ;;  %v2109_v48 = vadd.f32 %v2108_v39, %v1607_v36 }
 0x129   :  { %v2878_v46 = vpack.c.bf16 %v3235_v42, %v3234_v30  ;;  %v1610_v47 = vpop.f32.mrb[27].mxu1  ;;  %v2242_v49 = vadd.f32 %v2241_v38, %v2179_v32  ;;  %v2713_v50 = vpack.c.bf16 %v477_v43, %v474_v31  ;;  %v977_v52 = vadd.f32 %v976_v44, %v477_v43 }
 0x12a   :  { %2982 = vst [vmem:[%s3850_s4 + $0x68] sm:$0xff] %v2718_v41   ;;  %v1110_v51 = vadd.f32 %v1109_v45, %v1047_v35  ;;  %v1048_v53 = vmul.f32 %v477_v43, %v477_v43  ;;  %v2873_v54 = vpack.c.bf16 %v1610_v47, %v1607_v36  ;;  %v2110_v56 = vadd.f32 %v2109_v48, %v1610_v47 }
 0x12b   :  { %3013 = vst [vmem:[%s3851_s7 + $0x68] sm:$0xff] %v2878_v46   ;;  %v2243_v55 = vadd.f32 %v2242_v49, %v2180_v40  ;;  %2981 = vst [vmem:[%s3850_s4 + $0x60] sm:$0xff] %v2713_v50   ;;  %v2181_v57 = vmul.f32 %v1610_v47, %v1610_v47  ;;  %v978_v59 = vadd.f32 %v3154_v25, %v977_v52 }
 0x12c   :  { %v1111_v60 = vadd.f32 %v1110_v51, %v1048_v53  ;;  %3012 = vst [vmem:[%s3851_s7 + $0x60] sm:$0xff] %v2873_v54   ;;  %v1050_v63 = vmul.f32 %v3155_v37, %v3155_v37  ;;  %v2111_v0 = vadd.f32 %v3234_v30, %v2110_v56  ;;  %v2183_v4 = vmul.f32 %v3235_v42, %v3235_v42 }
 0x12d   :  { %v3158_v61 = vpop.f32.mrb[28].mxu0  ;;  %v2244_v1 = vadd.f32 %v2243_v55, %v2181_v57  ;;  %v979_v6 = vadd.f32 %v3155_v37, %v978_v59 }
 0x12e   :  { %v3238_v2 = vpop.f32.mrb[28].mxu1  ;;  %v490_v3 = vpop.f32.mrb[29].mxu0  ;;  %v1112_v5 = vadd.f32 %v1111_v60, %v1049_v58  ;;  %v2112_v11 = vadd.f32 %v3235_v42, %v2111_v0  ;;  %v1053_v30 = vmul.f32 %v3158_v61, %v3158_v61 }
 0x12f   :  { %v1051_v7 = vmul.f32 %v490_v3, %v490_v3  ;;  %v1623_v8 = vpop.f32.mrb[29].mxu1  ;;  %v3159_v9 = vpop.f32.mrb[30].mxu0  ;;  %v2245_v10 = vadd.f32 %v2244_v1, %v2182_v62  ;;  %v980_v16 = vadd.f32 %v979_v6, %v490_v3  ;;  %v2186_v34 = vmul.f32 %v3238_v2, %v3238_v2 }
 0x130   :  { %v2184_v12 = vmul.f32 %v1623_v8, %v1623_v8  ;;  %v2728_v13 = vpack.c.bf16 %v3159_v9, %v3158_v61  ;;  %v3239_v14 = vpop.f32.mrb[30].mxu1  ;;  %v493_v15 = vpop.f32.mrb[31].mxu0  ;;  %v1113_v17 = vadd.f32 %v1112_v5, %v1050_v63  ;;  %v2113_v20 = vadd.f32 %v2112_v11, %v1623_v8 }
 0x131   :  { %v2888_v18 = vpack.c.bf16 %v3239_v14, %v3238_v2  ;;  %v1626_v19 = vpop.f32.mrb[31].mxu1  ;;  %v2246_v21 = vadd.f32 %v2245_v10, %v2183_v4  ;;  %v2723_v22 = vpack.c.bf16 %v493_v15, %v490_v3  ;;  %v981_v24 = vadd.f32 %v980_v16, %v493_v15 }
 0x132   :  { %2984 = vst [vmem:[%s3850_s4 + $0x78] sm:$0xff] %v2728_v13   ;;  %v1114_v23 = vadd.f32 %v1113_v17, %v1051_v7  ;;  %v1052_v25 = vmul.f32 %v493_v15, %v493_v15  ;;  %v2883_v26 = vpack.c.bf16 %v1626_v19, %v1623_v8  ;;  %v2114_v28 = vadd.f32 %v2113_v20, %v1626_v19 }
 0x133   :  { %3015 = vst [vmem:[%s3851_s7 + $0x78] sm:$0xff] %v2888_v18   ;;  %v2247_v27 = vadd.f32 %v2246_v21, %v2184_v12  ;;  %2983 = vst [vmem:[%s3850_s4 + $0x70] sm:$0xff] %v2723_v22   ;;  %v2185_v29 = vmul.f32 %v1626_v19, %v1626_v19  ;;  %v982_v31 = vadd.f32 %v3158_v61, %v981_v24 }
 0x134   :  { %v1115_v32 = vadd.f32 %v1114_v23, %v1052_v25  ;;  %3014 = vst [vmem:[%s3851_s7 + $0x70] sm:$0xff] %v2883_v26   ;;  %v1054_v35 = vmul.f32 %v3159_v9, %v3159_v9  ;;  %v2115_v36 = vadd.f32 %v3238_v2, %v2114_v28  ;;  %v2187_v40 = vmul.f32 %v3239_v14, %v3239_v14 }
 0x135   :  { %v3162_v33 = vpop.f32.mrb[32].mxu0  ;;  %v2248_v37 = vadd.f32 %v2247_v27, %v2185_v29  ;;  %v983_v42 = vadd.f32 %v3159_v9, %v982_v31 }
 0x136   :  { %v3242_v38 = vpop.f32.mrb[32].mxu1  ;;  %v506_v39 = vpop.f32.mrb[33].mxu0  ;;  %v1116_v41 = vadd.f32 %v1115_v32, %v1053_v30  ;;  %v2116_v47 = vadd.f32 %v3239_v14, %v2115_v36  ;;  %v1057_v2 = vmul.f32 %v3162_v33, %v3162_v33 }
 0x137   :  { %v1055_v43 = vmul.f32 %v506_v39, %v506_v39  ;;  %v1639_v44 = vpop.f32.mrb[33].mxu1  ;;  %v3163_v45 = vpop.f32.mrb[34].mxu0  ;;  %v2249_v46 = vadd.f32 %v2248_v37, %v2186_v34  ;;  %v984_v52 = vadd.f32 %v983_v42, %v506_v39  ;;  %v2190_v6 = vmul.f32 %v3242_v38, %v3242_v38 }
 0x138   :  { %v2188_v48 = vmul.f32 %v1639_v44, %v1639_v44  ;;  %v2738_v49 = vpack.c.bf16 %v3163_v45, %v3162_v33  ;;  %v3243_v50 = vpop.f32.mrb[34].mxu1  ;;  %v509_v51 = vpop.f32.mrb[35].mxu0  ;;  %v1117_v53 = vadd.f32 %v1116_v41, %v1054_v35  ;;  %v2117_v56 = vadd.f32 %v2116_v47, %v1639_v44 }
 0x139   :  { %v2898_v54 = vpack.c.bf16 %v3243_v50, %v3242_v38  ;;  %v1642_v55 = vpop.f32.mrb[35].mxu1  ;;  %v2250_v57 = vadd.f32 %v2249_v46, %v2187_v40  ;;  %v2733_v58 = vpack.c.bf16 %v509_v51, %v506_v39  ;;  %v985_v60 = vadd.f32 %v984_v52, %v509_v51 }
 0x13a   :  { %2986 = vst [vmem:[%s3850_s4 + $0x88] sm:$0xff] %v2738_v49   ;;  %v1118_v59 = vadd.f32 %v1117_v53, %v1055_v43  ;;  %v1056_v61 = vmul.f32 %v509_v51, %v509_v51  ;;  %v2893_v62 = vpack.c.bf16 %v1642_v55, %v1639_v44  ;;  %v2118_v0 = vadd.f32 %v2117_v56, %v1642_v55 }
 0x13b   :  { %3017 = vst [vmem:[%s3851_s7 + $0x88] sm:$0xff] %v2898_v54   ;;  %v2251_v63 = vadd.f32 %v2250_v57, %v2188_v48  ;;  %2985 = vst [vmem:[%s3850_s4 + $0x80] sm:$0xff] %v2733_v58   ;;  %v2189_v1 = vmul.f32 %v1642_v55, %v1642_v55  ;;  %v986_v3 = vadd.f32 %v3162_v33, %v985_v60 }
 0x13c   :  { %v1119_v4 = vadd.f32 %v1118_v59, %v1056_v61  ;;  %3016 = vst [vmem:[%s3851_s7 + $0x80] sm:$0xff] %v2893_v62   ;;  %v1058_v7 = vmul.f32 %v3163_v45, %v3163_v45  ;;  %v2119_v8 = vadd.f32 %v3242_v38, %v2118_v0  ;;  %v2191_v12 = vmul.f32 %v3243_v50, %v3243_v50 }
 0x13d   :  { %v3166_v5 = vpop.f32.mrb[36].mxu0  ;;  %v2252_v9 = vadd.f32 %v2251_v63, %v2189_v1  ;;  %v987_v14 = vadd.f32 %v3163_v45, %v986_v3 }
 0x13e   :  { %v3246_v10 = vpop.f32.mrb[36].mxu1  ;;  %v522_v11 = vpop.f32.mrb[37].mxu0  ;;  %v1120_v13 = vadd.f32 %v1119_v4, %v1057_v2  ;;  %v2120_v19 = vadd.f32 %v3243_v50, %v2119_v8  ;;  %v1061_v38 = vmul.f32 %v3166_v5, %v3166_v5 }
 0x13f   :  { %v1059_v15 = vmul.f32 %v522_v11, %v522_v11  ;;  %v1655_v16 = vpop.f32.mrb[37].mxu1  ;;  %v3167_v17 = vpop.f32.mrb[38].mxu0  ;;  %v2253_v18 = vadd.f32 %v2252_v9, %v2190_v6  ;;  %v988_v24 = vadd.f32 %v987_v14, %v522_v11  ;;  %v2194_v42 = vmul.f32 %v3246_v10, %v3246_v10 }
 0x140   :  { %v2192_v20 = vmul.f32 %v1655_v16, %v1655_v16  ;;  %v2748_v21 = vpack.c.bf16 %v3167_v17, %v3166_v5  ;;  %v3247_v22 = vpop.f32.mrb[38].mxu1  ;;  %v525_v23 = vpop.f32.mrb[39].mxu0  ;;  %v1121_v25 = vadd.f32 %v1120_v13, %v1058_v7  ;;  %v2121_v28 = vadd.f32 %v2120_v19, %v1655_v16 }
 0x141   :  { %v2908_v26 = vpack.c.bf16 %v3247_v22, %v3246_v10  ;;  %v1658_v27 = vpop.f32.mrb[39].mxu1  ;;  %v2254_v29 = vadd.f32 %v2253_v18, %v2191_v12  ;;  %v2743_v30 = vpack.c.bf16 %v525_v23, %v522_v11  ;;  %v989_v32 = vadd.f32 %v988_v24, %v525_v23 }
 0x142   :  { %2988 = vst [vmem:[%s3850_s4 + $0x98] sm:$0xff] %v2748_v21   ;;  %v1122_v31 = vadd.f32 %v1121_v25, %v1059_v15  ;;  %v1060_v33 = vmul.f32 %v525_v23, %v525_v23  ;;  %v2903_v34 = vpack.c.bf16 %v1658_v27, %v1655_v16  ;;  %v2122_v36 = vadd.f32 %v2121_v28, %v1658_v27 }
 0x143   :  { %3019 = vst [vmem:[%s3851_s7 + $0x98] sm:$0xff] %v2908_v26   ;;  %v2255_v35 = vadd.f32 %v2254_v29, %v2192_v20  ;;  %2987 = vst [vmem:[%s3850_s4 + $0x90] sm:$0xff] %v2743_v30   ;;  %v2193_v37 = vmul.f32 %v1658_v27, %v1658_v27  ;;  %v990_v39 = vadd.f32 %v3166_v5, %v989_v32 }
 0x144   :  { %v1123_v40 = vadd.f32 %v1122_v31, %v1060_v33  ;;  %3018 = vst [vmem:[%s3851_s7 + $0x90] sm:$0xff] %v2903_v34   ;;  %v1062_v43 = vmul.f32 %v3167_v17, %v3167_v17  ;;  %v2123_v44 = vadd.f32 %v3246_v10, %v2122_v36  ;;  %v2195_v48 = vmul.f32 %v3247_v22, %v3247_v22 }
 0x145   :  { %v3170_v41 = vpop.f32.mrb[40].mxu0  ;;  %v2256_v45 = vadd.f32 %v2255_v35, %v2193_v37  ;;  %v991_v50 = vadd.f32 %v3167_v17, %v990_v39 }
 0x146   :  { %v3250_v46 = vpop.f32.mrb[40].mxu1  ;;  %v538_v47 = vpop.f32.mrb[41].mxu0  ;;  %v1124_v49 = vadd.f32 %v1123_v40, %v1061_v38  ;;  %v2124_v55 = vadd.f32 %v3247_v22, %v2123_v44  ;;  %v1065_v10 = vmul.f32 %v3170_v41, %v3170_v41 }
 0x147   :  { %v1063_v51 = vmul.f32 %v538_v47, %v538_v47  ;;  %v1671_v52 = vpop.f32.mrb[41].mxu1  ;;  %v3171_v53 = vpop.f32.mrb[42].mxu0  ;;  %v2257_v54 = vadd.f32 %v2256_v45, %v2194_v42  ;;  %v992_v60 = vadd.f32 %v991_v50, %v538_v47  ;;  %v2198_v14 = vmul.f32 %v3250_v46, %v3250_v46 }
 0x148   :  { %v2196_v56 = vmul.f32 %v1671_v52, %v1671_v52  ;;  %v2758_v57 = vpack.c.bf16 %v3171_v53, %v3170_v41  ;;  %v3251_v58 = vpop.f32.mrb[42].mxu1  ;;  %v541_v59 = vpop.f32.mrb[43].mxu0  ;;  %v1125_v61 = vadd.f32 %v1124_v49, %v1062_v43  ;;  %v2125_v0 = vadd.f32 %v2124_v55, %v1671_v52 }
 0x149   :  { %v2918_v62 = vpack.c.bf16 %v3251_v58, %v3250_v46  ;;  %v1674_v63 = vpop.f32.mrb[43].mxu1  ;;  %v2258_v1 = vadd.f32 %v2257_v54, %v2195_v48  ;;  %v2753_v2 = vpack.c.bf16 %v541_v59, %v538_v47  ;;  %v993_v4 = vadd.f32 %v992_v60, %v541_v59 }
 0x14a   :  { %2990 = vst [vmem:[%s3850_s4 + $0xa8] sm:$0xff] %v2758_v57   ;;  %v1126_v3 = vadd.f32 %v1125_v61, %v1063_v51  ;;  %v1064_v5 = vmul.f32 %v541_v59, %v541_v59  ;;  %v2913_v6 = vpack.c.bf16 %v1674_v63, %v1671_v52  ;;  %v2126_v8 = vadd.f32 %v2125_v0, %v1674_v63 }
 0x14b   :  { %3021 = vst [vmem:[%s3851_s7 + $0xa8] sm:$0xff] %v2918_v62   ;;  %v2259_v7 = vadd.f32 %v2258_v1, %v2196_v56  ;;  %2989 = vst [vmem:[%s3850_s4 + $0xa0] sm:$0xff] %v2753_v2   ;;  %v2197_v9 = vmul.f32 %v1674_v63, %v1674_v63  ;;  %v994_v11 = vadd.f32 %v3170_v41, %v993_v4 }
 0x14c   :  { %v1127_v12 = vadd.f32 %v1126_v3, %v1064_v5  ;;  %3020 = vst [vmem:[%s3851_s7 + $0xa0] sm:$0xff] %v2913_v6   ;;  %v1066_v15 = vmul.f32 %v3171_v53, %v3171_v53  ;;  %v2127_v16 = vadd.f32 %v3250_v46, %v2126_v8  ;;  %v2199_v20 = vmul.f32 %v3251_v58, %v3251_v58 }
 0x14d   :  { %v3174_v13 = vpop.f32.mrb[44].mxu0  ;;  %v2260_v17 = vadd.f32 %v2259_v7, %v2197_v9  ;;  %v995_v22 = vadd.f32 %v3171_v53, %v994_v11 }
 0x14e   :  { %v3254_v18 = vpop.f32.mrb[44].mxu1  ;;  %v554_v19 = vpop.f32.mrb[45].mxu0  ;;  %v1128_v21 = vadd.f32 %v1127_v12, %v1065_v10  ;;  %v2128_v27 = vadd.f32 %v3251_v58, %v2127_v16  ;;  %v1069_v46 = vmul.f32 %v3174_v13, %v3174_v13 }
 0x14f   :  { %v1067_v23 = vmul.f32 %v554_v19, %v554_v19  ;;  %v1687_v24 = vpop.f32.mrb[45].mxu1  ;;  %v3175_v25 = vpop.f32.mrb[46].mxu0  ;;  %v2261_v26 = vadd.f32 %v2260_v17, %v2198_v14  ;;  %v996_v32 = vadd.f32 %v995_v22, %v554_v19  ;;  %v2202_v50 = vmul.f32 %v3254_v18, %v3254_v18 }
 0x150   :  { %v2200_v28 = vmul.f32 %v1687_v24, %v1687_v24  ;;  %v2768_v29 = vpack.c.bf16 %v3175_v25, %v3174_v13  ;;  %v3255_v30 = vpop.f32.mrb[46].mxu1  ;;  %v557_v31 = vpop.f32.mrb[47].mxu0  ;;  %v1129_v33 = vadd.f32 %v1128_v21, %v1066_v15  ;;  %v2129_v36 = vadd.f32 %v2128_v27, %v1687_v24 }
 0x151   :  { %v2928_v34 = vpack.c.bf16 %v3255_v30, %v3254_v18  ;;  %v1690_v35 = vpop.f32.mrb[47].mxu1  ;;  %v2262_v37 = vadd.f32 %v2261_v26, %v2199_v20  ;;  %v2763_v38 = vpack.c.bf16 %v557_v31, %v554_v19  ;;  %v997_v40 = vadd.f32 %v996_v32, %v557_v31 }
 0x152   :  { %2992 = vst [vmem:[%s3850_s4 + $0xb8] sm:$0xff] %v2768_v29   ;;  %v1130_v39 = vadd.f32 %v1129_v33, %v1067_v23  ;;  %v1068_v41 = vmul.f32 %v557_v31, %v557_v31  ;;  %v2923_v42 = vpack.c.bf16 %v1690_v35, %v1687_v24  ;;  %v2130_v44 = vadd.f32 %v2129_v36, %v1690_v35 }
 0x153   :  { %3023 = vst [vmem:[%s3851_s7 + $0xb8] sm:$0xff] %v2928_v34   ;;  %v2263_v43 = vadd.f32 %v2262_v37, %v2200_v28  ;;  %2991 = vst [vmem:[%s3850_s4 + $0xb0] sm:$0xff] %v2763_v38   ;;  %v2201_v45 = vmul.f32 %v1690_v35, %v1690_v35  ;;  %v998_v47 = vadd.f32 %v3174_v13, %v997_v40 }
 0x154   :  { %v1131_v48 = vadd.f32 %v1130_v39, %v1068_v41  ;;  %3022 = vst [vmem:[%s3851_s7 + $0xb0] sm:$0xff] %v2923_v42   ;;  %v1070_v51 = vmul.f32 %v3175_v25, %v3175_v25  ;;  %v2131_v52 = vadd.f32 %v3254_v18, %v2130_v44  ;;  %v2203_v56 = vmul.f32 %v3255_v30, %v3255_v30 }
 0x155   :  { %v3178_v49 = vpop.f32.mrb[48].mxu0  ;;  %v2264_v53 = vadd.f32 %v2263_v43, %v2201_v45  ;;  %v999_v58 = vadd.f32 %v3175_v25, %v998_v47 }
 0x156   :  { %v3258_v54 = vpop.f32.mrb[48].mxu1  ;;  %v570_v55 = vpop.f32.mrb[49].mxu0  ;;  %v1132_v57 = vadd.f32 %v1131_v48, %v1069_v46  ;;  %v2132_v63 = vadd.f32 %v3255_v30, %v2131_v52  ;;  %v1073_v18 = vmul.f32 %v3178_v49, %v3178_v49 }
 0x157   :  { %v1071_v59 = vmul.f32 %v570_v55, %v570_v55  ;;  %v1703_v60 = vpop.f32.mrb[49].mxu1  ;;  %v3179_v61 = vpop.f32.mrb[50].mxu0  ;;  %v2265_v62 = vadd.f32 %v2264_v53, %v2202_v50  ;;  %v1000_v4 = vadd.f32 %v999_v58, %v570_v55  ;;  %v2206_v22 = vmul.f32 %v3258_v54, %v3258_v54 }
 0x158   :  { %v2204_v0 = vmul.f32 %v1703_v60, %v1703_v60  ;;  %v2778_v1 = vpack.c.bf16 %v3179_v61, %v3178_v49  ;;  %v3259_v2 = vpop.f32.mrb[50].mxu1  ;;  %v573_v3 = vpop.f32.mrb[51].mxu0  ;;  %v1133_v5 = vadd.f32 %v1132_v57, %v1070_v51  ;;  %v2133_v8 = vadd.f32 %v2132_v63, %v1703_v60 }
 0x159   :  { %v2938_v6 = vpack.c.bf16 %v3259_v2, %v3258_v54  ;;  %v1706_v7 = vpop.f32.mrb[51].mxu1  ;;  %v2266_v9 = vadd.f32 %v2265_v62, %v2203_v56  ;;  %v2773_v10 = vpack.c.bf16 %v573_v3, %v570_v55  ;;  %v1001_v12 = vadd.f32 %v1000_v4, %v573_v3 }
 0x15a   :  { %2994 = vst [vmem:[%s3850_s4 + $0xc8] sm:$0xff] %v2778_v1   ;;  %v1134_v11 = vadd.f32 %v1133_v5, %v1071_v59  ;;  %v1072_v13 = vmul.f32 %v573_v3, %v573_v3  ;;  %v2933_v14 = vpack.c.bf16 %v1706_v7, %v1703_v60  ;;  %v2134_v16 = vadd.f32 %v2133_v8, %v1706_v7 }
 0x15b   :  { %3025 = vst [vmem:[%s3851_s7 + $0xc8] sm:$0xff] %v2938_v6   ;;  %v2267_v15 = vadd.f32 %v2266_v9, %v2204_v0  ;;  %2993 = vst [vmem:[%s3850_s4 + $0xc0] sm:$0xff] %v2773_v10   ;;  %v2205_v17 = vmul.f32 %v1706_v7, %v1706_v7  ;;  %v1002_v19 = vadd.f32 %v3178_v49, %v1001_v12 }
 0x15c   :  { %v1135_v20 = vadd.f32 %v1134_v11, %v1072_v13  ;;  %3024 = vst [vmem:[%s3851_s7 + $0xc0] sm:$0xff] %v2933_v14   ;;  %v1074_v23 = vmul.f32 %v3179_v61, %v3179_v61  ;;  %v2135_v24 = vadd.f32 %v3258_v54, %v2134_v16  ;;  %v2207_v28 = vmul.f32 %v3259_v2, %v3259_v2 }
 0x15d   :  { %v3182_v21 = vpop.f32.mrb[52].mxu0  ;;  %v2268_v25 = vadd.f32 %v2267_v15, %v2205_v17  ;;  %v1003_v30 = vadd.f32 %v3179_v61, %v1002_v19 }
 0x15e   :  { %v3262_v26 = vpop.f32.mrb[52].mxu1  ;;  %v586_v27 = vpop.f32.mrb[53].mxu0  ;;  %v1136_v29 = vadd.f32 %v1135_v20, %v1073_v18  ;;  %v2136_v35 = vadd.f32 %v3259_v2, %v2135_v24  ;;  %v1077_v54 = vmul.f32 %v3182_v21, %v3182_v21 }
 0x15f   :  { %v1075_v31 = vmul.f32 %v586_v27, %v586_v27  ;;  %v1719_v32 = vpop.f32.mrb[53].mxu1  ;;  %v3183_v33 = vpop.f32.mrb[54].mxu0  ;;  %v2269_v34 = vadd.f32 %v2268_v25, %v2206_v22  ;;  %v1004_v40 = vadd.f32 %v1003_v30, %v586_v27  ;;  %v2210_v58 = vmul.f32 %v3262_v26, %v3262_v26 }
 0x160   :  { %v2208_v36 = vmul.f32 %v1719_v32, %v1719_v32  ;;  %v2788_v37 = vpack.c.bf16 %v3183_v33, %v3182_v21  ;;  %v3263_v38 = vpop.f32.mrb[54].mxu1  ;;  %v589_v39 = vpop.f32.mrb[55].mxu0  ;;  %v1137_v41 = vadd.f32 %v1136_v29, %v1074_v23  ;;  %v2137_v44 = vadd.f32 %v2136_v35, %v1719_v32 }
 0x161   :  { %v2948_v42 = vpack.c.bf16 %v3263_v38, %v3262_v26  ;;  %v1722_v43 = vpop.f32.mrb[55].mxu1  ;;  %v2270_v45 = vadd.f32 %v2269_v34, %v2207_v28  ;;  %v2783_v46 = vpack.c.bf16 %v589_v39, %v586_v27  ;;  %v1005_v48 = vadd.f32 %v1004_v40, %v589_v39 }
 0x162   :  { %2996 = vst [vmem:[%s3850_s4 + $0xd8] sm:$0xff] %v2788_v37   ;;  %v1138_v47 = vadd.f32 %v1137_v41, %v1075_v31  ;;  %v1076_v49 = vmul.f32 %v589_v39, %v589_v39  ;;  %v2943_v50 = vpack.c.bf16 %v1722_v43, %v1719_v32  ;;  %v2138_v52 = vadd.f32 %v2137_v44, %v1722_v43 }
 0x163   :  { %3027 = vst [vmem:[%s3851_s7 + $0xd8] sm:$0xff] %v2948_v42   ;;  %v2271_v51 = vadd.f32 %v2270_v45, %v2208_v36  ;;  %2995 = vst [vmem:[%s3850_s4 + $0xd0] sm:$0xff] %v2783_v46   ;;  %v2209_v53 = vmul.f32 %v1722_v43, %v1722_v43  ;;  %v1006_v55 = vadd.f32 %v3182_v21, %v1005_v48 }
 0x164   :  { %v1139_v56 = vadd.f32 %v1138_v47, %v1076_v49  ;;  %3026 = vst [vmem:[%s3851_s7 + $0xd0] sm:$0xff] %v2943_v50   ;;  %v1078_v59 = vmul.f32 %v3183_v33, %v3183_v33  ;;  %v2139_v60 = vadd.f32 %v3262_v26, %v2138_v52  ;;  %v2211_v0 = vmul.f32 %v3263_v38, %v3263_v38 }
 0x165   :  { %v3186_v57 = vpop.f32.mrb[56].mxu0  ;;  %v2272_v61 = vadd.f32 %v2271_v51, %v2209_v53  ;;  %v1007_v2 = vadd.f32 %v3183_v33, %v1006_v55 }
 0x166   :  { %v3266_v62 = vpop.f32.mrb[56].mxu1  ;;  %v602_v63 = vpop.f32.mrb[57].mxu0  ;;  %v1140_v1 = vadd.f32 %v1139_v56, %v1077_v54  ;;  %v2140_v7 = vadd.f32 %v3263_v38, %v2139_v60  ;;  %v1081_v26 = vmul.f32 %v3186_v57, %v3186_v57 }
 0x167   :  { %v1079_v3 = vmul.f32 %v602_v63, %v602_v63  ;;  %v1735_v4 = vpop.f32.mrb[57].mxu1  ;;  %v3187_v5 = vpop.f32.mrb[58].mxu0  ;;  %v2273_v6 = vadd.f32 %v2272_v61, %v2210_v58  ;;  %v1008_v12 = vadd.f32 %v1007_v2, %v602_v63  ;;  %v2214_v30 = vmul.f32 %v3266_v62, %v3266_v62 }
 0x168   :  { %v2212_v8 = vmul.f32 %v1735_v4, %v1735_v4  ;;  %v2798_v9 = vpack.c.bf16 %v3187_v5, %v3186_v57  ;;  %v3267_v10 = vpop.f32.mrb[58].mxu1  ;;  %v605_v11 = vpop.f32.mrb[59].mxu0  ;;  %v1141_v13 = vadd.f32 %v1140_v1, %v1078_v59  ;;  %v2141_v16 = vadd.f32 %v2140_v7, %v1735_v4 }
 0x169   :  { %v2958_v14 = vpack.c.bf16 %v3267_v10, %v3266_v62  ;;  %v1738_v15 = vpop.f32.mrb[59].mxu1  ;;  %v2274_v17 = vadd.f32 %v2273_v6, %v2211_v0  ;;  %v2793_v18 = vpack.c.bf16 %v605_v11, %v602_v63  ;;  %v1009_v20 = vadd.f32 %v1008_v12, %v605_v11 }
 0x16a   :  { %2998 = vst [vmem:[%s3850_s4 + $0xe8] sm:$0xff] %v2798_v9   ;;  %v1142_v19 = vadd.f32 %v1141_v13, %v1079_v3  ;;  %v1080_v21 = vmul.f32 %v605_v11, %v605_v11  ;;  %v2953_v22 = vpack.c.bf16 %v1738_v15, %v1735_v4  ;;  %v2142_v24 = vadd.f32 %v2141_v16, %v1738_v15 }
 0x16b   :  { %3029 = vst [vmem:[%s3851_s7 + $0xe8] sm:$0xff] %v2958_v14   ;;  %v2275_v23 = vadd.f32 %v2274_v17, %v2212_v8  ;;  %2997 = vst [vmem:[%s3850_s4 + $0xe0] sm:$0xff] %v2793_v18   ;;  %v2213_v25 = vmul.f32 %v1738_v15, %v1738_v15  ;;  %v1010_v27 = vadd.f32 %v3186_v57, %v1009_v20 }
 0x16c   :  { %v1143_v28 = vadd.f32 %v1142_v19, %v1080_v21  ;;  %3028 = vst [vmem:[%s3851_s7 + $0xe0] sm:$0xff] %v2953_v22   ;;  %v1082_v31 = vmul.f32 %v3187_v5, %v3187_v5  ;;  %v2143_v32 = vadd.f32 %v3266_v62, %v2142_v24  ;;  %v2215_v36 = vmul.f32 %v3267_v10, %v3267_v10 }
 0x16d   :  { %v3190_v29 = vpop.f32.mrb[60].mxu0  ;;  %v2276_v33 = vadd.f32 %v2275_v23, %v2213_v25  ;;  %v1011_v38 = vadd.f32 %v3187_v5, %v1010_v27 }
 0x16e   :  { %v3270_v34 = vpop.f32.mrb[60].mxu1  ;;  %v618_v35 = vpop.f32.mrb[61].mxu0  ;;  %v1144_v37 = vadd.f32 %v1143_v28, %v1081_v26  ;;  %v2144_v43 = vadd.f32 %v3267_v10, %v2143_v32  ;;  %v1085_v62 = vmul.f32 %v3190_v29, %v3190_v29 }
 0x16f   :  { %v1083_v39 = vmul.f32 %v618_v35, %v618_v35  ;;  %v1751_v40 = vpop.f32.mrb[61].mxu1  ;;  %v3191_v41 = vpop.f32.mrb[62].mxu0  ;;  %v2277_v42 = vadd.f32 %v2276_v33, %v2214_v30  ;;  %v1012_v48 = vadd.f32 %v1011_v38, %v618_v35  ;;  %v2218_v1 = vmul.f32 %v3270_v34, %v3270_v34 }
 0x170   :  { %v2216_v44 = vmul.f32 %v1751_v40, %v1751_v40  ;;  %v2808_v45 = vpack.c.bf16 %v3191_v41, %v3190_v29  ;;  %v3271_v46 = vpop.f32.mrb[62].mxu1  ;;  %v621_v47 = vpop.f32.mrb[63].mxu0  ;;  %v1145_v49 = vadd.f32 %v1144_v37, %v1082_v31  ;;  %v2145_v52 = vadd.f32 %v2144_v43, %v1751_v40 }
 0x171   :  { %v2968_v50 = vpack.c.bf16 %v3271_v46, %v3270_v34  ;;  %v1754_v51 = vpop.f32.mrb[63].mxu1  ;;  %v2278_v53 = vadd.f32 %v2277_v42, %v2215_v36  ;;  %v2803_v54 = vpack.c.bf16 %v621_v47, %v618_v35  ;;  %v1013_v56 = vadd.f32 %v1012_v48, %v621_v47 }
 0x172   :  { %3000 = vst [vmem:[%s3850_s4 + $0xf8] sm:$0xff] %v2808_v45   ;;  %v1146_v55 = vadd.f32 %v1145_v49, %v1083_v39  ;;  %v1084_v57 = vmul.f32 %v621_v47, %v621_v47  ;;  %v2963_v58 = vpack.c.bf16 %v1754_v51, %v1751_v40  ;;  %v2146_v60 = vadd.f32 %v2145_v52, %v1754_v51 }
 0x173   :  { %3031 = vst [vmem:[%s3851_s7 + $0xf8] sm:$0xff] %v2968_v50   ;;  %v2279_v59 = vadd.f32 %v2278_v53, %v2216_v44  ;;  %2999 = vst [vmem:[%s3850_s4 + $0xf0] sm:$0xff] %v2803_v54   ;;  %v2217_v61 = vmul.f32 %v1754_v51, %v1754_v51  ;;  %v1014_v63 = vadd.f32 %v3190_v29, %v1013_v56 }
 0x174   :  { %v1147_v0 = vadd.f32 %v1146_v55, %v1084_v57  ;;  %3030 = vst [vmem:[%s3851_s7 + $0xf0] sm:$0xff] %v2963_v58   ;;  %v2147_v2 = vadd.f32 %v3270_v34, %v2146_v60  ;;  %v1086_v4 = vmul.f32 %v3191_v41, %v3191_v41  ;;  %v2219_v7 = vmul.f32 %v3271_v46, %v3271_v46 }
 0x175   :  { %v2280_v3 = vadd.f32 %v2279_v59, %v2217_v61  ;;  %v1015_v5 = vadd.f32 %v3191_v41, %v1014_v63 }
 0x176   :  { %v1148_v6 = vadd.f32 %v1147_v0, %v1085_v62  ;;  %v2148_v8 = vadd.f32 %v3271_v46, %v2147_v2 }
 0x177   :  { %v2281_v9 = vadd.f32 %v2280_v3, %v2218_v1  ;;  %v1016_v10 = vrot.slane %v1015_v5, 4 }
 0x178   :  { %v1149_v11 = vadd.f32 %v1148_v6, %v1086_v4  ;;  %v2149_v12 = vrot.slane %v2148_v8, 4 }
 0x179   :  { %v2282_v13 = vadd.f32 %v2281_v9, %v2219_v7  ;;  %v1017_v14 = vadd.f32 %v1016_v10, %v1015_v5 }
 0x17a   :  { %v1150_v15 = vrot.slane %v1149_v11, 4  ;;  %v2150_v16 = vadd.f32 %v2149_v12, %v2148_v8 }
 0x17b   :  { %v2283_v17 = vrot.slane %v2282_v13, 4  ;;  %v1018_v18 = vrot.slane %v1017_v14, 2 }
 0x17c   :  { %v1151_v19 = vadd.f32 %v1150_v15, %v1149_v11  ;;  %v2151_v20 = vrot.slane %v2150_v16, 2 }
 0x17d   :  { %v2284_v21 = vadd.f32 %v2283_v17, %v2282_v13  ;;  %v1019_v22 = vadd.f32 %v1018_v18, %v1017_v14 }
 0x17e   :  { %v1152_v23 = vrot.slane %v1151_v19, 2  ;;  %v2152_v24 = vadd.f32 %v2151_v20, %v2150_v16 }
 0x17f   :  { %v2285_v25 = vrot.slane %v2284_v21, 2  ;;  %v1020_v26 = vrot.slane %v1019_v22, 1 }
 0x180   :  { %v1153_v27 = vadd.f32 %v1152_v23, %v1151_v19  ;;  %v2153_v28 = vrot.slane %v2152_v24, 1 }
 0x181   :  { %v2286_v29 = vadd.f32 %v2285_v25, %v2284_v21  ;;  %v1021_v30 = vadd.f32 %v1020_v26, %v1019_v22 }
 0x182   :  { %v1154_v31 = vrot.slane %v1153_v27, 1  ;;  %v2154_v32 = vadd.f32 %v2153_v28, %v2152_v24 }
 0x183   :  { %v2287_v33 = vrot.slane %v2286_v29, 1  ;;  %1022 = vst [vmem:[%s3852_s5] sm:$0xff] %v1021_v30 }
 0x184   :  { %v1155_v34 = vadd.f32 %v1154_v31, %v1153_v27  ;;  %2155 = vst [vmem:[%s3853_s8] sm:$0xff] %v2154_v32 }
 0x185   :  { %v2288_v35 = vadd.f32 %v2287_v33, %v2286_v29 }
 0x186   :  { %1156 = vst [vmem:[%s3854_s6] sm:$0xff] %v1155_v34 }
 0x187   :  { %2289 = vst [vmem:[%s3855_s9] sm:$0xff] %v2288_v35 }

// kernel: tile.10
= control target key start
LH: loop header
LB: loop body
LE: loop exit
PB: predicated region body
PF: predicated region fallthrough
CT: control target
= control target key end

     0   :  { %s28_s0 = inlined_call_operand.vmem [shape: f32[16], index: 0, kind: input, shape index: {}]   ;;  %s29_s1 = inlined_call_operand.vmem [shape: f32[9,16], index: 1, kind: output, shape index: {}]  }
   0x1   :  { %v4_v0 = vld [vmem:[%s28_s0] ss:$0 sm:$0xff] }
   0x2   :  { %5 = vst [vmem:[%s29_s1] sm:$0xff] %v4_v0  ;;  %8 = vst [vmem:[%s29_s1 + $0x8] sm:$0xff] %v4_v0 }

// kernel: tile.11
= control target key start
LH: loop header
LB: loop body
LE: loop exit
PB: predicated region body
PF: predicated region fallthrough
CT: control target
= control target key end

     0   :  { %s68_s10 = smov 112   ;;  %s69_s11 = smov 80   ;;  %vm4_vm0 = vcmask 130048   ;;  %vm10_vm1 = vcmask 1048448   ;;  %vm16_vm2 = vcmask 917248   ;;  %vm22_vm3 = vcmask 786048   ;;  %s112_s0 = inlined_call_operand.vmem [shape: f32[9,16], index: 0, kind: input, shape index: {}]   ;;  %s113_s1 = inlined_call_operand.vmem [shape: f32[144], index: 1, kind: output, shape index: {}]  }
   0x1   :  { %v54_v0 = vld [vmem:[%s112_s0 + $0x7] sm:$0x1]   ;;  %v56_v1 = vld [vmem:[%s112_s0 + $0x5] sm:$0x1]   ;;  %v55_v2 = vld [vmem:[%s112_s0 + $0x6] sm:$0x1]  }
   0x2   :  { %8 = vrot.lane.b32.xlu0 %v54_v0, %s68_s10  ;;  %20 = vrot.lane.b32.xlu1 %v56_v1, %s69_s11  ;;  %v57_v3 = vld [vmem:[%s112_s0 + $0x4] sm:$0x1]   ;;  %s2_s16 = smov 3  ;;  %s70_s19 = smov 96   ;;  %v58_v5 = vld [vmem:[%s112_s0 + $0x3] sm:$0x1]  }
   0x3   :  { %v3_v4 = vld [vmem:[%s112_s0] ss:$8 sm:%s2_s16]   ;;  %s71_s20 = smov 64   ;;  %v59_v6 = vld [vmem:[%s112_s0 + $0x2] sm:$0x1]   ;;  %s72_s25 = smov 48  }
   0x4   :  { %5 = vst.msk [vmem:[#allocation0] sm:$0x3] %vm4_vm0, %v3_v4   ;;  %s73_s26 = smov 32   ;;  %v60_v7 = vld [vmem:[%s112_s0 + $0x1] sm:$0x1]   ;;  %s74_s0 = smov 16  }
   0x5   :  { %vm28_vm4 = vcmask 654848   ;;  %vm34_vm5 = vcmask 523648   ;;  %vm40_vm6 = vcmask 392448   ;;  %vm46_vm7 = vcmask 261248  }
   0x6   :  { %14 = vrot.lane.b32.xlu0 %v55_v2, %s70_s19  ;;  %26 = vrot.lane.b32.xlu1 %v57_v3, %s71_s20 }
   0xa   :  { %32 = vrot.lane.b32.xlu0 %v58_v5, %s72_s25  ;;  %38 = vrot.lane.b32.xlu1 %v59_v6, %s73_s26 }
   0xe   :  { %44 = vrot.lane.b32.xlu0 %v60_v7, %s74_s0 }
  0x74   :  { %v9_v8 = vpop.permute.xlu0 %8   ;;  %v21_v9 = vpop.permute.xlu1 %20  }
  0x75   :  { %11 = vst.msk [vmem:[#allocation0] sm:$0x1] %vm10_vm1, %v9_v8  }
  0x78   :  { %v15_v10 = vpop.permute.xlu0 %14   ;;  %v27_v11 = vpop.permute.xlu1 %26  }
  0x79   :  { %17 = vst.msk [vmem:[#allocation0] sm:$0x1] %vm16_vm2, %v15_v10  }
  0x7a   :  { %23 = vst.msk [vmem:[#allocation0] sm:$0x1] %vm22_vm3, %v21_v9  }
  0x7b   :  { %29 = vst.msk [vmem:[#allocation0] sm:$0x1] %vm28_vm4, %v27_v11  }
  0x7c   :  { %v33_v12 = vpop.permute.xlu0 %32   ;;  %v39_v13 = vpop.permute.xlu1 %38  }
  0x7d   :  { %35 = vst.msk [vmem:[#allocation0] sm:$0x1] %vm34_vm5, %v33_v12  }
  0x7e   :  { %41 = vst.msk [vmem:[#allocation0] sm:$0x1] %vm40_vm6, %v39_v13  }
  0x80   :  { %v45_v14 = vpop.permute.xlu0 %44  }
  0x81   :  { %47 = vst.msk [vmem:[#allocation0] sm:$0x1] %vm46_vm7, %v45_v14  }
  0x88   :  { %v51_v15 = vld [vmem:[#allocation0] sm:$0x3] }
  0x89   :  { %53 = vst [vmem:[%s113_s1] sm:$0x3] %v51_v15 }

// kernel: basic_block_forward.5
= control target key start
LH: loop header
LB: loop body
LE: loop exit
PB: predicated region body
PF: predicated region fallthrough
CT: control target
= control target key end

     0   :  { %s1800_s0 = inlined_call_operand.vmem [shape: bf16[512,128], index: 0, kind: input, shape index: {}]   ;;  %s1801_s1 = inlined_call_operand.vmem [shape: f32[1,128], index: 1, kind: input, shape index: {}]   ;;  %s1802_s2 = inlined_call_operand.vmem [shape: f32[1,128], index: 2, kind: input, shape index: {}]   ;;  %s1803_s3 = inlined_call_operand.vmem [shape: bf16[512,128], index: 3, kind: input, shape index: {}]   ;;  %s1804_s4 = inlined_call_operand.vmem [shape: f32[1,128], index: 4, kind: input, shape index: {}]   ;;  %s1805_s5 = inlined_call_operand.vmem [shape: f32[1,128], index: 5, kind: input, shape index: {}]   ;;  %s1806_s6 = inlined_call_operand.vmem [shape: f32[512,128], index: 6, kind: output, shape index: {}]  }
   0x1   :  { %v764_v0 = vld [vmem:[%s1800_s0] sm:$0xff]   ;;  %v1019_v9 = vld [vmem:[%s1800_s0 + $0x8] sm:$0xff]   ;;  %v1020_v20 = vld [vmem:[%s1800_s0 + $0x10] sm:$0xff]  }
   0x2   :  { %v1126_v1 = vld [vmem:[%s1801_s1] ss:$0 sm:$0xff]  ;;  %v765_v2 = vunpack.c.l.bf16 %v764_v0  ;;  %v766_v5 = vunpack.c.h.bf16 %v764_v0  ;;  %v1050_v10 = vld [vmem:[%s1803_s3 + $0x8] sm:$0xff]   ;;  %v769_v14 = vunpack.c.l.bf16 %v1019_v9  ;;  %v770_v18 = vunpack.c.h.bf16 %v1019_v9  ;;  %v1051_v21 = vld [vmem:[%s1803_s3 + $0x10] sm:$0xff]  }
   0x3   :  { %v892_v3 = vld [vmem:[%s1803_s3] sm:$0xff]   ;;  %v897_v15 = vunpack.c.l.bf16 %v1050_v10  ;;  %v898_v19 = vunpack.c.h.bf16 %v1050_v10  ;;  %v773_v32 = vunpack.c.l.bf16 %v1020_v20  ;;  %v901_v33 = vunpack.c.l.bf16 %v1051_v21  ;;  %v1021_v42 = vld [vmem:[%s1800_s0 + $0x18] sm:$0xff]  }
   0x4   :  { %v1134_v4 = vld [vmem:[%s1804_s4] ss:$0 sm:$0xff]  ;;  %v893_v7 = vunpack.c.l.bf16 %v892_v3  ;;  %v894_v8 = vunpack.c.h.bf16 %v892_v3  ;;  %v158_v11 = vmul.f32 %v765_v2, %v1126_v1  ;;  %v159_v13 = vmul.f32 %v766_v5, %v1126_v1  ;;  %v1052_v43 = vld [vmem:[%s1803_s3 + $0x18] sm:$0xff]  }
   0x5   :  { %v1139_v6 = vld [vmem:[%s1802_s2] ss:$0 sm:$0xff]  ;;  %v160_v24 = vmul.f32 %v769_v14, %v1126_v1  ;;  %v430_v25 = vmul.f32 %v897_v15, %v1134_v4  ;;  %v161_v28 = vmul.f32 %v770_v18, %v1126_v1  ;;  %v431_v29 = vmul.f32 %v898_v19, %v1134_v4  ;;  %v1023_v14 = vld [vmem:[%s1800_s0 + $0x28] sm:$0xff]  }
   0x6   :  { %v1151_v12 = vld [vmem:[%s1805_s5] ss:$0 sm:$0xff]  ;;  %v428_v16 = vmul.f32 %v893_v7, %v1134_v4  ;;  %v429_v17 = vmul.f32 %v894_v8, %v1134_v4  ;;  %v229_v22 = vadd.f32 %v1139_v6, %v158_v11  ;;  %v230_v23 = vadd.f32 %v1139_v6, %v159_v13  ;;  %v1054_v19 = vld [vmem:[%s1803_s3 + $0x28] sm:$0xff]  }
   0x7   :  { %v231_v30 = vadd.f32 %v1139_v6, %v160_v24  ;;  %v501_v31 = vadd.f32 %v1151_v12, %v430_v25  ;;  %v232_v36 = vadd.f32 %v1139_v6, %v161_v28  ;;  %v502_v37 = vadd.f32 %v1151_v12, %v431_v29  ;;  %v1022_v52 = vld [vmem:[%s1800_s0 + $0x20] sm:$0xff]  }
   0x8   :  { %v499_v26 = vadd.f32 %v1151_v12, %v428_v16  ;;  %v500_v27 = vadd.f32 %v1151_v12, %v429_v17  ;;  %v162_v39 = vmul.f32 %v773_v32, %v1126_v1  ;;  %v432_v40 = vmul.f32 %v901_v33, %v1134_v4  ;;  %v1053_v57 = vld [vmem:[%s1803_s3 + $0x20] sm:$0xff]   ;;  %v1024_v32 = vld [vmem:[%s1800_s0 + $0x30] sm:$0xff]  }
   0x9   :  { %v565_v38 = vadd.f32 %v501_v31, %v231_v30  ;;  %v774_v41 = vunpack.c.h.bf16 %v1020_v20  ;;  %v566_v46 = vadd.f32 %v502_v37, %v232_v36  ;;  %v902_v47 = vunpack.c.h.bf16 %v1051_v21  ;;  %v1055_v33 = vld [vmem:[%s1803_s3 + $0x30] sm:$0xff]  }
   0xa   :  { %v563_v34 = vadd.f32 %v499_v26, %v229_v22  ;;  %v564_v35 = vadd.f32 %v500_v27, %v230_v23  ;;  %v233_v49 = vadd.f32 %v1139_v6, %v162_v39  ;;  %v503_v50 = vadd.f32 %v1151_v12, %v432_v40 }
   0xb   :  { %v629_v48 = vmax.f32 %v565_v38, 0.0  ;;  %v163_v51 = vmul.f32 %v774_v41, %v1126_v1  ;;  %v630_v53 = vmax.f32 %v566_v46, 0.0  ;;  %v433_v54 = vmul.f32 %v902_v47, %v1134_v4  ;;  %v1025_v46 = vld [vmem:[%s1800_s0 + $0x38] sm:$0xff]  }
   0xc   :  { %v627_v44 = vmax.f32 %v563_v34, 0.0  ;;  %v628_v45 = vmax.f32 %v564_v35, 0.0  ;;  %v777_v55 = vunpack.c.l.bf16 %v1021_v42  ;;  %v905_v56 = vunpack.c.l.bf16 %v1052_v43 }
   0xd   :  { %693 = vst [vmem:[%s1806_s6 + $0x10] sm:$0xff] %v629_v48  ;;  %v567_v58 = vadd.f32 %v503_v50, %v233_v49  ;;  %v234_v59 = vadd.f32 %v1139_v6, %v163_v51  ;;  %v778_v60 = vunpack.c.h.bf16 %v1021_v42  ;;  %v906_v61 = vunpack.c.h.bf16 %v1052_v43  ;;  %694 = vst [vmem:[%s1806_s6 + $0x18] sm:$0xff] %v630_v53 }
   0xe   :  { %691 = vst [vmem:[%s1806_s6] sm:$0xff] %v627_v44  ;;  %692 = vst [vmem:[%s1806_s6 + $0x8] sm:$0xff] %v628_v45  ;;  %v504_v62 = vadd.f32 %v1151_v12, %v433_v54  ;;  %v164_v63 = vmul.f32 %v777_v55, %v1126_v1  ;;  %v434_v0 = vmul.f32 %v905_v56, %v1134_v4  ;;  %v781_v2 = vunpack.c.l.bf16 %v1022_v52  ;;  %v1056_v55 = vld [vmem:[%s1803_s3 + $0x38] sm:$0xff]  }
   0xf   :  { %v631_v3 = vmax.f32 %v567_v58, 0.0  ;;  %v165_v5 = vmul.f32 %v778_v60, %v1126_v1  ;;  %v435_v7 = vmul.f32 %v906_v61, %v1134_v4  ;;  %v909_v8 = vunpack.c.l.bf16 %v1053_v57 }
  0x10   :  { %v568_v9 = vadd.f32 %v504_v62, %v234_v59  ;;  %v235_v10 = vadd.f32 %v1139_v6, %v164_v63  ;;  %v505_v11 = vadd.f32 %v1151_v12, %v434_v0  ;;  %v166_v13 = vmul.f32 %v781_v2, %v1126_v1 }
  0x11   :  { %695 = vst [vmem:[%s1806_s6 + $0x20] sm:$0xff] %v631_v3  ;;  %v236_v15 = vadd.f32 %v1139_v6, %v165_v5  ;;  %v506_v16 = vadd.f32 %v1151_v12, %v435_v7  ;;  %v436_v17 = vmul.f32 %v909_v8, %v1134_v4  ;;  %v782_v18 = vunpack.c.h.bf16 %v1022_v52  ;;  %v1026_v7 = vld [vmem:[%s1800_s0 + $0x40] sm:$0xff]  }
  0x12   :  { %v632_v20 = vmax.f32 %v568_v9, 0.0  ;;  %v569_v21 = vadd.f32 %v505_v11, %v235_v10  ;;  %v237_v22 = vadd.f32 %v1139_v6, %v166_v13  ;;  %v910_v23 = vunpack.c.h.bf16 %v1053_v57  ;;  %v1057_v13 = vld [vmem:[%s1803_s3 + $0x40] sm:$0xff]  }
  0x13   :  { %v570_v24 = vadd.f32 %v506_v16, %v236_v15  ;;  %v507_v25 = vadd.f32 %v1151_v12, %v436_v17  ;;  %v167_v26 = vmul.f32 %v782_v18, %v1126_v1  ;;  %v785_v27 = vunpack.c.l.bf16 %v1023_v14 }
  0x14   :  { %696 = vst [vmem:[%s1806_s6 + $0x28] sm:$0xff] %v632_v20  ;;  %v633_v28 = vmax.f32 %v569_v21, 0.0  ;;  %v437_v29 = vmul.f32 %v910_v23, %v1134_v4  ;;  %v913_v30 = vunpack.c.l.bf16 %v1054_v19  ;;  %v786_v31 = vunpack.c.h.bf16 %v1023_v14 }
  0x15   :  { %v634_v34 = vmax.f32 %v570_v24, 0.0  ;;  %v571_v35 = vadd.f32 %v507_v25, %v237_v22  ;;  %v238_v36 = vadd.f32 %v1139_v6, %v167_v26  ;;  %v168_v37 = vmul.f32 %v785_v27, %v1126_v1  ;;  %v1027_v26 = vld [vmem:[%s1800_s0 + $0x48] sm:$0xff]  }
  0x16   :  { %697 = vst [vmem:[%s1806_s6 + $0x30] sm:$0xff] %v633_v28  ;;  %v508_v38 = vadd.f32 %v1151_v12, %v437_v29  ;;  %v438_v39 = vmul.f32 %v913_v30, %v1134_v4  ;;  %v169_v40 = vmul.f32 %v786_v31, %v1126_v1  ;;  %v914_v41 = vunpack.c.h.bf16 %v1054_v19  ;;  %v1058_v27 = vld [vmem:[%s1803_s3 + $0x48] sm:$0xff]  }
  0x17   :  { %698 = vst [vmem:[%s1806_s6 + $0x38] sm:$0xff] %v634_v34  ;;  %v635_v42 = vmax.f32 %v571_v35, 0.0  ;;  %v239_v43 = vadd.f32 %v1139_v6, %v168_v37  ;;  %v789_v44 = vunpack.c.l.bf16 %v1024_v32  ;;  %v917_v45 = vunpack.c.l.bf16 %v1055_v33 }
  0x18   :  { %v572_v47 = vadd.f32 %v508_v38, %v238_v36  ;;  %v509_v48 = vadd.f32 %v1151_v12, %v438_v39  ;;  %v240_v49 = vadd.f32 %v1139_v6, %v169_v40  ;;  %v439_v50 = vmul.f32 %v914_v41, %v1134_v4  ;;  %v1028_v40 = vld [vmem:[%s1800_s0 + $0x50] sm:$0xff]  }
  0x19   :  { %699 = vst [vmem:[%s1806_s6 + $0x40] sm:$0xff] %v635_v42  ;;  %v170_v51 = vmul.f32 %v789_v44, %v1126_v1  ;;  %v440_v52 = vmul.f32 %v917_v45, %v1134_v4  ;;  %v790_v53 = vunpack.c.h.bf16 %v1024_v32  ;;  %v918_v54 = vunpack.c.h.bf16 %v1055_v33 }
  0x1a   :  { %v636_v56 = vmax.f32 %v572_v47, 0.0  ;;  %v573_v57 = vadd.f32 %v509_v48, %v239_v43  ;;  %v510_v58 = vadd.f32 %v1151_v12, %v439_v50  ;;  %v793_v59 = vunpack.c.l.bf16 %v1025_v46 }
  0x1b   :  { %v241_v60 = vadd.f32 %v1139_v6, %v170_v51  ;;  %v511_v61 = vadd.f32 %v1151_v12, %v440_v52  ;;  %v171_v62 = vmul.f32 %v790_v53, %v1126_v1  ;;  %v441_v63 = vmul.f32 %v918_v54, %v1134_v4 }
  0x1c   :  { %700 = vst [vmem:[%s1806_s6 + $0x48] sm:$0xff] %v636_v56  ;;  %v637_v0 = vmax.f32 %v573_v57, 0.0  ;;  %v574_v2 = vadd.f32 %v510_v58, %v240_v49  ;;  %v172_v3 = vmul.f32 %v793_v59, %v1126_v1  ;;  %v921_v5 = vunpack.c.l.bf16 %v1056_v55  ;;  %v1059_v49 = vld [vmem:[%s1803_s3 + $0x50] sm:$0xff]  }
  0x1d   :  { %v575_v8 = vadd.f32 %v511_v61, %v241_v60  ;;  %v242_v9 = vadd.f32 %v1139_v6, %v171_v62  ;;  %v512_v10 = vadd.f32 %v1151_v12, %v441_v63  ;;  %v794_v11 = vunpack.c.h.bf16 %v1025_v46  ;;  %v1029_v62 = vld [vmem:[%s1800_s0 + $0x58] sm:$0xff]  }
  0x1e   :  { %701 = vst [vmem:[%s1806_s6 + $0x50] sm:$0xff] %v637_v0  ;;  %v638_v14 = vmax.f32 %v574_v2, 0.0  ;;  %v243_v15 = vadd.f32 %v1139_v6, %v172_v3  ;;  %v442_v16 = vmul.f32 %v921_v5, %v1134_v4  ;;  %v922_v17 = vunpack.c.h.bf16 %v1056_v55  ;;  %v1060_v63 = vld [vmem:[%s1803_s3 + $0x58] sm:$0xff]  }
  0x1f   :  { %v639_v18 = vmax.f32 %v575_v8, 0.0  ;;  %v576_v19 = vadd.f32 %v512_v10, %v242_v9  ;;  %v173_v20 = vmul.f32 %v794_v11, %v1126_v1  ;;  %v797_v21 = vunpack.c.l.bf16 %v1026_v7 }
  0x20   :  { %702 = vst [vmem:[%s1806_s6 + $0x58] sm:$0xff] %v638_v14  ;;  %v513_v22 = vadd.f32 %v1151_v12, %v442_v16  ;;  %v443_v23 = vmul.f32 %v922_v17, %v1134_v4  ;;  %v925_v24 = vunpack.c.l.bf16 %v1057_v13  ;;  %v798_v25 = vunpack.c.h.bf16 %v1026_v7 }
  0x21   :  { %703 = vst [vmem:[%s1806_s6 + $0x60] sm:$0xff] %v639_v18  ;;  %v640_v28 = vmax.f32 %v576_v19, 0.0  ;;  %v244_v29 = vadd.f32 %v1139_v6, %v173_v20  ;;  %v174_v30 = vmul.f32 %v797_v21, %v1126_v1  ;;  %v926_v31 = vunpack.c.h.bf16 %v1057_v13  ;;  %v1030_v20 = vld [vmem:[%s1800_s0 + $0x60] sm:$0xff]  }
  0x22   :  { %v577_v32 = vadd.f32 %v513_v22, %v243_v15  ;;  %v514_v33 = vadd.f32 %v1151_v12, %v443_v23  ;;  %v444_v34 = vmul.f32 %v925_v24, %v1134_v4  ;;  %v175_v35 = vmul.f32 %v798_v25, %v1126_v1  ;;  %v1061_v25 = vld [vmem:[%s1803_s3 + $0x60] sm:$0xff]  }
  0x23   :  { %704 = vst [vmem:[%s1806_s6 + $0x68] sm:$0xff] %v640_v28  ;;  %v245_v36 = vadd.f32 %v1139_v6, %v174_v30  ;;  %v445_v37 = vmul.f32 %v926_v31, %v1134_v4  ;;  %v801_v38 = vunpack.c.l.bf16 %v1027_v26  ;;  %v929_v39 = vunpack.c.l.bf16 %v1058_v27 }
  0x24   :  { %v641_v41 = vmax.f32 %v577_v32, 0.0  ;;  %v578_v42 = vadd.f32 %v514_v33, %v244_v29  ;;  %v515_v43 = vadd.f32 %v1151_v12, %v444_v34  ;;  %v246_v44 = vadd.f32 %v1139_v6, %v175_v35  ;;  %v1031_v34 = vld [vmem:[%s1800_s0 + $0x68] sm:$0xff]  }
  0x25   :  { %v516_v45 = vadd.f32 %v1151_v12, %v445_v37  ;;  %v176_v46 = vmul.f32 %v801_v38, %v1126_v1  ;;  %v446_v47 = vmul.f32 %v929_v39, %v1134_v4  ;;  %v802_v48 = vunpack.c.h.bf16 %v1027_v26 }
  0x26   :  { %705 = vst [vmem:[%s1806_s6 + $0x70] sm:$0xff] %v641_v41  ;;  %v642_v50 = vmax.f32 %v578_v42, 0.0  ;;  %v579_v51 = vadd.f32 %v515_v43, %v245_v36  ;;  %v930_v52 = vunpack.c.h.bf16 %v1058_v27  ;;  %v805_v53 = vunpack.c.l.bf16 %v1028_v40  ;;  %v1062_v43 = vld [vmem:[%s1803_s3 + $0x68] sm:$0xff]  }
  0x27   :  { %v580_v54 = vadd.f32 %v516_v45, %v246_v44  ;;  %v247_v55 = vadd.f32 %v1139_v6, %v176_v46  ;;  %v517_v56 = vadd.f32 %v1151_v12, %v446_v47  ;;  %v177_v57 = vmul.f32 %v802_v48, %v1126_v1 }
  0x28   :  { %706 = vst [vmem:[%s1806_s6 + $0x78] sm:$0xff] %v642_v50  ;;  %v643_v58 = vmax.f32 %v579_v51, 0.0  ;;  %v447_v59 = vmul.f32 %v930_v52, %v1134_v4  ;;  %v178_v60 = vmul.f32 %v805_v53, %v1126_v1  ;;  %v933_v61 = vunpack.c.l.bf16 %v1059_v49 }
  0x29   :  { %v644_v0 = vmax.f32 %v580_v54, 0.0  ;;  %v581_v2 = vadd.f32 %v517_v56, %v247_v55  ;;  %v248_v3 = vadd.f32 %v1139_v6, %v177_v57  ;;  %v806_v5 = vunpack.c.h.bf16 %v1028_v40  ;;  %v1032_v56 = vld [vmem:[%s1800_s0 + $0x70] sm:$0xff]  }
  0x2a   :  { %707 = vst [vmem:[%s1806_s6 + $0x80] sm:$0xff] %v643_v58  ;;  %v518_v7 = vadd.f32 %v1151_v12, %v447_v59  ;;  %v249_v8 = vadd.f32 %v1139_v6, %v178_v60  ;;  %v448_v9 = vmul.f32 %v933_v61, %v1134_v4  ;;  %v934_v10 = vunpack.c.h.bf16 %v1059_v49  ;;  %v1063_v57 = vld [vmem:[%s1803_s3 + $0x70] sm:$0xff]  }
  0x2b   :  { %708 = vst [vmem:[%s1806_s6 + $0x88] sm:$0xff] %v644_v0  ;;  %v645_v11 = vmax.f32 %v581_v2, 0.0  ;;  %v179_v13 = vmul.f32 %v806_v5, %v1126_v1  ;;  %v809_v14 = vunpack.c.l.bf16 %v1029_v62  ;;  %v937_v15 = vunpack.c.l.bf16 %v1060_v63 }
  0x2c   :  { %v582_v16 = vadd.f32 %v518_v7, %v248_v3  ;;  %v519_v17 = vadd.f32 %v1151_v12, %v448_v9  ;;  %v449_v18 = vmul.f32 %v934_v10, %v1134_v4  ;;  %v810_v19 = vunpack.c.h.bf16 %v1029_v62 }
  0x2d   :  { %709 = vst [vmem:[%s1806_s6 + $0x90] sm:$0xff] %v645_v11  ;;  %v250_v21 = vadd.f32 %v1139_v6, %v179_v13  ;;  %v180_v22 = vmul.f32 %v809_v14, %v1126_v1  ;;  %v450_v23 = vmul.f32 %v937_v15, %v1134_v4  ;;  %v938_v24 = vunpack.c.h.bf16 %v1060_v63  ;;  %v1033_v14 = vld [vmem:[%s1800_s0 + $0x78] sm:$0xff]  }
  0x2e   :  { %v646_v26 = vmax.f32 %v582_v16, 0.0  ;;  %v583_v27 = vadd.f32 %v519_v17, %v249_v8  ;;  %v520_v28 = vadd.f32 %v1151_v12, %v449_v18  ;;  %v181_v29 = vmul.f32 %v810_v19, %v1126_v1  ;;  %v1064_v19 = vld [vmem:[%s1803_s3 + $0x78] sm:$0xff]  }
  0x2f   :  { %v251_v30 = vadd.f32 %v1139_v6, %v180_v22  ;;  %v521_v31 = vadd.f32 %v1151_v12, %v450_v23  ;;  %v451_v32 = vmul.f32 %v938_v24, %v1134_v4  ;;  %v813_v33 = vunpack.c.l.bf16 %v1030_v20 }
  0x30   :  { %710 = vst [vmem:[%s1806_s6 + $0x98] sm:$0xff] %v646_v26  ;;  %v647_v35 = vmax.f32 %v583_v27, 0.0  ;;  %v584_v36 = vadd.f32 %v520_v28, %v250_v21  ;;  %v252_v37 = vadd.f32 %v1139_v6, %v181_v29  ;;  %v941_v38 = vunpack.c.l.bf16 %v1061_v25  ;;  %v1034_v28 = vld [vmem:[%s1800_s0 + $0x80] sm:$0xff]  }
  0x31   :  { %v585_v39 = vadd.f32 %v521_v31, %v251_v30  ;;  %v522_v40 = vadd.f32 %v1151_v12, %v451_v32  ;;  %v182_v41 = vmul.f32 %v813_v33, %v1126_v1  ;;  %v814_v42 = vunpack.c.h.bf16 %v1030_v20  ;;  %v1065_v33 = vld [vmem:[%s1803_s3 + $0x80] sm:$0xff]  }
  0x32   :  { %711 = vst [vmem:[%s1806_s6 + $0xa0] sm:$0xff] %v647_v35  ;;  %v648_v44 = vmax.f32 %v584_v36, 0.0  ;;  %v452_v45 = vmul.f32 %v941_v38, %v1134_v4  ;;  %v942_v46 = vunpack.c.h.bf16 %v1061_v25  ;;  %v817_v47 = vunpack.c.l.bf16 %v1031_v34 }
  0x33   :  { %v649_v48 = vmax.f32 %v585_v39, 0.0  ;;  %v586_v49 = vadd.f32 %v522_v40, %v252_v37  ;;  %v253_v50 = vadd.f32 %v1139_v6, %v182_v41  ;;  %v183_v51 = vmul.f32 %v814_v42, %v1126_v1 }
  0x34   :  { %712 = vst [vmem:[%s1806_s6 + $0xa8] sm:$0xff] %v648_v44  ;;  %v523_v52 = vadd.f32 %v1151_v12, %v452_v45  ;;  %v453_v53 = vmul.f32 %v942_v46, %v1134_v4  ;;  %v184_v54 = vmul.f32 %v817_v47, %v1126_v1  ;;  %v945_v55 = vunpack.c.l.bf16 %v1062_v43 }
  0x35   :  { %713 = vst [vmem:[%s1806_s6 + $0xb0] sm:$0xff] %v649_v48  ;;  %v650_v58 = vmax.f32 %v586_v49, 0.0  ;;  %v254_v59 = vadd.f32 %v1139_v6, %v183_v51  ;;  %v818_v60 = vunpack.c.h.bf16 %v1031_v34  ;;  %v946_v61 = vunpack.c.h.bf16 %v1062_v43 }
  0x36   :  { %v587_v62 = vadd.f32 %v523_v52, %v253_v50  ;;  %v524_v63 = vadd.f32 %v1151_v12, %v453_v53  ;;  %v255_v0 = vadd.f32 %v1139_v6, %v184_v54  ;;  %v454_v2 = vmul.f32 %v945_v55, %v1134_v4  ;;  %v1035_v50 = vld [vmem:[%s1800_s0 + $0x88] sm:$0xff]  }
  0x37   :  { %714 = vst [vmem:[%s1806_s6 + $0xb8] sm:$0xff] %v650_v58  ;;  %v185_v3 = vmul.f32 %v818_v60, %v1126_v1  ;;  %v455_v5 = vmul.f32 %v946_v61, %v1134_v4  ;;  %v821_v7 = vunpack.c.l.bf16 %v1032_v56  ;;  %v949_v8 = vunpack.c.l.bf16 %v1063_v57  ;;  %v1066_v55 = vld [vmem:[%s1803_s3 + $0x88] sm:$0xff]  }
  0x38   :  { %v651_v9 = vmax.f32 %v587_v62, 0.0  ;;  %v588_v10 = vadd.f32 %v524_v63, %v254_v59  ;;  %v525_v11 = vadd.f32 %v1151_v12, %v454_v2  ;;  %v822_v13 = vunpack.c.h.bf16 %v1032_v56 }
  0x39   :  { %v256_v15 = vadd.f32 %v1139_v6, %v185_v3  ;;  %v526_v16 = vadd.f32 %v1151_v12, %v455_v5  ;;  %v186_v17 = vmul.f32 %v821_v7, %v1126_v1  ;;  %v456_v18 = vmul.f32 %v949_v8, %v1134_v4  ;;  %v1036_v7 = vld [vmem:[%s1800_s0 + $0x90] sm:$0xff]  }
  0x3a   :  { %715 = vst [vmem:[%s1806_s6 + $0xc0] sm:$0xff] %v651_v9  ;;  %v652_v20 = vmax.f32 %v588_v10, 0.0  ;;  %v589_v21 = vadd.f32 %v525_v11, %v255_v0  ;;  %v187_v22 = vmul.f32 %v822_v13, %v1126_v1  ;;  %v950_v23 = vunpack.c.h.bf16 %v1063_v57  ;;  %v1067_v13 = vld [vmem:[%s1803_s3 + $0x90] sm:$0xff]  }
  0x3b   :  { %v590_v24 = vadd.f32 %v526_v16, %v256_v15  ;;  %v257_v25 = vadd.f32 %v1139_v6, %v186_v17  ;;  %v527_v26 = vadd.f32 %v1151_v12, %v456_v18  ;;  %v825_v27 = vunpack.c.l.bf16 %v1033_v14 }
  0x3c   :  { %716 = vst [vmem:[%s1806_s6 + $0xc8] sm:$0xff] %v652_v20  ;;  %v653_v29 = vmax.f32 %v589_v21, 0.0  ;;  %v258_v30 = vadd.f32 %v1139_v6, %v187_v22  ;;  %v457_v31 = vmul.f32 %v950_v23, %v1134_v4  ;;  %v953_v32 = vunpack.c.l.bf16 %v1064_v19  ;;  %v1037_v22 = vld [vmem:[%s1800_s0 + $0x98] sm:$0xff]  }
  0x3d   :  { %v654_v34 = vmax.f32 %v590_v24, 0.0  ;;  %v591_v35 = vadd.f32 %v527_v26, %v257_v25  ;;  %v188_v36 = vmul.f32 %v825_v27, %v1126_v1  ;;  %v826_v37 = vunpack.c.h.bf16 %v1033_v14  ;;  %v1068_v27 = vld [vmem:[%s1803_s3 + $0x98] sm:$0xff]  }
  0x3e   :  { %717 = vst [vmem:[%s1806_s6 + $0xd0] sm:$0xff] %v653_v29  ;;  %v528_v38 = vadd.f32 %v1151_v12, %v457_v31  ;;  %v458_v39 = vmul.f32 %v953_v32, %v1134_v4  ;;  %v954_v40 = vunpack.c.h.bf16 %v1064_v19  ;;  %v829_v41 = vunpack.c.l.bf16 %v1034_v28 }
  0x3f   :  { %718 = vst [vmem:[%s1806_s6 + $0xd8] sm:$0xff] %v654_v34  ;;  %v655_v42 = vmax.f32 %v591_v35, 0.0  ;;  %v259_v43 = vadd.f32 %v1139_v6, %v188_v36  ;;  %v189_v44 = vmul.f32 %v826_v37, %v1126_v1  ;;  %v957_v45 = vunpack.c.l.bf16 %v1065_v33 }
  0x40   :  { %v592_v46 = vadd.f32 %v528_v38, %v258_v30  ;;  %v529_v47 = vadd.f32 %v1151_v12, %v458_v39  ;;  %v459_v48 = vmul.f32 %v954_v40, %v1134_v4  ;;  %v190_v49 = vmul.f32 %v829_v41, %v1126_v1 }
  0x41   :  { %719 = vst [vmem:[%s1806_s6 + $0xe0] sm:$0xff] %v655_v42  ;;  %v260_v51 = vadd.f32 %v1139_v6, %v189_v44  ;;  %v460_v52 = vmul.f32 %v957_v45, %v1134_v4  ;;  %v830_v53 = vunpack.c.h.bf16 %v1034_v28  ;;  %v958_v54 = vunpack.c.h.bf16 %v1065_v33  ;;  %v1038_v44 = vld [vmem:[%s1800_s0 + $0xa0] sm:$0xff]  }
  0x42   :  { %v656_v56 = vmax.f32 %v592_v46, 0.0  ;;  %v593_v57 = vadd.f32 %v529_v47, %v259_v43  ;;  %v530_v58 = vadd.f32 %v1151_v12, %v459_v48  ;;  %v261_v59 = vadd.f32 %v1139_v6, %v190_v49  ;;  %v1069_v49 = vld [vmem:[%s1803_s3 + $0xa0] sm:$0xff]  }
  0x43   :  { %v531_v60 = vadd.f32 %v1151_v12, %v460_v52  ;;  %v191_v61 = vmul.f32 %v830_v53, %v1126_v1  ;;  %v461_v62 = vmul.f32 %v958_v54, %v1134_v4  ;;  %v833_v63 = vunpack.c.l.bf16 %v1035_v50 }
  0x44   :  { %720 = vst [vmem:[%s1806_s6 + $0xe8] sm:$0xff] %v656_v56  ;;  %v657_v0 = vmax.f32 %v593_v57, 0.0  ;;  %v594_v2 = vadd.f32 %v530_v58, %v260_v51  ;;  %v961_v3 = vunpack.c.l.bf16 %v1066_v55  ;;  %v834_v5 = vunpack.c.h.bf16 %v1035_v50 }
  0x45   :  { %v595_v8 = vadd.f32 %v531_v60, %v261_v59  ;;  %v262_v9 = vadd.f32 %v1139_v6, %v191_v61  ;;  %v532_v10 = vadd.f32 %v1151_v12, %v461_v62  ;;  %v192_v11 = vmul.f32 %v833_v63, %v1126_v1  ;;  %v1039_v62 = vld [vmem:[%s1800_s0 + $0xa8] sm:$0xff]  }
  0x46   :  { %721 = vst [vmem:[%s1806_s6 + $0xf0] sm:$0xff] %v657_v0  ;;  %v658_v14 = vmax.f32 %v594_v2, 0.0  ;;  %v462_v15 = vmul.f32 %v961_v3, %v1134_v4  ;;  %v193_v16 = vmul.f32 %v834_v5, %v1126_v1  ;;  %v962_v17 = vunpack.c.h.bf16 %v1066_v55  ;;  %v1070_v63 = vld [vmem:[%s1803_s3 + $0xa8] sm:$0xff]  }
  0x47   :  { %v659_v18 = vmax.f32 %v595_v8, 0.0  ;;  %v596_v19 = vadd.f32 %v532_v10, %v262_v9  ;;  %v263_v20 = vadd.f32 %v1139_v6, %v192_v11  ;;  %v837_v21 = vunpack.c.l.bf16 %v1036_v7 }
  0x48   :  { %722 = vst [vmem:[%s1806_s6 + $0xf8] sm:$0xff] %v658_v14  ;;  %v533_v23 = vadd.f32 %v1151_v12, %v462_v15  ;;  %v264_v24 = vadd.f32 %v1139_v6, %v193_v16  ;;  %v463_v25 = vmul.f32 %v962_v17, %v1134_v4  ;;  %v965_v26 = vunpack.c.l.bf16 %v1067_v13  ;;  %v1040_v16 = vld [vmem:[%s1800_s0 + $0xb0] sm:$0xff]  }
  0x49   :  { %723 = vst [vmem:[%s1806_s6 + $0x100] sm:$0xff] %v659_v18  ;;  %v660_v28 = vmax.f32 %v596_v19, 0.0  ;;  %v194_v29 = vmul.f32 %v837_v21, %v1126_v1  ;;  %v838_v30 = vunpack.c.h.bf16 %v1036_v7  ;;  %v966_v31 = vunpack.c.h.bf16 %v1067_v13 }
  0x4a   :  { %v597_v32 = vadd.f32 %v533_v23, %v263_v20  ;;  %v534_v33 = vadd.f32 %v1151_v12, %v463_v25  ;;  %v464_v34 = vmul.f32 %v965_v26, %v1134_v4  ;;  %v841_v35 = vunpack.c.l.bf16 %v1037_v22  ;;  %v1071_v25 = vld [vmem:[%s1803_s3 + $0xb0] sm:$0xff]  }
  0x4b   :  { %724 = vst [vmem:[%s1806_s6 + $0x108] sm:$0xff] %v660_v28  ;;  %v265_v36 = vadd.f32 %v1139_v6, %v194_v29  ;;  %v195_v37 = vmul.f32 %v838_v30, %v1126_v1  ;;  %v465_v38 = vmul.f32 %v966_v31, %v1134_v4  ;;  %v969_v39 = vunpack.c.l.bf16 %v1068_v27 }
  0x4c   :  { %v661_v40 = vmax.f32 %v597_v32, 0.0  ;;  %v598_v41 = vadd.f32 %v534_v33, %v264_v24  ;;  %v535_v42 = vadd.f32 %v1151_v12, %v464_v34  ;;  %v196_v43 = vmul.f32 %v841_v35, %v1126_v1 }
  0x4d   :  { %v266_v45 = vadd.f32 %v1139_v6, %v195_v37  ;;  %v536_v46 = vadd.f32 %v1151_v12, %v465_v38  ;;  %v466_v47 = vmul.f32 %v969_v39, %v1134_v4  ;;  %v842_v48 = vunpack.c.h.bf16 %v1037_v22  ;;  %v1041_v38 = vld [vmem:[%s1800_s0 + $0xb8] sm:$0xff]  }
  0x4e   :  { %725 = vst [vmem:[%s1806_s6 + $0x110] sm:$0xff] %v661_v40  ;;  %v662_v50 = vmax.f32 %v598_v41, 0.0  ;;  %v599_v51 = vadd.f32 %v535_v42, %v265_v36  ;;  %v267_v52 = vadd.f32 %v1139_v6, %v196_v43  ;;  %v970_v53 = vunpack.c.h.bf16 %v1068_v27  ;;  %v1072_v43 = vld [vmem:[%s1803_s3 + $0xb8] sm:$0xff]  }
  0x4f   :  { %v600_v54 = vadd.f32 %v536_v46, %v266_v45  ;;  %v537_v55 = vadd.f32 %v1151_v12, %v466_v47  ;;  %v197_v56 = vmul.f32 %v842_v48, %v1126_v1  ;;  %v845_v57 = vunpack.c.l.bf16 %v1038_v44 }
  0x50   :  { %726 = vst [vmem:[%s1806_s6 + $0x118] sm:$0xff] %v662_v50  ;;  %v663_v58 = vmax.f32 %v599_v51, 0.0  ;;  %v467_v59 = vmul.f32 %v970_v53, %v1134_v4  ;;  %v973_v60 = vunpack.c.l.bf16 %v1069_v49  ;;  %v846_v61 = vunpack.c.h.bf16 %v1038_v44 }
  0x51   :  { %v664_v0 = vmax.f32 %v600_v54, 0.0  ;;  %v601_v2 = vadd.f32 %v537_v55, %v267_v52  ;;  %v268_v3 = vadd.f32 %v1139_v6, %v197_v56  ;;  %v198_v5 = vmul.f32 %v845_v57, %v1126_v1  ;;  %v1042_v56 = vld [vmem:[%s1800_s0 + $0xc0] sm:$0xff]  }
  0x52   :  { %727 = vst [vmem:[%s1806_s6 + $0x120] sm:$0xff] %v663_v58  ;;  %v538_v7 = vadd.f32 %v1151_v12, %v467_v59  ;;  %v468_v8 = vmul.f32 %v973_v60, %v1134_v4  ;;  %v199_v9 = vmul.f32 %v846_v61, %v1126_v1  ;;  %v974_v10 = vunpack.c.h.bf16 %v1069_v49  ;;  %v1073_v57 = vld [vmem:[%s1803_s3 + $0xc0] sm:$0xff]  }
  0x53   :  { %728 = vst [vmem:[%s1806_s6 + $0x128] sm:$0xff] %v664_v0  ;;  %v665_v11 = vmax.f32 %v601_v2, 0.0  ;;  %v269_v13 = vadd.f32 %v1139_v6, %v198_v5  ;;  %v849_v14 = vunpack.c.l.bf16 %v1039_v62  ;;  %v977_v15 = vunpack.c.l.bf16 %v1070_v63 }
  0x54   :  { %v602_v17 = vadd.f32 %v538_v7, %v268_v3  ;;  %v539_v18 = vadd.f32 %v1151_v12, %v468_v8  ;;  %v270_v19 = vadd.f32 %v1139_v6, %v199_v9  ;;  %v469_v20 = vmul.f32 %v974_v10, %v1134_v4  ;;  %v1043_v9 = vld [vmem:[%s1800_s0 + $0xc8] sm:$0xff]  }
  0x55   :  { %729 = vst [vmem:[%s1806_s6 + $0x130] sm:$0xff] %v665_v11  ;;  %v200_v21 = vmul.f32 %v849_v14, %v1126_v1  ;;  %v470_v22 = vmul.f32 %v977_v15, %v1134_v4  ;;  %v850_v23 = vunpack.c.h.bf16 %v1039_v62  ;;  %v978_v24 = vunpack.c.h.bf16 %v1070_v63 }
  0x56   :  { %v666_v26 = vmax.f32 %v602_v17, 0.0  ;;  %v603_v27 = vadd.f32 %v539_v18, %v269_v13  ;;  %v540_v28 = vadd.f32 %v1151_v12, %v469_v20  ;;  %v853_v29 = vunpack.c.l.bf16 %v1040_v16 }
  0x57   :  { %v271_v30 = vadd.f32 %v1139_v6, %v200_v21  ;;  %v541_v31 = vadd.f32 %v1151_v12, %v470_v22  ;;  %v201_v32 = vmul.f32 %v850_v23, %v1126_v1  ;;  %v471_v33 = vmul.f32 %v978_v24, %v1134_v4 }
  0x58   :  { %730 = vst [vmem:[%s1806_s6 + $0x138] sm:$0xff] %v666_v26  ;;  %v667_v34 = vmax.f32 %v603_v27, 0.0  ;;  %v604_v35 = vadd.f32 %v540_v28, %v270_v19  ;;  %v202_v36 = vmul.f32 %v853_v29, %v1126_v1  ;;  %v981_v37 = vunpack.c.l.bf16 %v1071_v25  ;;  %v1074_v19 = vld [vmem:[%s1803_s3 + $0xc8] sm:$0xff]  }
  0x59   :  { %v605_v39 = vadd.f32 %v541_v31, %v271_v30  ;;  %v272_v40 = vadd.f32 %v1139_v6, %v201_v32  ;;  %v542_v41 = vadd.f32 %v1151_v12, %v471_v33  ;;  %v854_v42 = vunpack.c.h.bf16 %v1040_v16  ;;  %v1044_v32 = vld [vmem:[%s1800_s0 + $0xd0] sm:$0xff]  }
  0x5a   :  { %731 = vst [vmem:[%s1806_s6 + $0x140] sm:$0xff] %v667_v34  ;;  %v668_v44 = vmax.f32 %v604_v35, 0.0  ;;  %v273_v45 = vadd.f32 %v1139_v6, %v202_v36  ;;  %v472_v46 = vmul.f32 %v981_v37, %v1134_v4  ;;  %v982_v47 = vunpack.c.h.bf16 %v1071_v25  ;;  %v1075_v33 = vld [vmem:[%s1803_s3 + $0xd0] sm:$0xff]  }
  0x5b   :  { %v669_v48 = vmax.f32 %v605_v39, 0.0  ;;  %v606_v49 = vadd.f32 %v542_v41, %v272_v40  ;;  %v203_v50 = vmul.f32 %v854_v42, %v1126_v1  ;;  %v857_v51 = vunpack.c.l.bf16 %v1041_v38 }
  0x5c   :  { %732 = vst [vmem:[%s1806_s6 + $0x148] sm:$0xff] %v668_v44  ;;  %v543_v52 = vadd.f32 %v1151_v12, %v472_v46  ;;  %v473_v53 = vmul.f32 %v982_v47, %v1134_v4  ;;  %v985_v54 = vunpack.c.l.bf16 %v1072_v43  ;;  %v858_v55 = vunpack.c.h.bf16 %v1041_v38 }
  0x5d   :  { %733 = vst [vmem:[%s1806_s6 + $0x150] sm:$0xff] %v669_v48  ;;  %v670_v58 = vmax.f32 %v606_v49, 0.0  ;;  %v274_v59 = vadd.f32 %v1139_v6, %v203_v50  ;;  %v204_v60 = vmul.f32 %v857_v51, %v1126_v1  ;;  %v986_v61 = vunpack.c.h.bf16 %v1072_v43  ;;  %v1654_v48 = vld [vmem:[%s1804_s4] ss:$0 sm:$0xff]  ;;  %v1045_v49 = vld [vmem:[%s1800_s0 + $0xd8] sm:$0xff]  }
  0x5e   :  { %v607_v62 = vadd.f32 %v543_v52, %v273_v45  ;;  %v544_v63 = vadd.f32 %v1151_v12, %v473_v53  ;;  %v474_v0 = vmul.f32 %v985_v54, %v1134_v4  ;;  %v205_v2 = vmul.f32 %v858_v55, %v1126_v1  ;;  %v1672_v50 = vld [vmem:[%s1801_s1] ss:$0 sm:$0xff]  ;;  %v1076_v54 = vld [vmem:[%s1803_s3 + $0xd8] sm:$0xff]  }
  0x5f   :  { %734 = vst [vmem:[%s1806_s6 + $0x158] sm:$0xff] %v670_v58  ;;  %v275_v3 = vadd.f32 %v1139_v6, %v204_v60  ;;  %v475_v5 = vmul.f32 %v986_v61, %v1134_v4  ;;  %v861_v7 = vunpack.c.l.bf16 %v1042_v56  ;;  %v989_v8 = vunpack.c.l.bf16 %v1073_v57 }
  0x60   :  { %v671_v10 = vmax.f32 %v607_v62, 0.0  ;;  %v608_v11 = vadd.f32 %v544_v63, %v274_v59  ;;  %v545_v13 = vadd.f32 %v1151_v12, %v474_v0  ;;  %v276_v14 = vadd.f32 %v1139_v6, %v205_v2  ;;  %v1046_v0 = vld [vmem:[%s1800_s0 + $0xe0] sm:$0xff]  }
  0x61   :  { %v546_v15 = vadd.f32 %v1151_v12, %v475_v5  ;;  %v206_v16 = vmul.f32 %v861_v7, %v1126_v1  ;;  %v476_v17 = vmul.f32 %v989_v8, %v1134_v4  ;;  %v862_v18 = vunpack.c.h.bf16 %v1042_v56 }
  0x62   :  { %735 = vst [vmem:[%s1806_s6 + $0x160] sm:$0xff] %v671_v10  ;;  %v672_v20 = vmax.f32 %v608_v11, 0.0  ;;  %v609_v21 = vadd.f32 %v545_v13, %v275_v3  ;;  %v990_v22 = vunpack.c.h.bf16 %v1073_v57  ;;  %v865_v23 = vunpack.c.l.bf16 %v1043_v9  ;;  %v1682_v57 = vld [vmem:[%s1805_s5] ss:$0 sm:$0xff] }
  0x63   :  { %v610_v24 = vadd.f32 %v546_v15, %v276_v14  ;;  %v277_v25 = vadd.f32 %v1139_v6, %v206_v16  ;;  %v547_v26 = vadd.f32 %v1151_v12, %v476_v17  ;;  %v207_v27 = vmul.f32 %v862_v18, %v1126_v1  ;;  %v1077_v13 = vld [vmem:[%s1803_s3 + $0xe0] sm:$0xff]  }
  0x64   :  { %736 = vst [vmem:[%s1806_s6 + $0x168] sm:$0xff] %v672_v20  ;;  %v673_v28 = vmax.f32 %v609_v21, 0.0  ;;  %v477_v29 = vmul.f32 %v990_v22, %v1134_v4  ;;  %v208_v30 = vmul.f32 %v865_v23, %v1126_v1  ;;  %v993_v31 = vunpack.c.l.bf16 %v1074_v19 }
  0x65   :  { %v674_v34 = vmax.f32 %v610_v24, 0.0  ;;  %v611_v35 = vadd.f32 %v547_v26, %v277_v25  ;;  %v278_v36 = vadd.f32 %v1139_v6, %v207_v27  ;;  %v866_v37 = vunpack.c.h.bf16 %v1043_v9  ;;  %v1047_v26 = vld [vmem:[%s1800_s0 + $0xe8] sm:$0xff]  }
  0x66   :  { %737 = vst [vmem:[%s1806_s6 + $0x170] sm:$0xff] %v673_v28  ;;  %v548_v38 = vadd.f32 %v1151_v12, %v477_v29  ;;  %v279_v39 = vadd.f32 %v1139_v6, %v208_v30  ;;  %v478_v40 = vmul.f32 %v993_v31, %v1134_v4  ;;  %v994_v41 = vunpack.c.h.bf16 %v1074_v19  ;;  %v1078_v27 = vld [vmem:[%s1803_s3 + $0xe8] sm:$0xff]  }
  0x67   :  { %738 = vst [vmem:[%s1806_s6 + $0x178] sm:$0xff] %v674_v34  ;;  %v675_v42 = vmax.f32 %v611_v35, 0.0  ;;  %v209_v43 = vmul.f32 %v866_v37, %v1126_v1  ;;  %v869_v44 = vunpack.c.l.bf16 %v1044_v32  ;;  %v997_v45 = vunpack.c.l.bf16 %v1075_v33  ;;  %v1666_v1 = vld [vmem:[%s1802_s2] ss:$0 sm:$0xff] }
  0x68   :  { %v612_v46 = vadd.f32 %v548_v38, %v278_v36  ;;  %v549_v47 = vadd.f32 %v1151_v12, %v478_v40  ;;  %v479_v4 = vmul.f32 %v1654_v48, %v994_v41  ;;  %v870_v6 = vunpack.c.h.bf16 %v1044_v32 }
  0x69   :  { %739 = vst [vmem:[%s1806_s6 + $0x180] sm:$0xff] %v675_v42  ;;  %v280_v12 = vadd.f32 %v1666_v1, %v209_v43  ;;  %v210_v51 = vmul.f32 %v1672_v50, %v869_v44  ;;  %v480_v52 = vmul.f32 %v1654_v48, %v997_v45  ;;  %v998_v53 = vunpack.c.h.bf16 %v1075_v33  ;;  %v1048_v44 = vld [vmem:[%s1800_s0 + $0xf0] sm:$0xff]  }
  0x6a   :  { %v676_v55 = vmax.f32 %v612_v46, 0.0  ;;  %v613_v56 = vadd.f32 %v549_v47, %v279_v39  ;;  %v550_v58 = vadd.f32 %v1682_v57, %v479_v4  ;;  %v211_v59 = vmul.f32 %v1672_v50, %v870_v6  ;;  %v1079_v6 = vld [vmem:[%s1803_s3 + $0xf0] sm:$0xff]  }
  0x6b   :  { %v281_v60 = vadd.f32 %v1666_v1, %v210_v51  ;;  %v551_v61 = vadd.f32 %v1682_v57, %v480_v52  ;;  %v481_v62 = vmul.f32 %v1654_v48, %v998_v53  ;;  %v873_v63 = vunpack.c.l.bf16 %v1045_v49 }
  0x6c   :  { %740 = vst [vmem:[%s1806_s6 + $0x188] sm:$0xff] %v676_v55  ;;  %v677_v2 = vmax.f32 %v613_v56, 0.0  ;;  %v614_v3 = vadd.f32 %v550_v58, %v280_v12  ;;  %v282_v5 = vadd.f32 %v1666_v1, %v211_v59  ;;  %v1001_v7 = vunpack.c.l.bf16 %v1076_v54  ;;  %v1049_v58 = vld [vmem:[%s1800_s0 + $0xf8] sm:$0xff]  }
  0x6d   :  { %v615_v8 = vadd.f32 %v551_v61, %v281_v60  ;;  %v552_v9 = vadd.f32 %v1682_v57, %v481_v62  ;;  %v212_v10 = vmul.f32 %v1672_v50, %v873_v63  ;;  %v874_v11 = vunpack.c.h.bf16 %v1045_v49  ;;  %v1080_v63 = vld [vmem:[%s1803_s3 + $0xf8] sm:$0xff]  }
  0x6e   :  { %741 = vst [vmem:[%s1806_s6 + $0x190] sm:$0xff] %v677_v2  ;;  %v678_v14 = vmax.f32 %v614_v3, 0.0  ;;  %v482_v15 = vmul.f32 %v1654_v48, %v1001_v7  ;;  %v1002_v16 = vunpack.c.h.bf16 %v1076_v54  ;;  %v877_v17 = vunpack.c.l.bf16 %v1046_v0 }
  0x6f   :  { %v679_v18 = vmax.f32 %v615_v8, 0.0  ;;  %v616_v19 = vadd.f32 %v552_v9, %v282_v5  ;;  %v283_v20 = vadd.f32 %v1666_v1, %v212_v10  ;;  %v213_v21 = vmul.f32 %v1672_v50, %v874_v11 }
  0x70   :  { %742 = vst [vmem:[%s1806_s6 + $0x198] sm:$0xff] %v678_v14  ;;  %v553_v22 = vadd.f32 %v1682_v57, %v482_v15  ;;  %v483_v23 = vmul.f32 %v1654_v48, %v1002_v16  ;;  %v214_v24 = vmul.f32 %v1672_v50, %v877_v17  ;;  %v1005_v25 = vunpack.c.l.bf16 %v1077_v13 }
  0x71   :  { %743 = vst [vmem:[%s1806_s6 + $0x1a0] sm:$0xff] %v679_v18  ;;  %v680_v28 = vmax.f32 %v616_v19, 0.0  ;;  %v284_v29 = vadd.f32 %v1666_v1, %v213_v21  ;;  %v878_v30 = vunpack.c.h.bf16 %v1046_v0  ;;  %v1006_v31 = vunpack.c.h.bf16 %v1077_v13 }
  0x72   :  { %v617_v32 = vadd.f32 %v553_v22, %v283_v20  ;;  %v554_v33 = vadd.f32 %v1682_v57, %v483_v23  ;;  %v285_v34 = vadd.f32 %v1666_v1, %v214_v24  ;;  %v484_v35 = vmul.f32 %v1654_v48, %v1005_v25 }
  0x73   :  { %744 = vst [vmem:[%s1806_s6 + $0x1a8] sm:$0xff] %v680_v28  ;;  %v215_v36 = vmul.f32 %v1672_v50, %v878_v30  ;;  %v485_v37 = vmul.f32 %v1654_v48, %v1006_v31  ;;  %v881_v38 = vunpack.c.l.bf16 %v1047_v26  ;;  %v1009_v39 = vunpack.c.l.bf16 %v1078_v27 }
  0x74   :  { %v681_v40 = vmax.f32 %v617_v32, 0.0  ;;  %v618_v41 = vadd.f32 %v554_v33, %v284_v29  ;;  %v555_v42 = vadd.f32 %v1682_v57, %v484_v35  ;;  %v882_v43 = vunpack.c.h.bf16 %v1047_v26 }
  0x75   :  { %v286_v45 = vadd.f32 %v1666_v1, %v215_v36  ;;  %v556_v46 = vadd.f32 %v1682_v57, %v485_v37  ;;  %v216_v47 = vmul.f32 %v1672_v50, %v881_v38  ;;  %v486_v4 = vmul.f32 %v1654_v48, %v1009_v39 }
  0x76   :  { %745 = vst [vmem:[%s1806_s6 + $0x1b0] sm:$0xff] %v681_v40  ;;  %v682_v49 = vmax.f32 %v618_v41, 0.0  ;;  %v619_v12 = vadd.f32 %v555_v42, %v285_v34  ;;  %v217_v51 = vmul.f32 %v1672_v50, %v882_v43  ;;  %v1010_v52 = vunpack.c.h.bf16 %v1078_v27 }
  0x77   :  { %v620_v53 = vadd.f32 %v556_v46, %v286_v45  ;;  %v287_v54 = vadd.f32 %v1666_v1, %v216_v47  ;;  %v557_v55 = vadd.f32 %v1682_v57, %v486_v4  ;;  %v885_v56 = vunpack.c.l.bf16 %v1048_v44 }
  0x78   :  { %746 = vst [vmem:[%s1806_s6 + $0x1b8] sm:$0xff] %v682_v49  ;;  %v683_v59 = vmax.f32 %v619_v12, 0.0  ;;  %v288_v60 = vadd.f32 %v1666_v1, %v217_v51  ;;  %v487_v61 = vmul.f32 %v1654_v48, %v1010_v52  ;;  %v1013_v62 = vunpack.c.l.bf16 %v1079_v6 }
  0x79   :  { %v684_v0 = vmax.f32 %v620_v53, 0.0  ;;  %v621_v2 = vadd.f32 %v557_v55, %v287_v54  ;;  %v218_v3 = vmul.f32 %v1672_v50, %v885_v56  ;;  %v886_v5 = vunpack.c.h.bf16 %v1048_v44 }
  0x7a   :  { %747 = vst [vmem:[%s1806_s6 + $0x1c0] sm:$0xff] %v683_v59  ;;  %v558_v7 = vadd.f32 %v1682_v57, %v487_v61  ;;  %v488_v8 = vmul.f32 %v1654_v48, %v1013_v62  ;;  %v1014_v9 = vunpack.c.h.bf16 %v1079_v6  ;;  %v889_v10 = vunpack.c.l.bf16 %v1049_v58 }
  0x7b   :  { %748 = vst [vmem:[%s1806_s6 + $0x1c8] sm:$0xff] %v684_v0  ;;  %v685_v11 = vmax.f32 %v621_v2, 0.0  ;;  %v289_v13 = vadd.f32 %v1666_v1, %v218_v3  ;;  %v219_v14 = vmul.f32 %v1672_v50, %v886_v5  ;;  %v1017_v15 = vunpack.c.l.bf16 %v1080_v63 }
  0x7c   :  { %v622_v16 = vadd.f32 %v558_v7, %v288_v60  ;;  %v559_v17 = vadd.f32 %v1682_v57, %v488_v8  ;;  %v489_v18 = vmul.f32 %v1654_v48, %v1014_v9  ;;  %v220_v19 = vmul.f32 %v1672_v50, %v889_v10 }
  0x7d   :  { %749 = vst [vmem:[%s1806_s6 + $0x1d0] sm:$0xff] %v685_v11  ;;  %v290_v20 = vadd.f32 %v1666_v1, %v219_v14  ;;  %v490_v21 = vmul.f32 %v1654_v48, %v1017_v15  ;;  %v890_v22 = vunpack.c.h.bf16 %v1049_v58  ;;  %v1018_v23 = vunpack.c.h.bf16 %v1080_v63 }
  0x7e   :  { %v686_v24 = vmax.f32 %v622_v16, 0.0  ;;  %v623_v25 = vadd.f32 %v559_v17, %v289_v13  ;;  %v560_v26 = vadd.f32 %v1682_v57, %v489_v18  ;;  %v291_v27 = vadd.f32 %v1666_v1, %v220_v19 }
  0x7f   :  { %v561_v28 = vadd.f32 %v1682_v57, %v490_v21  ;;  %v221_v29 = vmul.f32 %v1672_v50, %v890_v22  ;;  %v491_v30 = vmul.f32 %v1654_v48, %v1018_v23 }
  0x80   :  { %750 = vst [vmem:[%s1806_s6 + $0x1d8] sm:$0xff] %v686_v24  ;;  %v687_v31 = vmax.f32 %v623_v25, 0.0  ;;  %v624_v32 = vadd.f32 %v560_v26, %v290_v20 }
  0x81   :  { %v625_v33 = vadd.f32 %v561_v28, %v291_v27  ;;  %v292_v34 = vadd.f32 %v1666_v1, %v221_v29  ;;  %v562_v35 = vadd.f32 %v1682_v57, %v491_v30 }
  0x82   :  { %751 = vst [vmem:[%s1806_s6 + $0x1e0] sm:$0xff] %v687_v31  ;;  %v688_v36 = vmax.f32 %v624_v32, 0.0 }
  0x83   :  { %v689_v37 = vmax.f32 %v625_v33, 0.0  ;;  %v626_v50 = vadd.f32 %v562_v35, %v292_v34 }
  0x84   :  { %752 = vst [vmem:[%s1806_s6 + $0x1e8] sm:$0xff] %v688_v36 }
  0x85   :  { %753 = vst [vmem:[%s1806_s6 + $0x1f0] sm:$0xff] %v689_v37  ;;  %v690_v48 = vmax.f32 %v626_v50, 0.0 }
  0x87   :  { %754 = vst [vmem:[%s1806_s6 + $0x1f8] sm:$0xff] %v690_v48 }

// kernel: basic_block_forward.4
= control target key start
LH: loop header
LB: loop body
LE: loop exit
PB: predicated region body
PF: predicated region fallthrough
CT: control target
= control target key end

     0   :  { %v2022_v0 = vmov 0   ;;  %v215_v4 = vlaneseq  ;;  %s3013_s1 = inlined_call_operand.vmem [shape: bf16[256,128], index: 1, kind: input, shape index: {}]   ;;  %s3014_s0 = inlined_call_operand.vmem [shape: bf16[512,256], index: 0, kind: input, shape index: {}]   ;;  %s3015_s2 = inlined_call_operand.vmem [shape: f32[1,256], index: 2, kind: input, shape index: {}]   ;;  %s3016_s3 = inlined_call_operand.vmem [shape: f32[1,256], index: 3, kind: input, shape index: {}]   ;;  %s3017_s4 = inlined_call_operand.vmem [shape: bf16[512,128], index: 4, kind: output, shape index: {0}]   ;;  %s3018_s5 = inlined_call_operand.vmem [shape: f32[8,128], index: 5, kind: output, shape index: {1}]   ;;  %s3019_s6 = inlined_call_operand.vmem [shape: f32[8,128], index: 6, kind: output, shape index: {2}]  }
   0x1   :  { %813 = vmatprep.subr.bf16.mxu0 %v2022_v0  ;;  %v2006_v1 = vld [vmem:[%s3013_s1] sm:$0xff]   ;;  %1973 = vmatprep.subr.bf16.mxu1 %v2022_v0  ;;  %v2007_v2 = vld [vmem:[%s3013_s1 + $0x8] sm:$0xff]   ;;  %v2008_v3 = vld [vmem:[%s3013_s1 + $0x10] sm:$0xff]  }
   0x2   :  { %814 = vmatpush1.bf16.msra.mxu0 %v2006_v1  ;;  %1989 = vmatpush1.bf16.msra.mxu1 %v2006_v1  ;;  %v2009_v5 = vld [vmem:[%s3013_s1 + $0x18] sm:$0xff]   ;;  %v2076_v6 = vshrl.u32 %v215_v4, 7  ;;  %v2010_v7 = vld [vmem:[%s3013_s1 + $0x20] sm:$0xff]   ;;  %v22_v10 = vld [vmem:[%s3014_s0 + $0x8] sm:$0xff] }
   0x3   :  { %815 = vmatprep.subr.bf16.mxu0 %v2022_v0  ;;  %1974 = vmatprep.subr.bf16.mxu1 %v2022_v0  ;;  %v21_v9 = vld [vmem:[%s3014_s0] sm:$0xff]  ;;  %v88_v13 = vunpack.c.h.bf16 %v22_v10  ;;  %v2011_v15 = vld [vmem:[%s3013_s1 + $0x28] sm:$0xff]   ;;  %v2012_v20 = vld [vmem:[%s3013_s1 + $0x30] sm:$0xff]   ;;  %v87_v34 = vunpack.c.l.bf16 %v22_v10 }
   0x4   :  { %v221_v8 = vsub.s32 1, %v2076_v6  ;;  %v213_v11 = vld [vmem:[%s3015_s2] sm:$0x3]  ;;  %v86_v12 = vunpack.c.h.bf16 %v21_v9  ;;  %v2013_v25 = vld [vmem:[%s3013_s1 + $0x38] sm:$0xff]   ;;  %v217_v27 = vsub.s32 0, %v2076_v6  ;;  %v23_v29 = vld [vmem:[%s3014_s0 + $0x10] sm:$0xff]  ;;  %v85_v33 = vunpack.c.l.bf16 %v21_v9 }
   0x5   :  { %v353_v14 = vld [vmem:[%s3016_s3] sm:$0x3]  ;;  %v24_v30 = vld [vmem:[%s3014_s0 + $0x18] sm:$0xff]  ;;  %v26_v32 = vld [vmem:[%s3014_s0 + $0x28] sm:$0xff]  ;;  %v90_v36 = vunpack.c.h.bf16 %v23_v29  ;;  %v89_v39 = vunpack.c.l.bf16 %v23_v29 }
   0x6   :  { %816 = vmatpush1.bf16.msra.mxu0 %v2007_v2  ;;  %1990 = vmatpush1.bf16.msra.mxu1 %v2007_v2  ;;  %v2101_v16 = vrot.slane %v213_v11, %v221_v8  ;;  %v2103_v17 = vrot.slane %v353_v14, %v221_v8  ;;  %v2014_v28 = vld [vmem:[%s3013_s1 + $0x40] sm:$0xff]   ;;  %v2138_v35 = vrot.slane %v213_v11, %v217_v27  ;;  %v92_v37 = vunpack.c.h.bf16 %v24_v30  ;;  %v2015_v38 = vld [vmem:[%s3013_s1 + $0x48] sm:$0xff]   ;;  %v27_v43 = vld [vmem:[%s3014_s0 + $0x30] sm:$0xff] }
   0x7   :  { %817 = vmatprep.subr.bf16.mxu0 %v2022_v0  ;;  %1975 = vmatprep.subr.bf16.mxu1 %v2022_v0  ;;  %v25_v31 = vld [vmem:[%s3014_s0 + $0x20] sm:$0xff]  ;;  %v91_v40 = vunpack.c.l.bf16 %v24_v30  ;;  %v96_v42 = vunpack.c.h.bf16 %v26_v32  ;;  %v28_v44 = vld [vmem:[%s3014_s0 + $0x38] sm:$0xff]  ;;  %v95_v46 = vunpack.c.l.bf16 %v26_v32  ;;  %v2151_v47 = vrot.slane %v353_v14, %v217_v27  ;;  %v2016_v54 = vld [vmem:[%s3013_s1 + $0x50] sm:$0xff]  }
   0x8   :  { %v226_v18 = vmul.f32 %v2101_v16, %v86_v12  ;;  %v228_v19 = vmul.f32 %v2101_v16, %v88_v13  ;;  %v94_v41 = vunpack.c.h.bf16 %v25_v31  ;;  %v93_v45 = vunpack.c.l.bf16 %v25_v31  ;;  %v2017_v6 = vld [vmem:[%s3013_s1 + $0x58] sm:$0xff]  }
   0x9   :  { %v225_v48 = vmul.f32 %v2138_v35, %v85_v33  ;;  %v227_v49 = vmul.f32 %v2138_v35, %v87_v34  ;;  %v230_v50 = vmul.f32 %v2101_v16, %v90_v36  ;;  %v232_v51 = vmul.f32 %v2101_v16, %v92_v37  ;;  %v53_v34 = vld [vmem:[%s3014_s0 + $0x100] sm:$0xff] }
   0xa   :  { %818 = vmatpush1.bf16.msra.mxu0 %v2008_v3  ;;  %1991 = vmatpush1.bf16.msra.mxu1 %v2008_v3  ;;  %v366_v21 = vadd.f32 %v2103_v17, %v226_v18  ;;  %v368_v22 = vadd.f32 %v2103_v17, %v228_v19  ;;  %v98_v52 = vunpack.c.h.bf16 %v27_v43  ;;  %v100_v53 = vunpack.c.h.bf16 %v28_v44  ;;  %v29_v19 = vld [vmem:[%s3014_s0 + $0x40] sm:$0xff] }
   0xb   :  { %819 = vmatprep.subr.bf16.mxu0 %v2022_v0  ;;  %1976 = vmatprep.subr.bf16.mxu1 %v2022_v0  ;;  %v229_v55 = vmul.f32 %v2138_v35, %v89_v39  ;;  %v231_v56 = vmul.f32 %v2138_v35, %v91_v40  ;;  %v234_v57 = vmul.f32 %v2101_v16, %v94_v41  ;;  %v97_v63 = vunpack.c.l.bf16 %v27_v43  ;;  %v31_v39 = vld [vmem:[%s3014_s0 + $0x50] sm:$0xff] }
   0xc   :  { %v494_v23 = vmax.f32 %v366_v21, 0.0  ;;  %v496_v24 = vmax.f32 %v368_v22, 0.0  ;;  %v236_v58 = vmul.f32 %v2101_v16, %v96_v42  ;;  %v233_v59 = vmul.f32 %v2138_v35, %v93_v45  ;;  %v2019_v45 = vld [vmem:[%s3013_s1 + $0x68] sm:$0xff]  }
   0xd   :  { %v235_v60 = vmul.f32 %v2138_v35, %v95_v46  ;;  %v365_v61 = vadd.f32 %v2151_v47, %v225_v48  ;;  %v367_v62 = vadd.f32 %v2151_v47, %v227_v49  ;;  %v99_v1 = vunpack.c.l.bf16 %v28_v44  ;;  %v2213_v44 = vld [vmem:[%s3014_s0 + $0x58] sm:$0xff] }
   0xe   :  { %820 = vmatpush1.bf16.msra.mxu0 %v2009_v5  ;;  %1992 = vmatpush1.bf16.msra.mxu1 %v2009_v5  ;;  %v622_v26 = vpack.c.bf16 %v496_v24, %v494_v23  ;;  %v370_v2 = vadd.f32 %v2103_v17, %v230_v50  ;;  %v372_v3 = vadd.f32 %v2103_v17, %v232_v51  ;;  %v102_v32 = vunpack.c.h.bf16 %v29_v19  ;;  %v54_v50 = vld [vmem:[%s3014_s0 + $0x108] sm:$0xff] }
   0xf   :  { %821 = vmatprep.subr.bf16.mxu0 %v2022_v0  ;;  %1977 = vmatprep.subr.bf16.mxu1 %v2022_v0  ;;  %v238_v4 = vmul.f32 %v2101_v16, %v98_v52  ;;  %v240_v5 = vmul.f32 %v2101_v16, %v100_v53  ;;  %v371_v8 = vadd.f32 %v2151_v47, %v231_v56  ;;  %v493_v13 = vmax.f32 %v365_v61, 0.0 }
  0x10   :  { %845 = vmatprep.mubr.bf16.mxu0 %v622_v26  ;;  %v374_v9 = vadd.f32 %v2103_v17, %v234_v57  ;;  %v376_v10 = vadd.f32 %v2103_v17, %v236_v58  ;;  %v373_v11 = vadd.f32 %v2151_v47, %v233_v59  ;;  %v375_v12 = vadd.f32 %v2151_v47, %v235_v60 }
  0x11   :  { %v495_v14 = vmax.f32 %v367_v62, 0.0  ;;  %v239_v18 = vmul.f32 %v2138_v35, %v99_v1  ;;  %v498_v21 = vmax.f32 %v370_v2, 0.0  ;;  %v500_v22 = vmax.f32 %v372_v3, 0.0  ;;  %v2020_v1 = vld [vmem:[%s3013_s1 + $0x70] sm:$0xff]  }
  0x12   :  { %822 = vmatpush1.bf16.msra.mxu0 %v2010_v7  ;;  %1993 = vmatpush1.bf16.msra.mxu1 %v2010_v7  ;;  %v369_v7 = vadd.f32 %v2151_v47, %v229_v55  ;;  %v378_v23 = vadd.f32 %v2103_v17, %v238_v4  ;;  %v380_v24 = vadd.f32 %v2103_v17, %v240_v5  ;;  %v499_v27 = vmax.f32 %v371_v8, 0.0 }
  0x13   :  { %823 = vmatprep.subr.bf16.mxu0 %v2022_v0  ;;  %1978 = vmatprep.subr.bf16.mxu1 %v2022_v0  ;;  %v504_v29 = vmax.f32 %v376_v10, 0.0  ;;  %v501_v30 = vmax.f32 %v373_v11, 0.0  ;;  %v503_v31 = vmax.f32 %v375_v12, 0.0  ;;  %v2203_v36 = vpack.c.bf16 %v495_v14, %v493_v13 }
  0x14   :  { %v497_v26 = vmax.f32 %v369_v7, 0.0  ;;  %v506_v40 = vmax.f32 %v378_v23, 0.0  ;;  %v508_v41 = vmax.f32 %v380_v24, 0.0  ;;  %v101_v42 = vunpack.c.l.bf16 %v29_v19 }
  0x15   :  { %v2219_v46 = vpack.c.bf16 %v500_v22, %v498_v21  ;;  %v149_v51 = vunpack.c.l.bf16 %v53_v34  ;;  %v2229_v52 = vpack.c.bf16 %v503_v31, %v501_v30  ;;  %v242_v53 = vmul.f32 %v2101_v16, %v102_v32  ;;  %v56_v21 = vld [vmem:[%s3014_s0 + $0x118] sm:$0xff]  ;;  %v33_v32 = vld [vmem:[%s3014_s0 + $0x60] sm:$0xff] }
  0x16   :  { %824 = vmatpush1.bf16.msra.mxu0 %v2011_v15  ;;  %1994 = vmatpush1.bf16.msra.mxu1 %v2011_v15  ;;  %v237_v15 = vmul.f32 %v2138_v35, %v97_v63  ;;  %v2221_v48 = vpack.c.bf16 %v499_v27, %v497_v26  ;;  %v106_v55 = vunpack.c.h.bf16 %v31_v39  ;;  %v108_v58 = vunpack.c.h.bf16 %v2213_v44  ;;  %v2021_v22 = vld [vmem:[%s3013_s1 + $0x78] sm:$0xff]  }
  0x17   :  { %825 = vmatprep.subr.bf16.mxu0 %v2022_v0  ;;  %1979 = vmatprep.subr.bf16.mxu1 %v2022_v0  ;;  %v150_v59 = vunpack.c.h.bf16 %v53_v34  ;;  %v2234_v60 = vpack.c.bf16 %v508_v41, %v506_v40  ;;  %v241_v61 = vmul.f32 %v2138_v35, %v101_v42  ;;  %v151_v63 = vunpack.c.l.bf16 %v54_v50 }
  0x18   :  { %v377_v37 = vadd.f32 %v2151_v47, %v237_v15  ;;  %v105_v2 = vunpack.c.l.bf16 %v31_v39  ;;  %v152_v3 = vunpack.c.h.bf16 %v54_v50  ;;  %v289_v5 = vmul.f32 %v2138_v35, %v149_v51 }
  0x19   :  { %v290_v4 = vmul.f32 %v2101_v16, %v150_v59  ;;  %v246_v8 = vmul.f32 %v2101_v16, %v106_v55  ;;  %v248_v10 = vmul.f32 %v2101_v16, %v108_v58  ;;  %v381_v14 = vadd.f32 %v2151_v47, %v241_v61 }
  0x1a   :  { %826 = vmatpush1.bf16.msra.mxu0 %v2012_v20  ;;  %1995 = vmatpush1.bf16.msra.mxu1 %v2012_v20  ;;  %v30_v20 = vld [vmem:[%s3014_s0 + $0x48] sm:$0xff]  ;;  %v505_v56 = vmax.f32 %v377_v37, 0.0  ;;  %v292_v11 = vmul.f32 %v2101_v16, %v152_v3  ;;  %v429_v13 = vadd.f32 %v2151_v47, %v289_v5  ;;  %v245_v24 = vmul.f32 %v2138_v35, %v105_v2 }
  0x1b   :  { %827 = vmatprep.subr.bf16.mxu0 %v2022_v0  ;;  %1980 = vmatprep.subr.bf16.mxu1 %v2022_v0  ;;  %v104_v33 = vunpack.c.h.bf16 %v30_v20  ;;  %v103_v43 = vunpack.c.l.bf16 %v30_v20  ;;  %v430_v12 = vadd.f32 %v2103_v17, %v290_v4  ;;  %v55_v20 = vld [vmem:[%s3014_s0 + $0x110] sm:$0xff]  ;;  %v386_v31 = vadd.f32 %v2103_v17, %v246_v8  ;;  %v36_v8 = vld [vmem:[%s3014_s0 + $0x78] sm:$0xff] }
  0x1c   :  { %v154_v34 = vunpack.c.h.bf16 %v55_v20  ;;  %v156_v37 = vunpack.c.h.bf16 %v56_v21  ;;  %v388_v40 = vadd.f32 %v2103_v17, %v248_v10  ;;  %v2280_v42 = vadd.f32 %v2151_v47, %v245_v24  ;;  %v58_v10 = vld [vmem:[%s3014_s0 + $0x128] sm:$0xff] }
  0x1d   :  { %v243_v62 = vmul.f32 %v2138_v35, %v103_v43  ;;  %v558_v26 = vmax.f32 %v430_v12, 0.0  ;;  %v110_v50 = vunpack.c.h.bf16 %v33_v32  ;;  %v160_v24 = vunpack.c.h.bf16 %v58_v10 }
  0x1e   :  { %828 = vmatpush1.bf16.msra.mxu0 %v2013_v25  ;;  %1996 = vmatpush1.bf16.msra.mxu1 %v2013_v25  ;;  %v2018_v25 = vld [vmem:[%s3013_s1 + $0x60] sm:$0xff]   ;;  %v516_v59 = vmax.f32 %v388_v40, 0.0  ;;  %v513_v3 = vmax.f32 %v2280_v42, 0.0 }
  0x1f   :  { %829 = vmatprep.subr.bf16.mxu0 %v2022_v0  ;;  %1981 = vmatprep.subr.bf16.mxu1 %v2022_v0  ;;  %v383_v15 = vadd.f32 %v2151_v47, %v243_v62 }
  0x21   :  { %v511_v39 = vmax.f32 %v383_v15, 0.0 }
  0x22   :  { %830 = vmatpush1.bf16.msra.mxu0 %v2014_v28  ;;  %1997 = vmatpush1.bf16.msra.mxu1 %v2014_v28  ;;  %v502_v28 = vmax.f32 %v374_v9, 0.0  ;;  %v291_v9 = vmul.f32 %v2138_v35, %v151_v63 }
  0x23   :  { %831 = vmatprep.subr.bf16.mxu0 %v2022_v0  ;;  %1982 = vmatprep.subr.bf16.mxu1 %v2022_v0 }
  0x24   :  { %v2223_v49 = vpack.c.bf16 %v504_v29, %v502_v28  ;;  %v431_v19 = vadd.f32 %v2151_v47, %v291_v9  ;;  %v557_v29 = vmax.f32 %v429_v13, 0.0 }
  0x26   :  { %832 = vmatpush1.bf16.msra.mxu0 %v2015_v38  ;;  %1998 = vmatpush1.bf16.msra.mxu1 %v2015_v38  ;;  %v379_v38 = vadd.f32 %v2151_v47, %v239_v18  ;;  %v107_v18 = vunpack.c.l.bf16 %v2213_v44  ;;  %v559_v30 = vmax.f32 %v431_v19, 0.0  ;;  %v294_v44 = vmul.f32 %v2101_v16, %v154_v34 }
  0x27   :  { %833 = vmatprep.subr.bf16.mxu0 %v2022_v0  ;;  %1983 = vmatprep.subr.bf16.mxu1 %v2022_v0 }
  0x28   :  { %v507_v57 = vmax.f32 %v379_v38, 0.0  ;;  %v509_v38 = vmax.f32 %v381_v14, 0.0  ;;  %v247_v41 = vmul.f32 %v2138_v35, %v107_v18  ;;  %v653_v51 = vpack.c.bf16 %v559_v30, %v557_v29 }
  0x2a   :  { %834 = vmatpush1.bf16.msra.mxu0 %v2016_v54  ;;  %1999 = vmatpush1.bf16.msra.mxu1 %v2016_v54  ;;  %v244_v54 = vmul.f32 %v2101_v16, %v104_v33  ;;  %v2267_v23 = vpack.c.bf16 %v507_v57, %v505_v56  ;;  %v514_v56 = vmax.f32 %v386_v31, 0.0  ;;  %v434_v57 = vadd.f32 %v2103_v17, %v294_v44 }
  0x2b   :  { %835 = vmatprep.subr.bf16.mxu0 %v2022_v0  ;;  %1984 = vmatprep.subr.bf16.mxu1 %v2022_v0  ;;  %v387_v61 = vadd.f32 %v2151_v47, %v247_v41  ;;  %v2299_v2 = vpack.c.bf16 %v511_v39, %v509_v38  ;;  %v300_v31 = vmul.f32 %v2101_v16, %v160_v24 }
  0x2c   :  { %v384_v7 = vadd.f32 %v2103_v17, %v244_v54  ;;  %v155_v54 = vunpack.c.l.bf16 %v56_v21  ;;  %v562_v4 = vmax.f32 %v434_v57, 0.0  ;;  %v2314_v15 = vpack.c.bf16 %v516_v59, %v514_v56 }
  0x2d   :  { %v515_v21 = vmax.f32 %v387_v61, 0.0  ;;  %v440_v41 = vadd.f32 %v2103_v17, %v300_v31 }
  0x2e   :  { %836 = vmatpush1.bf16.msra.mxu0 %v2017_v6  ;;  %2000 = vmatpush1.bf16.msra.mxu1 %v2017_v6  ;;  %v382_v6 = vadd.f32 %v2103_v17, %v242_v53  ;;  %v512_v28 = vmax.f32 %v384_v7, 0.0  ;;  %v153_v53 = vunpack.c.l.bf16 %v55_v20  ;;  %v295_v63 = vmul.f32 %v2138_v35, %v155_v54 }
  0x2f   :  { %837 = vmatprep.subr.bf16.mxu0 %v2022_v0  ;;  %1985 = vmatprep.subr.bf16.mxu1 %v2022_v0  ;;  %v109_v7 = vunpack.c.l.bf16 %v33_v32  ;;  %v2333_v44 = vpack.c.bf16 %v515_v21, %v513_v3  ;;  %v568_v54 = vmax.f32 %v440_v41, 0.0 }
  0x30   :  { %v510_v27 = vmax.f32 %v382_v6, 0.0  ;;  %v293_v62 = vmul.f32 %v2138_v35, %v153_v53  ;;  %v115_v53 = vunpack.c.l.bf16 %v36_v8 }
  0x32   :  { %838 = vmatpush1.bf16.msra.mxu0 %v2018_v25  ;;  %2001 = vmatpush1.bf16.msra.mxu1 %v2018_v25  ;;  %v432_v25 = vadd.f32 %v2103_v17, %v292_v11  ;;  %v2284_v55 = vpack.c.bf16 %v512_v28, %v510_v27  ;;  %v433_v9 = vadd.f32 %v2151_v47, %v293_v62 }
  0x33   :  { %839 = vmatprep.subr.bf16.mxu0 %v2022_v0  ;;  %1986 = vmatprep.subr.bf16.mxu1 %v2022_v0  ;;  %v250_v11 = vmul.f32 %v2101_v16, %v110_v50  ;;  %v249_v27 = vmul.f32 %v2138_v35, %v109_v7 }
  0x34   :  { %v560_v33 = vmax.f32 %v432_v25, 0.0  ;;  %v561_v19 = vmax.f32 %v433_v9, 0.0  ;;  %v255_v9 = vmul.f32 %v2138_v35, %v115_v53 }
  0x35   :  { %v390_v34 = vadd.f32 %v2103_v17, %v250_v11  ;;  %v389_v50 = vadd.f32 %v2151_v47, %v249_v27  ;;  %v61_v27 = vld [vmem:[%s3014_s0 + $0x140] sm:$0xff] }
  0x36   :  { %840 = vmatpush1.bf16.msra.mxu0 %v2019_v45  ;;  %2002 = vmatpush1.bf16.msra.mxu1 %v2019_v45  ;;  %v654_v43 = vpack.c.bf16 %v560_v33, %v558_v26  ;;  %v296_v45 = vmul.f32 %v2101_v16, %v156_v37  ;;  %v159_v33 = vunpack.c.l.bf16 %v58_v10 }
  0x37   :  { %841 = vmatprep.subr.bf16.mxu0 %v2022_v0  ;;  %1987 = vmatprep.subr.bf16.mxu1 %v2022_v0  ;;  %v518_v57 = vmax.f32 %v390_v34, 0.0 }
  0x38   :  { %973 = vmatprep.mubr.bf16.mxu1 %v654_v43  ;;  %v436_v58 = vadd.f32 %v2103_v17, %v296_v45  ;;  %v299_v43 = vmul.f32 %v2138_v35, %v159_v33 }
  0x3a   :  { %842 = vmatpush1.bf16.msra.mxu0 %v2020_v1  ;;  %2003 = vmatpush1.bf16.msra.mxu1 %v2020_v1  ;;  %v57_v1 = vld [vmem:[%s3014_s0 + $0x120] sm:$0xff]  ;;  %v564_v5 = vmax.f32 %v436_v58, 0.0  ;;  %v439_v56 = vadd.f32 %v2151_v47, %v299_v43 }
  0x3b   :  { %843 = vmatprep.subr.bf16.mxu0 %v2022_v0  ;;  %1988 = vmatprep.subr.bf16.mxu1 %v2022_v0  ;;  %v34_v0 = vld [vmem:[%s3014_s0 + $0x68] sm:$0xff]  ;;  %v158_v14 = vunpack.c.h.bf16 %v57_v1  ;;  %v157_v29 = vunpack.c.l.bf16 %v57_v1 }
  0x3c   :  { %v112_v6 = vunpack.c.h.bf16 %v34_v0  ;;  %v111_v12 = vunpack.c.l.bf16 %v34_v0  ;;  %v656_v13 = vpack.c.bf16 %v564_v5, %v562_v4  ;;  %v60_v0 = vld [vmem:[%s3014_s0 + $0x138] sm:$0xff]  ;;  %v567_v3 = vmax.f32 %v439_v56, 0.0  ;;  %v37_v5 = vld [vmem:[%s3014_s0 + $0x80] sm:$0xff] }
  0x3d   :  { %v298_v25 = vmul.f32 %v2101_v16, %v158_v14  ;;  %v297_v39 = vmul.f32 %v2138_v35, %v157_v29  ;;  %v517_v4 = vmax.f32 %v389_v50, 0.0  ;;  %v118_v21 = vunpack.c.h.bf16 %v37_v5 }
  0x3e   :  { %844 = vmatpush1.bf16.msra.mxu0 %v2021_v22  ;;  %2004 = vmatpush1.bf16.msra.mxu1 %v2021_v22  ;;  %v116_v22 = vunpack.c.h.bf16 %v36_v8  ;;  %v252_v26 = vmul.f32 %v2101_v16, %v112_v6  ;;  %v251_v30 = vmul.f32 %v2138_v35, %v111_v12  ;;  %v164_v6 = vunpack.c.h.bf16 %v60_v0 }
  0x3f   :  { %v438_v32 = vadd.f32 %v2103_v17, %v298_v25  ;;  %v117_v29 = vunpack.c.l.bf16 %v37_v5  ;;  %v258_v43 = vmul.f32 %v2101_v16, %v118_v21 }
  0x40   :  { %v256_v40 = vmul.f32 %v2101_v16, %v116_v22  ;;  %v392_v45 = vadd.f32 %v2103_v17, %v252_v26 }
  0x41   :  { %846 = vmatmul.mubr.bf16.vlgmr.msra.gmra.mrb[0].mxu0 %v2203_v36  ;;  %v35_v36 = vld [vmem:[%s3014_s0 + $0x70] sm:$0xff]  ;;  %974 = vmatmul.mubr.bf16.vlgmr.msra.gmra.mrb[0].mxu1 %v653_v51  ;;  %v566_v42 = vmax.f32 %v438_v32, 0.0  ;;  %v391_v51 = vadd.f32 %v2151_v47, %v251_v30  ;;  %v257_v53 = vmul.f32 %v2138_v35, %v117_v29 }
  0x42   :  { %853 = vmatprep.mubr.bf16.mxu0 %v2219_v46  ;;  %v435_v46 = vadd.f32 %v2151_v47, %v295_v63  ;;  %v114_v18 = vunpack.c.h.bf16 %v35_v36  ;;  %981 = vmatprep.mubr.bf16.mxu1 %v656_v13  ;;  %v113_v38 = vunpack.c.l.bf16 %v35_v36  ;;  %v396_v63 = vadd.f32 %v2103_v17, %v256_v40  ;;  %v39_v40 = vld [vmem:[%s3014_s0 + $0x90] sm:$0xff] }
  0x43   :  { %v658_v1 = vpack.c.bf16 %v568_v54, %v566_v42  ;;  %v520_v36 = vmax.f32 %v392_v45, 0.0  ;;  %v519_v8 = vmax.f32 %v391_v51, 0.0  ;;  %v304_v13 = vmul.f32 %v2101_v16, %v164_v6  ;;  %v40_v45 = vld [vmem:[%s3014_s0 + $0x98] sm:$0xff] }
  0x44   :  { %v563_v20 = vmax.f32 %v435_v46, 0.0  ;;  %v254_v37 = vmul.f32 %v2101_v16, %v114_v18  ;;  %v253_v58 = vmul.f32 %v2138_v35, %v113_v38  ;;  %v38_v46 = vld [vmem:[%s3014_s0 + $0x88] sm:$0xff]  ;;  %v163_v18 = vunpack.c.l.bf16 %v60_v0 }
  0x45   :  { %v120_v24 = vunpack.c.h.bf16 %v38_v46  ;;  %v444_v25 = vadd.f32 %v2103_v17, %v304_v13  ;;  %v2369_v31 = vpack.c.bf16 %v519_v8, %v517_v4  ;;  %v119_v32 = vunpack.c.l.bf16 %v38_v46  ;;  %v63_v8 = vld [vmem:[%s3014_s0 + $0x150] sm:$0xff] }
  0x46   :  { %v655_v28 = vpack.c.bf16 %v563_v20, %v561_v19  ;;  %v394_v62 = vadd.f32 %v2103_v17, %v254_v37  ;;  %v393_v12 = vadd.f32 %v2151_v47, %v253_v58  ;;  %v524_v20 = vmax.f32 %v396_v63, 0.0  ;;  %v62_v37 = vld [vmem:[%s3014_s0 + $0x148] sm:$0xff] }
  0x47   :  { %v572_v33 = vmax.f32 %v444_v25, 0.0  ;;  %v166_v42 = vunpack.c.h.bf16 %v61_v27  ;;  %v168_v54 = vunpack.c.h.bf16 %v62_v37  ;;  %v259_v0 = vmul.f32 %v2138_v35, %v119_v32 }
  0x48   :  { %v522_v19 = vmax.f32 %v394_v62, 0.0  ;;  %v121_v4 = vunpack.c.l.bf16 %v39_v40  ;;  %v123_v5 = vunpack.c.l.bf16 %v40_v45  ;;  %v397_v46 = vadd.f32 %v2151_v47, %v257_v53 }
  0x49   :  { %854 = vmatmul.mubr.bf16.gmra.mrb[4].mxu0 %v2221_v48  ;;  %v59_v48 = vld [vmem:[%s3014_s0 + $0x130] sm:$0xff]  ;;  %982 = vmatmul.mubr.bf16.gmra.mrb[4].mxu1 %v655_v28  ;;  %v2365_v28 = vpack.c.bf16 %v520_v36, %v518_v57  ;;  %v306_v56 = vmul.f32 %v2101_v16, %v166_v42  ;;  %v122_v57 = vunpack.c.h.bf16 %v39_v40  ;;  %v308_v62 = vmul.f32 %v2101_v16, %v168_v54 }
  0x4a   :  { %861 = vmatprep.mubr.bf16.mxu0 %v2223_v49  ;;  %v437_v49 = vadd.f32 %v2151_v47, %v297_v39  ;;  %v162_v61 = vunpack.c.h.bf16 %v59_v48  ;;  %989 = vmatprep.mubr.bf16.mxu1 %v658_v1  ;;  %v161_v11 = vunpack.c.l.bf16 %v59_v48  ;;  %v2375_v38 = vpack.c.bf16 %v524_v20, %v522_v19  ;;  %v64_v19 = vld [vmem:[%s3014_s0 + $0x158] sm:$0xff] }
  0x4b   :  { %v521_v39 = vmax.f32 %v393_v12, 0.0  ;;  %v260_v48 = vmul.f32 %v2101_v16, %v120_v24  ;;  %v446_v63 = vadd.f32 %v2103_v17, %v306_v56  ;;  %v167_v1 = vunpack.c.l.bf16 %v62_v37 }
  0x4c   :  { %v565_v59 = vmax.f32 %v437_v49, 0.0  ;;  %v302_v7 = vmul.f32 %v2101_v16, %v162_v61  ;;  %v301_v22 = vmul.f32 %v2138_v35, %v161_v11  ;;  %v124_v61 = vunpack.c.h.bf16 %v40_v45 }
  0x4d   :  { %v400_v36 = vadd.f32 %v2103_v17, %v260_v48  ;;  %v448_v6 = vadd.f32 %v2103_v17, %v308_v62  ;;  %v262_v12 = vmul.f32 %v2101_v16, %v122_v57  ;;  %v170_v24 = vunpack.c.h.bf16 %v63_v8 }
  0x4e   :  { %v657_v10 = vpack.c.bf16 %v567_v3, %v565_v59  ;;  %v442_v14 = vadd.f32 %v2103_v17, %v302_v7  ;;  %v441_v30 = vadd.f32 %v2151_v47, %v301_v22  ;;  %v165_v59 = vunpack.c.l.bf16 %v61_v27 }
  0x4f   :  { %v398_v3 = vadd.f32 %v2103_v17, %v258_v43  ;;  %v574_v7 = vmax.f32 %v446_v63, 0.0  ;;  %v264_v13 = vmul.f32 %v2101_v16, %v124_v61  ;;  %v528_v21 = vmax.f32 %v400_v36, 0.0  ;;  %v66_v36 = vld [vmem:[%s3014_s0 + $0x168] sm:$0xff] }
  0x50   :  { %v570_v26 = vmax.f32 %v442_v14, 0.0  ;;  %v569_v41 = vmax.f32 %v441_v30, 0.0  ;;  %v576_v14 = vmax.f32 %v448_v6, 0.0  ;;  %v261_v25 = vmul.f32 %v2138_v35, %v121_v4 }
  0x51   :  { %862 = vmatmul.mubr.bf16.gmra.mrb[8].mxu0 %v2229_v52  ;;  %990 = vmatmul.mubr.bf16.gmra.mrb[8].mxu1 %v657_v10  ;;  %v303_v52 = vmul.f32 %v2138_v35, %v163_v18  ;;  %v399_v10 = vadd.f32 %v2151_v47, %v259_v0  ;;  %v526_v20 = vmax.f32 %v398_v3, 0.0  ;;  %v525_v29 = vmax.f32 %v397_v46, 0.0  ;;  %v65_v0 = vld [vmem:[%s3014_s0 + $0x160] sm:$0xff]  ;;  %v44_v46 = vld [vmem:[%s3014_s0 + $0xb8] sm:$0xff] }
  0x52   :  { %869 = vmatprep.mubr.bf16.mxu0 %v2234_v60  ;;  %v395_v60 = vadd.f32 %v2151_v47, %v255_v9  ;;  %v660_v50 = vpack.c.bf16 %v572_v33, %v570_v26  ;;  %v263_v26 = vmul.f32 %v2138_v35, %v123_v5  ;;  %v662_v27 = vpack.c.bf16 %v576_v14, %v574_v7  ;;  %v43_v5 = vld [vmem:[%s3014_s0 + $0xb0] sm:$0xff] }
  0x53   :  { %v443_v34 = vadd.f32 %v2151_v47, %v303_v52  ;;  %v41_v52 = vld [vmem:[%s3014_s0 + $0xa0] sm:$0xff]  ;;  %v527_v30 = vmax.f32 %v399_v10, 0.0  ;;  %v172_v32 = vunpack.c.h.bf16 %v64_v19  ;;  %v310_v33 = vmul.f32 %v2101_v16, %v170_v24 }
  0x54   :  { %v523_v51 = vmax.f32 %v395_v60, 0.0  ;;  %997 = vmatprep.mubr.bf16.mxu1 %v660_v50  ;;  %v404_v37 = vadd.f32 %v2103_v17, %v264_v13  ;;  %v126_v42 = vunpack.c.h.bf16 %v41_v52  ;;  %v171_v48 = vunpack.c.l.bf16 %v64_v19 }
  0x55   :  { %v571_v49 = vmax.f32 %v443_v34, 0.0  ;;  %v402_v34 = vadd.f32 %v2103_v17, %v262_v12  ;;  %v450_v43 = vadd.f32 %v2103_v17, %v310_v33  ;;  %v2426_v45 = vpack.c.bf16 %v528_v21, %v526_v20 }
  0x56   :  { %v2400_v9 = vpack.c.bf16 %v523_v51, %v521_v39  ;;  %v42_v39 = vld [vmem:[%s3014_s0 + $0xa8] sm:$0xff]  ;;  %v403_v50 = vadd.f32 %v2151_v47, %v263_v26  ;;  %v311_v56 = vmul.f32 %v2138_v35, %v171_v48  ;;  %v2437_v62 = vpack.c.bf16 %v527_v30, %v525_v29 }
  0x57   :  { %v659_v58 = vpack.c.bf16 %v571_v49, %v569_v41  ;;  %v169_v41 = vunpack.c.l.bf16 %v63_v8  ;;  %v128_v51 = vunpack.c.h.bf16 %v42_v39  ;;  %v578_v54 = vmax.f32 %v450_v43, 0.0 }
  0x58   :  { %v530_v57 = vmax.f32 %v402_v34, 0.0  ;;  %v266_v63 = vmul.f32 %v2101_v16, %v126_v42  ;;  %v451_v3 = vadd.f32 %v2151_v47, %v311_v56  ;;  %v174_v7 = vunpack.c.h.bf16 %v65_v0  ;;  %v67_v34 = vld [vmem:[%s3014_s0 + $0x170] sm:$0xff] }
  0x59   :  { %870 = vmatmul.mubr.bf16.gmra.mrb[12].mxu0 %v2267_v23  ;;  %998 = vmatmul.mubr.bf16.gmra.mrb[12].mxu1 %v659_v58  ;;  %v305_v23 = vmul.f32 %v2138_v35, %v165_v59  ;;  %v309_v49 = vmul.f32 %v2138_v35, %v169_v41  ;;  %v532_v58 = vmax.f32 %v404_v37, 0.0  ;;  %v125_v59 = vunpack.c.l.bf16 %v41_v52  ;;  %v45_v41 = vld [vmem:[%s3014_s0 + $0xc0] sm:$0xff] }
  0x5a   :  { %877 = vmatprep.mubr.bf16.mxu0 %v2284_v55  ;;  %v307_v55 = vmul.f32 %v2138_v35, %v167_v1  ;;  %1005 = vmatprep.mubr.bf16.mxu1 %v662_v27  ;;  %v127_v8 = vunpack.c.l.bf16 %v42_v39  ;;  %v176_v14 = vunpack.c.h.bf16 %v66_v36  ;;  %v130_v19 = vunpack.c.h.bf16 %v43_v5 }
  0x5b   :  { %v445_v11 = vadd.f32 %v2151_v47, %v305_v23  ;;  %v449_v61 = vadd.f32 %v2151_v47, %v309_v49  ;;  %v531_v23 = vmax.f32 %v403_v50, 0.0  ;;  %v2453_v12 = vpack.c.bf16 %v532_v58, %v530_v57  ;;  %v68_v50 = vld [vmem:[%s3014_s0 + $0x178] sm:$0xff] }
  0x5c   :  { %v447_v18 = vadd.f32 %v2151_v47, %v307_v55  ;;  %v268_v55 = vmul.f32 %v2101_v16, %v128_v51  ;;  %v265_v13 = vmul.f32 %v2138_v35, %v125_v59  ;;  %v173_v21 = vunpack.c.l.bf16 %v65_v0  ;;  %v46_v0 = vld [vmem:[%s3014_s0 + $0xc8] sm:$0xff] }
  0x5d   :  { %v573_v22 = vmax.f32 %v445_v11, 0.0  ;;  %v577_v6 = vmax.f32 %v449_v61, 0.0  ;;  %v579_v11 = vmax.f32 %v451_v3, 0.0  ;;  %v316_v24 = vmul.f32 %v2101_v16, %v176_v14 }
  0x5e   :  { %v575_v60 = vmax.f32 %v447_v18, 0.0  ;;  %v314_v18 = vmul.f32 %v2101_v16, %v174_v7  ;;  %v175_v26 = vunpack.c.l.bf16 %v66_v36  ;;  %v408_v52 = vadd.f32 %v2103_v17, %v268_v55 }
  0x5f   :  { %v663_v20 = vpack.c.bf16 %v579_v11, %v577_v6  ;;  %v267_v27 = vmul.f32 %v2138_v35, %v127_v8  ;;  %v405_v29 = vadd.f32 %v2151_v47, %v265_v13  ;;  %v456_v30 = vadd.f32 %v2103_v17, %v316_v24 }
  0x60   :  { %v661_v40 = vpack.c.bf16 %v575_v60, %v573_v22  ;;  %v132_v22 = vunpack.c.h.bf16 %v44_v46  ;;  %v313_v60 = vmul.f32 %v2138_v35, %v173_v21  ;;  %v315_v33 = vmul.f32 %v2138_v35, %v175_v26 }
  0x61   :  { %878 = vmatmul.mubr.bf16.gmra.mrb[16].mxu0 %v2299_v2  ;;  %v312_v2 = vmul.f32 %v2101_v16, %v172_v32  ;;  %v270_v39 = vmul.f32 %v2101_v16, %v130_v19  ;;  %v131_v43 = vunpack.c.l.bf16 %v44_v46  ;;  %v584_v48 = vmax.f32 %v456_v30, 0.0 }
  0x62   :  { %885 = vmatprep.mubr.bf16.mxu0 %v2314_v15  ;;  %v401_v15 = vadd.f32 %v2151_v47, %v261_v25  ;;  %1006 = vmatmul.mubr.bf16.gmra.mrb[16].mxu1 %v661_v40  ;;  %v454_v25 = vadd.f32 %v2103_v17, %v314_v18  ;;  %v129_v40 = vunpack.c.l.bf16 %v43_v5  ;;  %v453_v42 = vadd.f32 %v2151_v47, %v313_v60 }
  0x63   :  { %v452_v53 = vadd.f32 %v2103_v17, %v312_v2  ;;  %v272_v2 = vmul.f32 %v2101_v16, %v132_v22  ;;  %v536_v49 = vmax.f32 %v408_v52, 0.0  ;;  %v407_v51 = vadd.f32 %v2151_v47, %v267_v27  ;;  %v70_v27 = vld [vmem:[%s3014_s0 + $0x188] sm:$0xff] }
  0x64   :  { %v529_v4 = vmax.f32 %v401_v15, 0.0  ;;  %v582_v32 = vmax.f32 %v454_v25, 0.0  ;;  %v455_v15 = vadd.f32 %v2151_v47, %v315_v33  ;;  %v533_v56 = vmax.f32 %v405_v29, 0.0 }
  0x65   :  { %v580_v1 = vmax.f32 %v452_v53, 0.0  ;;  %v581_v53 = vmax.f32 %v453_v42, 0.0  ;;  %v134_v57 = vunpack.c.h.bf16 %v45_v41  ;;  %v410_v61 = vadd.f32 %v2103_v17, %v270_v39 }
  0x66   :  { %v666_v58 = vpack.c.bf16 %v584_v48, %v582_v32  ;;  %v583_v59 = vmax.f32 %v455_v15, 0.0  ;;  %v412_v3 = vadd.f32 %v2103_v17, %v272_v2  ;;  %v271_v36 = vmul.f32 %v2138_v35, %v131_v43 }
  0x67   :  { %v664_v10 = vpack.c.bf16 %v580_v1, %v578_v54  ;;  %v178_v54 = vunpack.c.h.bf16 %v67_v34  ;;  %v179_v7 = vunpack.c.l.bf16 %v68_v50  ;;  %v535_v8 = vmax.f32 %v407_v51, 0.0  ;;  %v2543_v51 = vld [vmem:[%s3014_s0 + $0xd0] sm:$0xff] }
  0x68   :  { %v274_v46 = vmul.f32 %v2101_v16, %v134_v57  ;;  %v133_v11 = vunpack.c.l.bf16 %v45_v41  ;;  %v538_v19 = vmax.f32 %v410_v61, 0.0  ;;  %v2509_v24 = vadd.f32 %v2151_v47, %v271_v36 }
  0x69   :  { %886 = vmatmul.mubr.bf16.gmra.mrb[20].mxu0 %v2333_v44  ;;  %v406_v44 = vadd.f32 %v2103_v17, %v266_v63  ;;  %1013 = vmatprep.mubr.bf16.mxu1 %v664_v10  ;;  %v269_v63 = vmul.f32 %v2138_v35, %v129_v40  ;;  %v318_v1 = vmul.f32 %v2101_v16, %v178_v54  ;;  %v135_v29 = vunpack.c.l.bf16 %v46_v0 }
  0x6a   :  { %893 = vmatprep.mubr.bf16.mxu0 %v2365_v28  ;;  %v2460_v28 = vpack.c.bf16 %v531_v23, %v529_v4  ;;  %1014 = vmatmul.mubr.bf16.gmra.mrb[20].mxu1 %v663_v20  ;;  %v177_v4 = vunpack.c.l.bf16 %v67_v34  ;;  %v136_v23 = vunpack.c.h.bf16 %v46_v0  ;;  %v319_v18 = vmul.f32 %v2138_v35, %v179_v7 }
  0x6b   :  { %v534_v37 = vmax.f32 %v406_v44, 0.0  ;;  %1021 = vmatprep.mubr.bf16.mxu1 %v666_v58  ;;  %v458_v6 = vadd.f32 %v2103_v17, %v318_v1  ;;  %v69_v44 = vld [vmem:[%s3014_s0 + $0x180] sm:$0xff]  ;;  %v540_v20 = vmax.f32 %v412_v3, 0.0  ;;  %v2504_v21 = vadd.f32 %v2151_v47, %v269_v63 }
  0x6c   :  { %v317_v10 = vmul.f32 %v2138_v35, %v177_v4  ;;  %v276_v25 = vmul.f32 %v2101_v16, %v136_v23  ;;  %v459_v52 = vadd.f32 %v2151_v47, %v319_v18  ;;  %v2517_v60 = vpack.c.bf16 %v535_v8, %v533_v56  ;;  %v73_v3 = vld [vmem:[%s3014_s0 + $0x1a0] sm:$0xff] }
  0x6d   :  { %v2494_v55 = vpack.c.bf16 %v536_v49, %v534_v37  ;;  %v586_v14 = vmax.f32 %v458_v6, 0.0  ;;  %v182_v32 = vunpack.c.h.bf16 %v69_v44  ;;  %v273_v33 = vmul.f32 %v2138_v35, %v133_v11 }
  0x6e   :  { %v457_v22 = vadd.f32 %v2151_v47, %v317_v10  ;;  %v587_v37 = vmax.f32 %v459_v52, 0.0  ;;  %v2523_v39 = vpack.c.bf16 %v540_v20, %v538_v19  ;;  %v537_v40 = vmax.f32 %v2504_v21, 0.0 }
  0x6f   :  { %v184_v41 = vunpack.c.h.bf16 %v70_v27  ;;  %v322_v42 = vmul.f32 %v2101_v16, %v182_v32  ;;  %v539_v2 = vmax.f32 %v2509_v24, 0.0  ;;  %v2532_v43 = vadd.f32 %v2103_v17, %v276_v25  ;;  %v76_v32 = vld [vmem:[%s3014_s0 + $0x1b8] sm:$0xff] }
  0x70   :  { %v585_v30 = vmax.f32 %v457_v22, 0.0  ;;  %v181_v15 = vunpack.c.l.bf16 %v69_v44  ;;  %v2538_v49 = vmul.f32 %v2138_v35, %v135_v29  ;;  %v183_v56 = vunpack.c.l.bf16 %v70_v27 }
  0x71   :  { %894 = vmatmul.mubr.bf16.gmra.mrb[24].mxu0 %v2369_v31  ;;  %v180_v31 = vunpack.c.h.bf16 %v68_v50  ;;  %v72_v50 = vld [vmem:[%s3014_s0 + $0x198] sm:$0xff]  ;;  %v462_v54 = vadd.f32 %v2103_v17, %v322_v42  ;;  %v2549_v57 = vadd.f32 %v2151_v47, %v273_v33  ;;  %v138_v36 = vunpack.c.h.bf16 %v2543_v51 }
  0x72   :  { %901 = vmatprep.mubr.bf16.mxu0 %v2375_v38  ;;  %v665_v38 = vpack.c.bf16 %v583_v59, %v581_v53  ;;  %v667_v48 = vpack.c.bf16 %v587_v37, %v585_v30  ;;  %v324_v53 = vmul.f32 %v2101_v16, %v184_v41  ;;  %v321_v58 = vmul.f32 %v2138_v35, %v181_v15  ;;  %v48_v33 = vld [vmem:[%s3014_s0 + $0xd8] sm:$0xff] }
  0x73   :  { %v320_v5 = vmul.f32 %v2101_v16, %v180_v31  ;;  %v590_v63 = vmax.f32 %v462_v54, 0.0  ;;  %v323_v31 = vmul.f32 %v2138_v35, %v183_v56  ;;  %v188_v1 = vunpack.c.h.bf16 %v72_v50 }
  0x74   :  { %1022 = vmatmul.mubr.bf16.gmra.mrb[24].mxu1 %v665_v38  ;;  %v464_v61 = vadd.f32 %v2103_v17, %v324_v53  ;;  %v461_v38 = vadd.f32 %v2151_v47, %v321_v58  ;;  %v187_v8 = vunpack.c.l.bf16 %v72_v50  ;;  %v189_v30 = vunpack.c.l.bf16 %v73_v3 }
  0x75   :  { %v460_v13 = vadd.f32 %v2103_v17, %v320_v5  ;;  %v463_v6 = vadd.f32 %v2151_v47, %v323_v31  ;;  %v328_v7 = vmul.f32 %v2101_v16, %v188_v1  ;;  %v196_v58 = vunpack.c.h.bf16 %v76_v32 }
  0x76   :  { %v592_v5 = vmax.f32 %v464_v61, 0.0  ;;  %v327_v44 = vmul.f32 %v2138_v35, %v187_v8  ;;  %v329_v15 = vmul.f32 %v2138_v35, %v189_v30  ;;  %v140_v61 = vunpack.c.h.bf16 %v48_v33 }
  0x77   :  { %v588_v26 = vmax.f32 %v460_v13, 0.0  ;;  %v190_v13 = vunpack.c.h.bf16 %v73_v3  ;;  %v591_v18 = vmax.f32 %v463_v6, 0.0  ;;  %v195_v6 = vunpack.c.l.bf16 %v76_v32 }
  0x78   :  { %v467_v29 = vadd.f32 %v2151_v47, %v327_v44  ;;  %v469_v31 = vadd.f32 %v2151_v47, %v329_v15  ;;  %v415_v8 = vadd.f32 %v2151_v47, %v2538_v49  ;;  %v643_v49 = vpack.c.bf16 %v539_v2, %v537_v40 }
  0x79   :  { %902 = vmatmul.mubr.bf16.gmra.mrb[28].mxu0 %v2400_v9  ;;  %v2520_v9 = vadd.f32 %v2103_v17, %v274_v46  ;;  %v668_v34 = vpack.c.bf16 %v588_v26, %v586_v14  ;;  %v74_v46 = vld [vmem:[%s3014_s0 + $0x1a8] sm:$0xff]  ;;  %v670_v14 = vpack.c.bf16 %v592_v5, %v590_v63  ;;  %v330_v25 = vmul.f32 %v2101_v16, %v190_v13  ;;  %v75_v26 = vld [vmem:[%s3014_s0 + $0x1b0] sm:$0xff] }
  0x7a   :  { %909 = vmatprep.mubr.bf16.mxu0 %v2426_v45  ;;  %v71_v45 = vld [vmem:[%s3014_s0 + $0x190] sm:$0xff]  ;;  %v192_v22 = vunpack.c.h.bf16 %v74_v46  ;;  %v191_v42 = vunpack.c.l.bf16 %v74_v46  ;;  %v194_v50 = vunpack.c.h.bf16 %v75_v26  ;;  %v137_v63 = vunpack.c.l.bf16 %v2543_v51  ;;  %v49_v51 = vld [vmem:[%s3014_s0 + $0xe0] sm:$0xff] }
  0x7b   :  { %1029 = vmatprep.mubr.bf16.mxu1 %v668_v34  ;;  %v542_v0 = vmax.f32 %v2520_v9, 0.0  ;;  %v186_v59 = vunpack.c.h.bf16 %v71_v45  ;;  %v185_v23 = vunpack.c.l.bf16 %v71_v45  ;;  %v470_v41 = vadd.f32 %v2103_v17, %v330_v25  ;;  %v80_v9 = vld [vmem:[%s3014_s0 + $0x1d8] sm:$0xff] }
  0x7c   :  { %1030 = vmatmul.mubr.bf16.gmra.mrb[28].mxu1 %v667_v48  ;;  %v332_v37 = vmul.f32 %v2101_v16, %v192_v22  ;;  %v595_v48 = vmax.f32 %v467_v29, 0.0  ;;  %v331_v56 = vmul.f32 %v2138_v35, %v191_v42  ;;  %v280_v13 = vmul.f32 %v2101_v16, %v140_v61 }
  0x7d   :  { %v326_v4 = vmul.f32 %v2101_v16, %v186_v59  ;;  %v325_v11 = vmul.f32 %v2138_v35, %v185_v23  ;;  %1037 = vmatprep.mubr.bf16.mxu1 %v670_v14  ;;  %v598_v54 = vmax.f32 %v470_v41, 0.0  ;;  %v2592_v59 = vld [vmem:[%s3014_s0 + $0x1c0] sm:$0xff]  ;;  %v78_v23 = vld [vmem:[%s3014_s0 + $0x1c8] sm:$0xff]  ;;  %v139_v14 = vunpack.c.l.bf16 %v48_v33 }
  0x7e   :  { %v472_v53 = vadd.f32 %v2103_v17, %v332_v37  ;;  %v471_v3 = vadd.f32 %v2151_v47, %v331_v56  ;;  %v543_v2 = vmax.f32 %v415_v8, 0.0  ;;  %v199_v37 = vunpack.c.l.bf16 %v78_v23 }
  0x7f   :  { %v466_v10 = vadd.f32 %v2103_v17, %v326_v4  ;;  %v465_v20 = vadd.f32 %v2151_v47, %v325_v11  ;;  %v193_v4 = vunpack.c.l.bf16 %v75_v26  ;;  %v278_v11 = vmul.f32 %v2101_v16, %v138_v36 }
  0x80   :  { %v600_v1 = vmax.f32 %v472_v53, 0.0  ;;  %v599_v44 = vmax.f32 %v471_v3, 0.0  ;;  %v335_v36 = vmul.f32 %v2138_v35, %v195_v6  ;;  %v420_v26 = vadd.f32 %v2103_v17, %v280_v13  ;;  %v52_v13 = vld [vmem:[%s3014_s0 + $0xf8] sm:$0xff] }
  0x81   :  { %910 = vmatmul.mubr.bf16.gmra.mrb[32].mxu0 %v2437_v62  ;;  %v589_v62 = vmax.f32 %v461_v38, 0.0  ;;  %v594_v19 = vmax.f32 %v466_v10, 0.0  ;;  %v593_v34 = vmax.f32 %v465_v20, 0.0  ;;  %v336_v38 = vmul.f32 %v2101_v16, %v196_v58 }
  0x82   :  { %917 = vmatprep.mubr.bf16.mxu0 %v2453_v12  ;;  %v468_v12 = vadd.f32 %v2103_v17, %v328_v7  ;;  %v198_v7 = vunpack.c.h.bf16 %v2592_v59  ;;  %v674_v46 = vpack.c.bf16 %v600_v1, %v598_v54  ;;  %v541_v20 = vmax.f32 %v2549_v57, 0.0 }
  0x83   :  { %v669_v52 = vpack.c.bf16 %v591_v18, %v589_v62  ;;  %v671_v5 = vpack.c.bf16 %v595_v48, %v593_v34  ;;  %v476_v10 = vadd.f32 %v2103_v17, %v336_v38  ;;  %v277_v18 = vmul.f32 %v2138_v35, %v137_v63 }
  0x84   :  { %v596_v27 = vmax.f32 %v468_v12, 0.0  ;;  %v597_v12 = vmax.f32 %v469_v31, 0.0  ;;  %v338_v22 = vmul.f32 %v2101_v16, %v198_v7  ;;  %v418_v57 = vadd.f32 %v2103_v17, %v278_v11  ;;  %v51_v11 = vld [vmem:[%s3014_s0 + $0xf0] sm:$0xff] }
  0x85   :  { %1038 = vmatmul.mubr.bf16.gmra.mrb[32].mxu1 %v669_v52  ;;  %v604_v24 = vmax.f32 %v476_v10, 0.0  ;;  %v279_v52 = vmul.f32 %v2138_v35, %v139_v14  ;;  %v475_v32 = vadd.f32 %v2151_v47, %v335_v36  ;;  %v197_v34 = vunpack.c.l.bf16 %v2592_v59 }
  0x86   :  { %v672_v45 = vpack.c.bf16 %v596_v27, %v594_v19  ;;  %v333_v19 = vmul.f32 %v2138_v35, %v193_v4  ;;  %v142_v27 = vunpack.c.h.bf16 %v49_v51  ;;  %v673_v29 = vpack.c.bf16 %v599_v44, %v597_v12 }
  0x87   :  { %v478_v33 = vadd.f32 %v2103_v17, %v338_v22  ;;  %v204_v48 = vunpack.c.h.bf16 %v80_v9  ;;  %v546_v15 = vmax.f32 %v418_v57, 0.0  ;;  %v419_v53 = vadd.f32 %v2151_v47, %v279_v52 }
  0x88   :  { %1045 = vmatprep.mubr.bf16.mxu1 %v672_v45  ;;  %v473_v30 = vadd.f32 %v2151_v47, %v333_v19  ;;  %v645_v56 = vpack.c.bf16 %v543_v2, %v541_v20  ;;  %v282_v61 = vmul.f32 %v2101_v16, %v142_v27  ;;  %v141_v63 = vunpack.c.l.bf16 %v49_v51 }
  0x89   :  { %918 = vmatmul.mubr.bf16.gmra.mrb[36].mxu0 %v2460_v28  ;;  %v334_v28 = vmul.f32 %v2101_v16, %v194_v50  ;;  %v548_v50 = vmax.f32 %v420_v26, 0.0  ;;  %v337_v59 = vmul.f32 %v2138_v35, %v197_v34  ;;  %v339_v1 = vmul.f32 %v2138_v35, %v199_v37  ;;  %v83_v37 = vld [vmem:[%s3014_s0 + $0x1f0] sm:$0xff] }
  0x8a   :  { %925 = vmatprep.mubr.bf16.mxu0 %v2494_v55  ;;  %v544_v55 = vmax.f32 %v2532_v43, 0.0  ;;  %v200_v43 = vunpack.c.h.bf16 %v78_v23  ;;  %v601_v31 = vmax.f32 %v473_v30, 0.0  ;;  %v606_v3 = vmax.f32 %v478_v33, 0.0 }
  0x8b   :  { %v474_v62 = vadd.f32 %v2103_v17, %v334_v28  ;;  %v603_v28 = vmax.f32 %v475_v32, 0.0  ;;  %v344_v23 = vmul.f32 %v2101_v16, %v204_v48  ;;  %v547_v6 = vmax.f32 %v419_v53, 0.0 }
  0x8c   :  { %v646_v25 = vpack.c.bf16 %v544_v55, %v542_v0  ;;  %v340_v40 = vmul.f32 %v2101_v16, %v200_v43  ;;  %v417_v0 = vadd.f32 %v2151_v47, %v277_v18  ;;  %v2657_v55 = vld [vmem:[%s3014_s0 + $0x1e0] sm:$0xff]  ;;  %v281_v10 = vmul.f32 %v2138_v35, %v141_v63 }
  0x8d   :  { %1046 = vmatmul.mubr.bf16.gmra.mrb[36].mxu1 %v671_v5  ;;  %v602_v21 = vmax.f32 %v474_v62, 0.0  ;;  %v648_v5 = vpack.c.bf16 %v548_v50, %v546_v15  ;;  %v422_v62 = vadd.f32 %v2103_v17, %v282_v61  ;;  %v203_v43 = vunpack.c.l.bf16 %v80_v9 }
  0x8e   :  { %1053 = vmatprep.mubr.bf16.mxu1 %v674_v46  ;;  %v480_v42 = vadd.f32 %v2103_v17, %v340_v40  ;;  %v545_v58 = vmax.f32 %v417_v0, 0.0  ;;  %v2663_v46 = vld [vmem:[%s3014_s0 + $0x1e8] sm:$0xff]  ;;  %v675_v18 = vpack.c.bf16 %v603_v28, %v601_v31  ;;  %v477_v12 = vadd.f32 %v2151_v47, %v337_v59 }
  0x8f   :  { %v676_v41 = vpack.c.bf16 %v604_v24, %v602_v21  ;;  %v479_v44 = vadd.f32 %v2151_v47, %v339_v1  ;;  %v206_v19 = vunpack.c.h.bf16 %v2657_v55  ;;  %v484_v51 = vadd.f32 %v2103_v17, %v344_v23 }
  0x90   :  { %v608_v38 = vmax.f32 %v480_v42, 0.0  ;;  %v208_v36 = vunpack.c.h.bf16 %v2663_v46  ;;  %v146_v21 = vunpack.c.h.bf16 %v51_v11  ;;  %v148_v24 = vunpack.c.h.bf16 %v52_v13 }
  0x91   :  { %926 = vmatmul.mubr.bf16.gmra.mrb[40].mxu0 %v2517_v60  ;;  %v79_v60 = vld [vmem:[%s3014_s0 + $0x1d0] sm:$0xff]  ;;  %v647_v40 = vpack.c.bf16 %v547_v6, %v545_v58  ;;  %v343_v57 = vmul.f32 %v2138_v35, %v203_v43  ;;  %v550_v26 = vmax.f32 %v422_v62, 0.0  ;;  %v605_v52 = vmax.f32 %v477_v12, 0.0 }
  0x92   :  { %933 = vmatprep.mubr.bf16.mxu0 %v2523_v39  ;;  %v50_v39 = vld [vmem:[%s3014_s0 + $0xe8] sm:$0xff]  ;;  %v202_v45 = vunpack.c.h.bf16 %v79_v60  ;;  %v201_v14 = vunpack.c.l.bf16 %v79_v60  ;;  %v607_v60 = vmax.f32 %v479_v44, 0.0  ;;  %v346_v9 = vmul.f32 %v2101_v16, %v206_v19 }
  0x93   :  { %v144_v54 = vunpack.c.h.bf16 %v50_v39  ;;  %v143_v8 = vunpack.c.l.bf16 %v50_v39  ;;  %v421_v0 = vadd.f32 %v2151_v47, %v281_v10  ;;  %v612_v27 = vmax.f32 %v484_v51, 0.0 }
  0x94   :  { %v342_v4 = vmul.f32 %v2101_v16, %v202_v45  ;;  %v341_v2 = vmul.f32 %v2138_v35, %v201_v14  ;;  %v286_v33 = vmul.f32 %v2101_v16, %v146_v21  ;;  %v288_v34 = vmul.f32 %v2101_v16, %v148_v24 }
  0x95   :  { %1054 = vmatmul.mubr.bf16.gmra.mrb[40].mxu1 %v673_v29  ;;  %v284_v7 = vmul.f32 %v2101_v16, %v144_v54  ;;  %v348_v29 = vmul.f32 %v2101_v16, %v208_v36  ;;  %v145_v42 = vunpack.c.l.bf16 %v51_v11  ;;  %v147_v45 = vunpack.c.l.bf16 %v52_v13 }
  0x96   :  { %1061 = vmatprep.mubr.bf16.mxu1 %v676_v41  ;;  %v482_v20 = vadd.f32 %v2103_v17, %v342_v4  ;;  %v84_v41 = vld [vmem:[%s3014_s0 + $0x1f8] sm:$0xff]  ;;  %v481_v48 = vadd.f32 %v2151_v47, %v341_v2  ;;  %v483_v15 = vadd.f32 %v2151_v47, %v343_v57  ;;  %v677_v50 = vpack.c.bf16 %v607_v60, %v605_v52 }
  0x97   :  { %v424_v22 = vadd.f32 %v2103_v17, %v284_v7  ;;  %v486_v53 = vadd.f32 %v2103_v17, %v346_v9  ;;  %v205_v54 = vunpack.c.l.bf16 %v2657_v55  ;;  %v488_v61 = vadd.f32 %v2103_v17, %v348_v29 }
  0x98   :  { %v610_v39 = vmax.f32 %v482_v20, 0.0  ;;  %v210_v63 = vunpack.c.h.bf16 %v83_v37  ;;  %v212_v31 = vunpack.c.h.bf16 %v84_v41  ;;  %v549_v59 = vmax.f32 %v421_v0, 0.0 }
  0x99   :  { %934 = vmatmul.mubr.bf16.gmra.mrb[44].mxu0 %v643_v49  ;;  %v678_v49 = vpack.c.bf16 %v608_v38, %v606_v3  ;;  %v552_v30 = vmax.f32 %v424_v22, 0.0  ;;  %v426_v1 = vadd.f32 %v2103_v17, %v286_v33  ;;  %v428_v3 = vadd.f32 %v2103_v17, %v288_v34 }
  0x9a   :  { %941 = vmatprep.mubr.bf16.mxu0 %v646_v25  ;;  %v283_v25 = vmul.f32 %v2138_v35, %v143_v8  ;;  %v680_v58 = vpack.c.bf16 %v612_v27, %v610_v39  ;;  %v285_v4 = vmul.f32 %v2138_v35, %v145_v42  ;;  %v609_v23 = vmax.f32 %v481_v48, 0.0 }
  0x9b   :  { %v650_v28 = vpack.c.bf16 %v552_v30, %v550_v26  ;;  %v287_v55 = vmul.f32 %v2138_v35, %v147_v45  ;;  %v345_v6 = vmul.f32 %v2138_v35, %v205_v54  ;;  %v614_v8 = vmax.f32 %v486_v53, 0.0 }
  0x9c   :  { %v423_v32 = vadd.f32 %v2151_v47, %v283_v25  ;;  %v350_v62 = vmul.f32 %v2101_v16, %v210_v63  ;;  %v352_v10 = vmul.f32 %v2101_v16, %v212_v31  ;;  %v554_v11 = vmax.f32 %v426_v1, 0.0 }
  0x9d   :  { %1062 = vmatmul.mubr.bf16.gmra.mrb[44].mxu1 %v675_v18  ;;  %v556_v13 = vmax.f32 %v428_v3, 0.0  ;;  %v425_v43 = vadd.f32 %v2151_v47, %v285_v4  ;;  %v485_v12 = vadd.f32 %v2151_v47, %v345_v6  ;;  %v209_v19 = vunpack.c.l.bf16 %v83_v37 }
  0x9e   :  { %1069 = vmatprep.mubr.bf16.mxu1 %v678_v49  ;;  %v551_v38 = vmax.f32 %v423_v32, 0.0  ;;  %v211_v49 = vunpack.c.l.bf16 %v84_v41  ;;  %v427_v20 = vadd.f32 %v2151_v47, %v287_v55  ;;  %v490_v36 = vadd.f32 %v2103_v17, %v350_v62 }
  0x9f   :  { %v492_v16 = vadd.f32 %v2103_v17, %v352_v10  ;;  %v652_v22 = vpack.c.bf16 %v556_v13, %v554_v11  ;;  %v613_v25 = vmax.f32 %v485_v12, 0.0  ;;  %v349_v24 = vmul.f32 %v2138_v35, %v209_v19 }
  0xa0   :  { %v649_v14 = vpack.c.bf16 %v551_v38, %v549_v59  ;;  %v553_v2 = vmax.f32 %v425_v43, 0.0  ;;  %v555_v57 = vmax.f32 %v427_v20, 0.0  ;;  %v618_v26 = vmax.f32 %v490_v36, 0.0 }
  0xa1   :  { %942 = vmatmul.mubr.bf16.gmra.mrb[48].mxu0 %v645_v56  ;;  %v207_v56 = vunpack.c.l.bf16 %v2663_v46  ;;  %v616_v46 = vmax.f32 %v488_v61, 0.0  ;;  %v620_v52 = vmax.f32 %v492_v16, 0.0  ;;  %v489_v9 = vadd.f32 %v2151_v47, %v349_v24 }
  0xa2   :  { %949 = vmatprep.mubr.bf16.mxu0 %v648_v5  ;;  %v611_v5 = vmax.f32 %v483_v15, 0.0  ;;  %v651_v0 = vpack.c.bf16 %v555_v57, %v553_v2 }
  0xa3   :  { %v347_v7 = vmul.f32 %v2138_v35, %v207_v56  ;;  %v682_v51 = vpack.c.bf16 %v616_v46, %v614_v8  ;;  %v684_v39 = vpack.c.bf16 %v620_v52, %v618_v26  ;;  %v617_v27 = vmax.f32 %v489_v9, 0.0 }
  0xa4   :  { %v679_v18 = vpack.c.bf16 %v611_v5, %v609_v23 }
  0xa5   :  { %1070 = vmatmul.mubr.bf16.gmra.mrb[48].mxu1 %v677_v50  ;;  %v487_v44 = vadd.f32 %v2151_v47, %v347_v7 }
  0xa6   :  { %1077 = vmatprep.mubr.bf16.mxu1 %v680_v58 }
  0xa7   :  { %v615_v21 = vmax.f32 %v487_v44, 0.0 }
  0xa9   :  { %950 = vmatmul.mubr.bf16.gmra.mrb[52].mxu0 %v647_v40  ;;  %v351_v40 = vmul.f32 %v2138_v35, %v211_v49  ;;  %v681_v60 = vpack.c.bf16 %v615_v21, %v613_v25 }
  0xaa   :  { %957 = vmatprep.mubr.bf16.mxu0 %v650_v28 }
  0xab   :  { %v491_v17 = vadd.f32 %v2151_v47, %v351_v40 }
  0xad   :  { %1078 = vmatmul.mubr.bf16.gmra.mrb[52].mxu1 %v679_v18  ;;  %v619_v29 = vmax.f32 %v491_v17, 0.0 }
  0xae   :  { %1085 = vmatprep.mubr.bf16.mxu1 %v682_v51 }
  0xaf   :  { %v683_v35 = vpack.c.bf16 %v619_v29, %v617_v27 }
  0xb1   :  { %958 = vmatmul.mubr.bf16.gmra.mrb[56].mxu0 %v649_v14 }
  0xb2   :  { %965 = vmatprep.mubr.bf16.mxu0 %v652_v22 }
  0xb5   :  { %1086 = vmatmul.mubr.bf16.gmra.mrb[56].mxu1 %v681_v60 }
  0xb6   :  { %1093 = vmatprep.mubr.bf16.mxu1 %v684_v39 }
  0xb9   :  { %966 = vmatmul.mubr.bf16.gmra.mrb[60].mxu0 %v651_v0 }
  0xbd   :  { %1094 = vmatmul.mubr.bf16.gmra.mrb[60].mxu1 %v683_v35 }
 0x114   :  { %v847_v30 = vpop.f32.mrb[0].mxu0  ;;  %v2719_v34 = vpop.f32.mrb[0].mxu1 }
 0x115   :  { %v849_v32 = vpop.f32.mrb[1].mxu0  ;;  %v1492_v37 = vmul.f32 %v847_v30, %v847_v30  ;;  %v977_v47 = vpop.f32.mrb[1].mxu1 }
 0x116   :  { %v850_v33 = vpop.f32.mrb[2].mxu0  ;;  %v2721_v15 = vpop.f32.mrb[2].mxu1 }
 0x117   :  { %v1785_v41 = vpack.c.bf16 %v850_v33, %v847_v30  ;;  %v1422_v42 = vadd.f32 %v850_v33, %v847_v30  ;;  %v1493_v45 = vmul.f32 %v850_v33, %v850_v33  ;;  %v852_v48 = vpop.f32.mrb[3].mxu0  ;;  %v1865_v53 = vpack.c.bf16 %v2721_v15, %v2719_v34  ;;  %v980_v54 = vpop.f32.mrb[3].mxu1 }
 0x119   :  { %1786 = vst [vmem:[%s3017_s4] sm:$0xff] %v1785_v41   ;;  %v1556_v50 = vadd.f32 %v1493_v45, %v1492_v37  ;;  %1957 = vst [vmem:[%s3017_s4 + $0x80] sm:$0xff] %v1865_v53  }
 0x11c   :  { %v855_v56 = vpop.f32.mrb[4].mxu0  ;;  %v2731_v28 = vpop.f32.mrb[4].mxu1 }
 0x11d   :  { %v1423_v58 = vadd.f32 %v1422_v42, %v855_v56  ;;  %v1494_v61 = vmul.f32 %v855_v56, %v855_v56  ;;  %v857_v63 = vpop.f32.mrb[5].mxu0  ;;  %v985_v23 = vpop.f32.mrb[5].mxu1 }
 0x11e   :  { %v858_v31 = vpop.f32.mrb[6].mxu0  ;;  %v2733_v5 = vpop.f32.mrb[6].mxu1 }
 0x11f   :  { %v1557_v59 = vadd.f32 %v1556_v50, %v1494_v61  ;;  %v1790_v1 = vpack.c.bf16 %v858_v31, %v855_v56  ;;  %v1424_v3 = vadd.f32 %v1423_v58, %v858_v31  ;;  %v1495_v38 = vmul.f32 %v858_v31, %v858_v31  ;;  %v860_v4 = vpop.f32.mrb[7].mxu0  ;;  %v988_v7 = vpop.f32.mrb[7].mxu1 }
 0x120   :  { %v1870_v6 = vpack.c.bf16 %v2733_v5, %v2731_v28 }
 0x121   :  { %1942 = vst [vmem:[%s3017_s4 + $0x8] sm:$0xff] %v1790_v1   ;;  %v1558_v55 = vadd.f32 %v1557_v59, %v1495_v38 }
 0x122   :  { %1958 = vst [vmem:[%s3017_s4 + $0x88] sm:$0xff] %v1870_v6  }
 0x124   :  { %v863_v8 = vpop.f32.mrb[8].mxu0  ;;  %v2743_v13 = vpop.f32.mrb[8].mxu1 }
 0x125   :  { %v1425_v46 = vadd.f32 %v1424_v3, %v863_v8  ;;  %v1496_v62 = vmul.f32 %v863_v8, %v863_v8  ;;  %v865_v10 = vpop.f32.mrb[9].mxu0  ;;  %v993_v19 = vpop.f32.mrb[9].mxu1 }
 0x126   :  { %v866_v11 = vpop.f32.mrb[10].mxu0  ;;  %v2745_v49 = vpop.f32.mrb[10].mxu1 }
 0x127   :  { %v1559_v14 = vadd.f32 %v1558_v55, %v1496_v62  ;;  %v1795_v43 = vpack.c.bf16 %v866_v11, %v863_v8  ;;  %v1426_v18 = vadd.f32 %v1425_v46, %v866_v11  ;;  %v1497_v12 = vmul.f32 %v866_v11, %v866_v11  ;;  %v868_v44 = vpop.f32.mrb[11].mxu0  ;;  %v996_v36 = vpop.f32.mrb[11].mxu1 }
 0x128   :  { %v1875_v51 = vpack.c.bf16 %v2745_v49, %v2743_v13 }
 0x129   :  { %1943 = vst [vmem:[%s3017_s4 + $0x10] sm:$0xff] %v1795_v43   ;;  %v1560_v20 = vadd.f32 %v1559_v14, %v1497_v12 }
 0x12a   :  { %1959 = vst [vmem:[%s3017_s4 + $0x90] sm:$0xff] %v1875_v51  }
 0x12c   :  { %v871_v16 = vpop.f32.mrb[12].mxu0  ;;  %v2755_v40 = vpop.f32.mrb[12].mxu1 }
 0x12d   :  { %v1427_v22 = vadd.f32 %v1426_v18, %v871_v16  ;;  %v1498_v25 = vmul.f32 %v871_v16, %v871_v16  ;;  %v873_v21 = vpop.f32.mrb[13].mxu0  ;;  %v1001_v9 = vpop.f32.mrb[13].mxu1 }
 0x12e   :  { %v874_v24 = vpop.f32.mrb[14].mxu0  ;;  %v2757_v17 = vpop.f32.mrb[14].mxu1 }
 0x12f   :  { %v1561_v2 = vadd.f32 %v1560_v20, %v1498_v25  ;;  %v1800_v57 = vpack.c.bf16 %v874_v24, %v871_v16  ;;  %v1428_v26 = vadd.f32 %v1427_v22, %v874_v24  ;;  %v1499_v52 = vmul.f32 %v874_v24, %v874_v24  ;;  %v876_v60 = vpop.f32.mrb[15].mxu0  ;;  %v1004_v27 = vpop.f32.mrb[15].mxu1 }
 0x130   :  { %v1880_v39 = vpack.c.bf16 %v2757_v17, %v2755_v40 }
 0x131   :  { %1944 = vst [vmem:[%s3017_s4 + $0x18] sm:$0xff] %v1800_v57   ;;  %v1562_v0 = vadd.f32 %v1561_v2, %v1499_v52 }
 0x132   :  { %1960 = vst [vmem:[%s3017_s4 + $0x98] sm:$0xff] %v1880_v39  }
 0x134   :  { %v879_v29 = vpop.f32.mrb[16].mxu0 }
 0x135   :  { %v1429_v35 = vadd.f32 %v1428_v26, %v879_v29  ;;  %v1500_v30 = vmul.f32 %v879_v29, %v879_v29  ;;  %v881_v32 = vpop.f32.mrb[17].mxu0  ;;  %v2767_v47 = vpop.f32.mrb[16].mxu1 }
 0x136   :  { %v882_v33 = vpop.f32.mrb[18].mxu0  ;;  %v1009_v50 = vpop.f32.mrb[17].mxu1 }
 0x137   :  { %v1563_v37 = vadd.f32 %v1562_v0, %v1500_v30  ;;  %v1805_v41 = vpack.c.bf16 %v882_v33, %v879_v29  ;;  %v1430_v42 = vadd.f32 %v1429_v35, %v882_v33  ;;  %v1501_v45 = vmul.f32 %v882_v33, %v882_v33  ;;  %v884_v48 = vpop.f32.mrb[19].mxu0  ;;  %v2772_v54 = vpop.f32.mrb[18].mxu1 }
 0x138   :  { %v1885_v56 = vpack.c.bf16 %v2772_v54, %v2767_v47  ;;  %v1012_v58 = vpop.f32.mrb[19].mxu1 }
 0x139   :  { %1945 = vst [vmem:[%s3017_s4 + $0x20] sm:$0xff] %v1805_v41   ;;  %v1564_v53 = vadd.f32 %v1563_v37, %v1501_v45 }
 0x13a   :  { %1961 = vst [vmem:[%s3017_s4 + $0xa0] sm:$0xff] %v1885_v56  }
 0x13c   :  { %v887_v61 = vpop.f32.mrb[20].mxu0 }
 0x13d   :  { %v1431_v63 = vadd.f32 %v1430_v42, %v887_v61  ;;  %v1502_v31 = vmul.f32 %v887_v61, %v887_v61  ;;  %v889_v59 = vpop.f32.mrb[21].mxu0  ;;  %v2779_v6 = vpop.f32.mrb[20].mxu1 }
 0x13e   :  { %v890_v1 = vpop.f32.mrb[22].mxu0  ;;  %v1017_v8 = vpop.f32.mrb[21].mxu1 }
 0x13f   :  { %v1565_v3 = vadd.f32 %v1564_v53, %v1502_v31  ;;  %v1810_v38 = vpack.c.bf16 %v890_v1, %v887_v61  ;;  %v1432_v4 = vadd.f32 %v1431_v63, %v890_v1  ;;  %v1503_v23 = vmul.f32 %v890_v1, %v890_v1  ;;  %v892_v55 = vpop.f32.mrb[23].mxu0  ;;  %v2784_v46 = vpop.f32.mrb[22].mxu1 }
 0x140   :  { %v1890_v62 = vpack.c.bf16 %v2784_v46, %v2779_v6  ;;  %v1020_v10 = vpop.f32.mrb[23].mxu1 }
 0x141   :  { %1946 = vst [vmem:[%s3017_s4 + $0x28] sm:$0xff] %v1810_v38   ;;  %v1566_v7 = vadd.f32 %v1565_v3, %v1503_v23 }
 0x142   :  { %1962 = vst [vmem:[%s3017_s4 + $0xa8] sm:$0xff] %v1890_v62  }
 0x144   :  { %v895_v11 = vpop.f32.mrb[24].mxu0 }
 0x145   :  { %v1433_v14 = vadd.f32 %v1432_v4, %v895_v11  ;;  %v1504_v43 = vmul.f32 %v895_v11, %v895_v11  ;;  %v897_v18 = vpop.f32.mrb[25].mxu0 }
 0x146   :  { %v898_v12 = vpop.f32.mrb[26].mxu0 }
 0x147   :  { %v1567_v44 = vadd.f32 %v1566_v7, %v1504_v43  ;;  %v1815_v19 = vpack.c.bf16 %v898_v12, %v895_v11  ;;  %v1434_v20 = vadd.f32 %v1433_v14, %v898_v12  ;;  %v1505_v51 = vmul.f32 %v898_v12, %v898_v12  ;;  %v900_v36 = vpop.f32.mrb[27].mxu0  ;;  %v2794_v22 = vpop.f32.mrb[24].mxu1 }
 0x148   :  { %v1025_v25 = vpop.f32.mrb[25].mxu1 }
 0x149   :  { %1947 = vst [vmem:[%s3017_s4 + $0x30] sm:$0xff] %v1815_v19   ;;  %v1568_v16 = vadd.f32 %v1567_v44, %v1505_v51  ;;  %v2796_v21 = vpop.f32.mrb[26].mxu1 }
 0x14a   :  { %v1895_v2 = vpack.c.bf16 %v2796_v21, %v2794_v22  ;;  %v1028_v57 = vpop.f32.mrb[27].mxu1 }
 0x14c   :  { %v903_v24 = vpop.f32.mrb[28].mxu0  ;;  %1963 = vst [vmem:[%s3017_s4 + $0xb0] sm:$0xff] %v1895_v2  }
 0x14d   :  { %v1435_v26 = vadd.f32 %v1434_v20, %v903_v24  ;;  %v1506_v52 = vmul.f32 %v903_v24, %v903_v24  ;;  %v905_v60 = vpop.f32.mrb[29].mxu0 }
 0x14e   :  { %v906_v9 = vpop.f32.mrb[30].mxu0 }
 0x14f   :  { %v1569_v0 = vadd.f32 %v1568_v16, %v1506_v52  ;;  %v1820_v39 = vpack.c.bf16 %v906_v9, %v903_v24  ;;  %v1436_v27 = vadd.f32 %v1435_v26, %v906_v9  ;;  %v1507_v29 = vmul.f32 %v906_v9, %v906_v9  ;;  %v908_v35 = vpop.f32.mrb[31].mxu0  ;;  %v2806_v32 = vpop.f32.mrb[28].mxu1 }
 0x150   :  { %v1033_v33 = vpop.f32.mrb[29].mxu1 }
 0x151   :  { %1948 = vst [vmem:[%s3017_s4 + $0x38] sm:$0xff] %v1820_v39   ;;  %v1570_v30 = vadd.f32 %v1569_v0, %v1507_v29  ;;  %v2808_v41 = vpop.f32.mrb[30].mxu1 }
 0x152   :  { %v1900_v50 = vpack.c.bf16 %v2808_v41, %v2806_v32  ;;  %v1036_v53 = vpop.f32.mrb[31].mxu1 }
 0x154   :  { %v911_v37 = vpop.f32.mrb[32].mxu0  ;;  %1964 = vst [vmem:[%s3017_s4 + $0xb8] sm:$0xff] %v1900_v50  }
 0x155   :  { %v1437_v42 = vadd.f32 %v1436_v27, %v911_v37  ;;  %v1508_v45 = vmul.f32 %v911_v37, %v911_v37  ;;  %v913_v48 = vpop.f32.mrb[33].mxu0 }
 0x156   :  { %v914_v56 = vpop.f32.mrb[34].mxu0 }
 0x157   :  { %v1571_v58 = vadd.f32 %v1570_v30, %v1508_v45  ;;  %v1825_v61 = vpack.c.bf16 %v914_v56, %v911_v37  ;;  %v1438_v63 = vadd.f32 %v1437_v42, %v914_v56  ;;  %v1509_v31 = vmul.f32 %v914_v56, %v914_v56  ;;  %v916_v59 = vpop.f32.mrb[35].mxu0 }
 0x158   :  { %v2818_v3 = vpop.f32.mrb[32].mxu1 }
 0x159   :  { %1949 = vst [vmem:[%s3017_s4 + $0x40] sm:$0xff] %v1825_v61   ;;  %v1572_v1 = vadd.f32 %v1571_v58, %v1509_v31  ;;  %v1041_v4 = vpop.f32.mrb[33].mxu1 }
 0x15a   :  { %v2820_v8 = vpop.f32.mrb[34].mxu1 }
 0x15b   :  { %v1905_v10 = vpack.c.bf16 %v2820_v8, %v2818_v3  ;;  %v1044_v11 = vpop.f32.mrb[35].mxu1 }
 0x15c   :  { %v919_v38 = vpop.f32.mrb[36].mxu0 }
 0x15d   :  { %v1439_v23 = vadd.f32 %v1438_v63, %v919_v38  ;;  %v1510_v55 = vmul.f32 %v919_v38, %v919_v38  ;;  %v921_v7 = vpop.f32.mrb[37].mxu0  ;;  %1965 = vst [vmem:[%s3017_s4 + $0xc0] sm:$0xff] %v1905_v10  }
 0x15e   :  { %v922_v62 = vpop.f32.mrb[38].mxu0 }
 0x15f   :  { %v1573_v14 = vadd.f32 %v1572_v1, %v1510_v55  ;;  %v1830_v43 = vpack.c.bf16 %v922_v62, %v919_v38  ;;  %v1440_v18 = vadd.f32 %v1439_v23, %v922_v62  ;;  %v1511_v12 = vmul.f32 %v922_v62, %v922_v62  ;;  %v924_v44 = vpop.f32.mrb[39].mxu0 }
 0x160   :  { %v2830_v20 = vpop.f32.mrb[36].mxu1 }
 0x161   :  { %1950 = vst [vmem:[%s3017_s4 + $0x48] sm:$0xff] %v1830_v43   ;;  %v1574_v19 = vadd.f32 %v1573_v14, %v1511_v12  ;;  %v1049_v36 = vpop.f32.mrb[37].mxu1 }
 0x162   :  { %v2832_v2 = vpop.f32.mrb[38].mxu1 }
 0x163   :  { %v1910_v26 = vpack.c.bf16 %v2832_v2, %v2830_v20  ;;  %v1052_v52 = vpop.f32.mrb[39].mxu1 }
 0x164   :  { %v927_v51 = vpop.f32.mrb[40].mxu0 }
 0x165   :  { %v1441_v16 = vadd.f32 %v1440_v18, %v927_v51  ;;  %v1512_v25 = vmul.f32 %v927_v51, %v927_v51  ;;  %v929_v24 = vpop.f32.mrb[41].mxu0  ;;  %1966 = vst [vmem:[%s3017_s4 + $0xc8] sm:$0xff] %v1910_v26  }
 0x166   :  { %v930_v57 = vpop.f32.mrb[42].mxu0 }
 0x167   :  { %v1575_v60 = vadd.f32 %v1574_v19, %v1512_v25  ;;  %v1835_v9 = vpack.c.bf16 %v930_v57, %v927_v51  ;;  %v1442_v0 = vadd.f32 %v1441_v16, %v930_v57  ;;  %v1513_v39 = vmul.f32 %v930_v57, %v930_v57  ;;  %v932_v27 = vpop.f32.mrb[43].mxu0 }
 0x168   :  { %v2842_v35 = vpop.f32.mrb[40].mxu1 }
 0x169   :  { %1951 = vst [vmem:[%s3017_s4 + $0x50] sm:$0xff] %v1835_v9   ;;  %v1576_v29 = vadd.f32 %v1575_v60, %v1513_v39  ;;  %v1057_v33 = vpop.f32.mrb[41].mxu1 }
 0x16a   :  { %v2844_v48 = vpop.f32.mrb[42].mxu1 }
 0x16b   :  { %v1915_v53 = vpack.c.bf16 %v2844_v48, %v2842_v35  ;;  %v1060_v56 = vpop.f32.mrb[43].mxu1 }
 0x16c   :  { %v935_v30 = vpop.f32.mrb[44].mxu0 }
 0x16d   :  { %v1443_v37 = vadd.f32 %v1442_v0, %v935_v30  ;;  %v1514_v42 = vmul.f32 %v935_v30, %v935_v30  ;;  %v937_v45 = vpop.f32.mrb[45].mxu0  ;;  %1967 = vst [vmem:[%s3017_s4 + $0xd0] sm:$0xff] %v1915_v53  }
 0x16e   :  { %v938_v50 = vpop.f32.mrb[46].mxu0 }
 0x16f   :  { %v1577_v58 = vadd.f32 %v1576_v29, %v1514_v42  ;;  %v1840_v61 = vpack.c.bf16 %v938_v50, %v935_v30  ;;  %v1444_v63 = vadd.f32 %v1443_v37, %v938_v50  ;;  %v1515_v31 = vmul.f32 %v938_v50, %v938_v50  ;;  %v940_v59 = vpop.f32.mrb[47].mxu0 }
 0x170   :  { %v2854_v38 = vpop.f32.mrb[44].mxu1 }
 0x171   :  { %1952 = vst [vmem:[%s3017_s4 + $0x58] sm:$0xff] %v1840_v61   ;;  %v1578_v1 = vadd.f32 %v1577_v58, %v1515_v31  ;;  %v1065_v23 = vpop.f32.mrb[45].mxu1 }
 0x172   :  { %v2856_v10 = vpop.f32.mrb[46].mxu1 }
 0x173   :  { %v1920_v14 = vpack.c.bf16 %v2856_v10, %v2854_v38  ;;  %v1068_v43 = vpop.f32.mrb[47].mxu1 }
 0x174   :  { %v943_v4 = vpop.f32.mrb[48].mxu0 }
 0x175   :  { %v1445_v55 = vadd.f32 %v1444_v63, %v943_v4  ;;  %v1516_v7 = vmul.f32 %v943_v4, %v943_v4  ;;  %v945_v62 = vpop.f32.mrb[49].mxu0  ;;  %1968 = vst [vmem:[%s3017_s4 + $0xd8] sm:$0xff] %v1920_v14  }
 0x176   :  { %v946_v11 = vpop.f32.mrb[50].mxu0 }
 0x177   :  { %v1579_v18 = vadd.f32 %v1578_v1, %v1516_v7  ;;  %v1845_v12 = vpack.c.bf16 %v946_v11, %v943_v4  ;;  %v1446_v44 = vadd.f32 %v1445_v55, %v946_v11  ;;  %v1517_v19 = vmul.f32 %v946_v11, %v946_v11  ;;  %v948_v51 = vpop.f32.mrb[51].mxu0 }
 0x178   :  { %v2866_v16 = vpop.f32.mrb[48].mxu1 }
 0x179   :  { %1953 = vst [vmem:[%s3017_s4 + $0x60] sm:$0xff] %v1845_v12   ;;  %v1580_v36 = vadd.f32 %v1579_v18, %v1517_v19  ;;  %v1073_v24 = vpop.f32.mrb[49].mxu1 }
 0x17a   :  { %v2868_v60 = vpop.f32.mrb[50].mxu1 }
 0x17b   :  { %v1925_v0 = vpack.c.bf16 %v2868_v60, %v2866_v16  ;;  %v1076_v39 = vpop.f32.mrb[51].mxu1 }
 0x17c   :  { %v951_v25 = vpop.f32.mrb[52].mxu0  ;;  %v1524_v39 = vmul.f32 %v2719_v34, %v2719_v34 }
 0x17d   :  { %v1447_v57 = vadd.f32 %v1446_v44, %v951_v25  ;;  %v1518_v26 = vmul.f32 %v951_v25, %v951_v25  ;;  %v953_v52 = vpop.f32.mrb[53].mxu0  ;;  %1969 = vst [vmem:[%s3017_s4 + $0xe0] sm:$0xff] %v1925_v0  }
 0x17e   :  { %v954_v9 = vpop.f32.mrb[54].mxu0 }
 0x17f   :  { %v1581_v27 = vadd.f32 %v1580_v36, %v1518_v26  ;;  %v1850_v29 = vpack.c.bf16 %v954_v9, %v951_v25  ;;  %v1448_v30 = vadd.f32 %v1447_v57, %v954_v9  ;;  %v1519_v33 = vmul.f32 %v954_v9, %v954_v9  ;;  %v956_v37 = vpop.f32.mrb[55].mxu0 }
 0x180   :  { %v2878_v45 = vpop.f32.mrb[52].mxu1 }
 0x181   :  { %1954 = vst [vmem:[%s3017_s4 + $0x68] sm:$0xff] %v1850_v29   ;;  %v1582_v42 = vadd.f32 %v1581_v27, %v1519_v33  ;;  %v1081_v53 = vpop.f32.mrb[53].mxu1 }
 0x182   :  { %v2880_v63 = vpop.f32.mrb[54].mxu1  ;;  %v1526_v53 = vmul.f32 %v2731_v28, %v2731_v28 }
 0x183   :  { %v1930_v59 = vpack.c.bf16 %v2880_v63, %v2878_v45  ;;  %v1084_v1 = vpop.f32.mrb[55].mxu1 }
 0x184   :  { %v959_v50 = vpop.f32.mrb[56].mxu0 }
 0x185   :  { %v1449_v56 = vadd.f32 %v1448_v30, %v959_v50  ;;  %v1520_v58 = vmul.f32 %v959_v50, %v959_v50  ;;  %v961_v61 = vpop.f32.mrb[57].mxu0  ;;  %1970 = vst [vmem:[%s3017_s4 + $0xe8] sm:$0xff] %v1930_v59   ;;  %v1525_v30 = vmul.f32 %v2721_v15, %v2721_v15  ;;  %v1527_v59 = vmul.f32 %v2733_v5, %v2733_v5 }
 0x186   :  { %v962_v31 = vpop.f32.mrb[58].mxu0 }
 0x187   :  { %v1583_v4 = vadd.f32 %v1582_v42, %v1520_v58  ;;  %v1855_v23 = vpack.c.bf16 %v962_v31, %v959_v50  ;;  %v1450_v55 = vadd.f32 %v1449_v56, %v962_v31  ;;  %v1521_v7 = vmul.f32 %v962_v31, %v962_v31  ;;  %v964_v62 = vpop.f32.mrb[59].mxu0 }
 0x188   :  { %v2890_v14 = vpop.f32.mrb[56].mxu1 }
 0x189   :  { %1955 = vst [vmem:[%s3017_s4 + $0x70] sm:$0xff] %v1855_v23   ;;  %v1584_v11 = vadd.f32 %v1583_v4, %v1521_v7  ;;  %v1089_v18 = vpop.f32.mrb[57].mxu1 }
 0x18a   :  { %v2892_v51 = vpop.f32.mrb[58].mxu1  ;;  %v1531_v18 = vmul.f32 %v2757_v17, %v2757_v17 }
 0x18b   :  { %v1935_v25 = vpack.c.bf16 %v2892_v51, %v2890_v14  ;;  %v1092_v24 = vpop.f32.mrb[59].mxu1 }
 0x18c   :  { %v967_v43 = vpop.f32.mrb[60].mxu0 }
 0x18d   :  { %v1451_v12 = vadd.f32 %v1450_v55, %v967_v43  ;;  %v1522_v44 = vmul.f32 %v967_v43, %v967_v43  ;;  %v969_v19 = vpop.f32.mrb[61].mxu0  ;;  %1971 = vst [vmem:[%s3017_s4 + $0xf0] sm:$0xff] %v1935_v25   ;;  %v1529_v55 = vmul.f32 %v2745_v49, %v2745_v49 }
 0x18e   :  { %v970_v36 = vpop.f32.mrb[62].mxu0 }
 0x18f   :  { %v1585_v57 = vadd.f32 %v1584_v11, %v1522_v44  ;;  %v1860_v26 = vpack.c.bf16 %v970_v36, %v967_v43  ;;  %v1452_v52 = vadd.f32 %v1451_v12, %v970_v36  ;;  %v1523_v9 = vmul.f32 %v970_v36, %v970_v36  ;;  %v972_v0 = vpop.f32.mrb[63].mxu0 }
 0x190   :  { %v2908_v42 = vpop.f32.mrb[60].mxu1 }
 0x191   :  { %1956 = vst [vmem:[%s3017_s4 + $0x78] sm:$0xff] %v1860_v26   ;;  %v1453_v27 = vadd.f32 %v1452_v52, %v2719_v34  ;;  %v1586_v29 = vadd.f32 %v1585_v57, %v1523_v9  ;;  %v1097_v50 = vpop.f32.mrb[61].mxu1 }
 0x192   :  { %v2913_v61 = vpop.f32.mrb[62].mxu1 }
 0x193   :  { %v1454_v33 = vadd.f32 %v1453_v27, %v2721_v15  ;;  %v1587_v37 = vadd.f32 %v1586_v29, %v1524_v39  ;;  %v1940_v34 = vpack.c.bf16 %v2913_v61, %v2908_v42  ;;  %v1100_v31 = vpop.f32.mrb[63].mxu1 }
 0x195   :  { %v1455_v56 = vadd.f32 %v1454_v33, %v2731_v28  ;;  %v1588_v58 = vadd.f32 %v1587_v37, %v1525_v30  ;;  %1972 = vst [vmem:[%s3017_s4 + $0xf8] sm:$0xff] %v1940_v34   ;;  %v1528_v28 = vmul.f32 %v2743_v13, %v2743_v13  ;;  %v1541_v34 = vmul.f32 %v2820_v8, %v2820_v8 }
 0x197   :  { %v1456_v15 = vadd.f32 %v1455_v56, %v2733_v5  ;;  %v1589_v1 = vadd.f32 %v1588_v58, %v1526_v53  ;;  %v1530_v5 = vmul.f32 %v2755_v40, %v2755_v40  ;;  %v1540_v53 = vmul.f32 %v2818_v3, %v2818_v3 }
 0x199   :  { %v1457_v4 = vadd.f32 %v1456_v15, %v2743_v13  ;;  %v1590_v23 = vadd.f32 %v1589_v1, %v1527_v59  ;;  %v1532_v13 = vmul.f32 %v2767_v47, %v2767_v47  ;;  %v1542_v59 = vmul.f32 %v2830_v20, %v2830_v20 }
 0x19a   :  { %v1543_v1 = vmul.f32 %v2832_v2, %v2832_v2 }
 0x19b   :  { %v1458_v7 = vadd.f32 %v1457_v4, %v2745_v49  ;;  %v1591_v62 = vadd.f32 %v1590_v23, %v1528_v28  ;;  %v1533_v49 = vmul.f32 %v2772_v54, %v2772_v54  ;;  %v1544_v4 = vmul.f32 %v2842_v35, %v2842_v35 }
 0x19d   :  { %v1459_v11 = vadd.f32 %v1458_v7, %v2755_v40  ;;  %v1592_v43 = vadd.f32 %v1591_v62, %v1529_v55  ;;  %v1534_v40 = vmul.f32 %v2779_v6, %v2779_v6  ;;  %v1545_v55 = vmul.f32 %v2844_v48, %v2844_v48 }
 0x19e   :  { %v1546_v62 = vmul.f32 %v2854_v38, %v2854_v38 }
 0x19f   :  { %v1460_v12 = vadd.f32 %v1459_v11, %v2757_v17  ;;  %v1593_v44 = vadd.f32 %v1592_v43, %v1530_v5  ;;  %v1535_v17 = vmul.f32 %v2784_v46, %v2784_v46  ;;  %v1547_v11 = vmul.f32 %v2856_v10, %v2856_v10 }
 0x1a1   :  { %v1594_v19 = vadd.f32 %v1593_v44, %v1531_v18  ;;  %v1461_v36 = vadd.f32 %v1460_v12, %v2767_v47  ;;  %v1536_v47 = vmul.f32 %v2794_v22, %v2794_v22  ;;  %v1548_v18 = vmul.f32 %v2866_v16, %v2866_v16 }
 0x1a2   :  { %v1549_v44 = vmul.f32 %v2868_v60, %v2868_v60 }
 0x1a3   :  { %v1462_v25 = vadd.f32 %v1461_v36, %v2772_v54  ;;  %v1595_v24 = vadd.f32 %v1594_v19, %v1532_v13  ;;  %v1537_v54 = vmul.f32 %v2796_v21, %v2796_v21  ;;  %v1550_v19 = vmul.f32 %v2878_v45, %v2878_v45 }
 0x1a5   :  { %v1463_v57 = vadd.f32 %v1462_v25, %v2779_v6  ;;  %v1596_v26 = vadd.f32 %v1595_v24, %v1533_v49  ;;  %v1538_v6 = vmul.f32 %v2806_v32, %v2806_v32  ;;  %v1551_v49 = vmul.f32 %v2880_v63, %v2880_v63 }
 0x1a6   :  { %v1552_v24 = vmul.f32 %v2890_v14, %v2890_v14 }
 0x1a7   :  { %v1464_v52 = vadd.f32 %v1463_v57, %v2784_v46  ;;  %v1597_v9 = vadd.f32 %v1596_v26, %v1534_v40  ;;  %v1539_v46 = vmul.f32 %v2808_v41, %v2808_v41  ;;  %v1553_v57 = vmul.f32 %v2892_v51, %v2892_v51 }
 0x1a9   :  { %v1465_v0 = vadd.f32 %v1464_v52, %v2794_v22  ;;  %v1598_v39 = vadd.f32 %v1597_v9, %v1535_v17  ;;  %v1555_v9 = vmul.f32 %v2913_v61, %v2913_v61 }
 0x1ab   :  { %v1466_v27 = vadd.f32 %v1465_v0, %v2796_v21  ;;  %v1599_v29 = vadd.f32 %v1598_v39, %v1536_v47 }
 0x1ad   :  { %v1467_v30 = vadd.f32 %v1466_v27, %v2806_v32  ;;  %v1600_v33 = vadd.f32 %v1599_v29, %v1537_v54 }
 0x1af   :  { %v1468_v37 = vadd.f32 %v1467_v30, %v2808_v41  ;;  %v1601_v50 = vadd.f32 %v1600_v33, %v1538_v6 }
 0x1b1   :  { %v1469_v22 = vadd.f32 %v1468_v37, %v2818_v3  ;;  %v1602_v56 = vadd.f32 %v1601_v50, %v1539_v46 }
 0x1b3   :  { %v1603_v21 = vadd.f32 %v1602_v56, %v1540_v53  ;;  %v1470_v58 = vadd.f32 %v1469_v22, %v2820_v8 }
 0x1b5   :  { %v1604_v32 = vadd.f32 %v1603_v21, %v1541_v34  ;;  %v1471_v31 = vadd.f32 %v1470_v58, %v2830_v20 }
 0x1b7   :  { %v1605_v41 = vadd.f32 %v1604_v32, %v1542_v59  ;;  %v1472_v15 = vadd.f32 %v1471_v31, %v2832_v2 }
 0x1b9   :  { %v1606_v3 = vadd.f32 %v1605_v41, %v1543_v1  ;;  %v1473_v28 = vadd.f32 %v1472_v15, %v2842_v35 }
 0x1bb   :  { %v1607_v23 = vadd.f32 %v1606_v3, %v1544_v4  ;;  %v1474_v8 = vadd.f32 %v1473_v28, %v2844_v48 }
 0x1bd   :  { %v1608_v7 = vadd.f32 %v1607_v23, %v1545_v55  ;;  %v1475_v20 = vadd.f32 %v1474_v8, %v2854_v38 }
 0x1bf   :  { %v1609_v5 = vadd.f32 %v1608_v7, %v1546_v62  ;;  %v1476_v2 = vadd.f32 %v1475_v20, %v2856_v10 }
 0x1c1   :  { %v1610_v43 = vadd.f32 %v1609_v5, %v1547_v11  ;;  %v1477_v35 = vadd.f32 %v1476_v2, %v2866_v16 }
 0x1c3   :  { %v1611_v12 = vadd.f32 %v1610_v43, %v1548_v18  ;;  %v1478_v48 = vadd.f32 %v1477_v35, %v2868_v60 }
 0x1c5   :  { %v1612_v13 = vadd.f32 %v1611_v12, %v1549_v44  ;;  %v1479_v38 = vadd.f32 %v1478_v48, %v2878_v45  ;;  %v1554_v45 = vmul.f32 %v2908_v42, %v2908_v42 }
 0x1c7   :  { %v1613_v36 = vadd.f32 %v1612_v13, %v1550_v19  ;;  %v1480_v10 = vadd.f32 %v1479_v38, %v2880_v63 }
 0x1c9   :  { %v1614_v25 = vadd.f32 %v1613_v36, %v1551_v49  ;;  %v1481_v16 = vadd.f32 %v1480_v10, %v2890_v14 }
 0x1cb   :  { %v1615_v40 = vadd.f32 %v1614_v25, %v1552_v24  ;;  %v1482_v60 = vadd.f32 %v1481_v16, %v2892_v51 }
 0x1cd   :  { %v1616_v26 = vadd.f32 %v1615_v40, %v1553_v57  ;;  %v1483_v17 = vadd.f32 %v1482_v60, %v2908_v42 }
 0x1cf   :  { %v1617_v52 = vadd.f32 %v1616_v26, %v1554_v45  ;;  %v1484_v63 = vadd.f32 %v1483_v17, %v2913_v61 }
 0x1d1   :  { %v1485_v47 = vrot.slane %v1484_v63, 4  ;;  %v1618_v14 = vadd.f32 %v1617_v52, %v1555_v9 }
 0x1d3   :  { %v1486_v0 = vadd.f32 %v1485_v47, %v1484_v63  ;;  %v1619_v39 = vrot.slane %v1618_v14, 4 }
 0x1d5   :  { %v1487_v54 = vrot.slane %v1486_v0, 2  ;;  %v1620_v27 = vadd.f32 %v1619_v39, %v1618_v14 }
 0x1d7   :  { %v1488_v29 = vadd.f32 %v1487_v54, %v1486_v0  ;;  %v1621_v51 = vrot.slane %v1620_v27, 2 }
 0x1d9   :  { %v1489_v6 = vrot.slane %v1488_v29, 1  ;;  %v1622_v30 = vadd.f32 %v1621_v51, %v1620_v27 }
 0x1db   :  { %v1490_v33 = vadd.f32 %v1489_v6, %v1488_v29  ;;  %v1623_v46 = vrot.slane %v1622_v30, 1 }
 0x1dd   :  { %1491 = vst [vmem:[%s3018_s5] sm:$0xff] %v1490_v33  ;;  %v1624_v42 = vadd.f32 %v1623_v46, %v1622_v30 }
 0x1df   :  { %1625 = vst [vmem:[%s3019_s6] sm:$0xff] %v1624_v42 }

</bundles_post_ra>
